<compile_context>
chip_gen: v6e
topology: v6e:2x2x1
jax: 0.10.0
libtpu: 0.0.40
codegen_flags: <defaults>
</compile_context>

<pallas_src>
import functools

import jax
import jax.numpy as jnp
import numpy as np
from jax import lax
from jax.experimental import pallas as pl
from jax.experimental.pallas import tpu as pltpu

# LeNet5 geometry (fixed by the PyTorch module: 1x28x28 input).
KH = KW = 5
H_IN = W_IN = 28
PAD = 2                       # int((32 - 28) / 2)
C1_OUT, C2_OUT = 6, 16
H1 = W1 = 28                  # conv1 output spatial
H1P = W1P = 14                # after avg_pool2d(2, 2)
H2 = W2 = 10                  # conv2 output spatial
H2P = W2P = 5                 # after avg_pool2d(2, 2)
FC1, FC2, FC3 = 120, 84, 10
FC1P = FC2P = FC3P = 128      # lane-dense FC head
ROW1 = W1 * C1_OUT            # 168 : conv1 row, flattened (w, c)
ROW2 = W2 * C2_OUT            # 160 : conv2 row, flattened (w, c)
HP = H_IN + 2 * PAD           # 32  : padded input width
K1 = KH * HP                  # 160 : conv1 contraction depth (kh taps concatenated)


def lenet5_kernel(x1_ref, w1_ref, b1_ref, w2_ref, b2_ref, m2_ref,
                  fc1b_ref, fc2w_ref, fc2b_ref, fc3w_ref, fc3b_ref,
                  out_ref, v1_ref, a2_ref):
    bt = x1_ref.shape[1]
    f32 = jnp.float32
    bf16 = jnp.bfloat16

    # ---- conv1 -> tanh : ONE MXU matmul, K = 160 (kh taps pre-concatenated) ----
    lhs1 = x1_ref[...].reshape(H1 * bt, K1)                      # free merge (bt % 16 == 0)
    acc1 = jnp.dot(lhs1, w1_ref[...], preferred_element_type=f32)    # (28*bt, 168) f32
    y1 = jnp.tanh(acc1 + b1_ref[...]).reshape(H1P, 2, bt, ROW1)

    # ---- pool1, vertical half (horizontal half + 0.25 folded into w2_ref) ----
    v1_ref[...] = (y1[:, 0] + y1[:, 1]).astype(bf16)             # (14, bt, 168)

    # ---- conv2 -> tanh : 5 banded MXU matmuls (K = 168 each) ----
    acc2 = jnp.dot(v1_ref[0:H2, :, :].reshape(H2 * bt, ROW1), w2_ref[0],
                   preferred_element_type=f32)
    for kh in range(1, KH):
        acc2 = acc2 + jnp.dot(v1_ref[kh:kh + H2, :, :].reshape(H2 * bt, ROW1),
                              w2_ref[kh], preferred_element_type=f32)
    a2_ref[...] = jnp.tanh(acc2 + b2_ref[...]).astype(bf16).reshape(H2, bt, ROW2)

    # ---- fc1 (pool2 + 0.25 + NCHW flatten folded into m2_ref) -> tanh ----
    h1 = jnp.dot(a2_ref[0], m2_ref[0], preferred_element_type=f32)
    for h2 in range(1, H2):
        h1 = h1 + jnp.dot(a2_ref[h2], m2_ref[h2], preferred_element_type=f32)
    h1 = jnp.tanh(h1 + fc1b_ref[...])                            # (bt, 128) f32

    # ---- fc2 -> tanh, fc3 (128-lane padded) -> softmax, all f32 ----
    h2a = jnp.tanh(jnp.dot(h1, fc2w_ref[...], preferred_element_type=f32)
                   + fc2b_ref[...])
    logits = jnp.dot(h2a, fc3w_ref[...], preferred_element_type=f32) + fc3b_ref[...]
    m = jnp.max(logits, axis=-1, keepdims=True)
    e = jnp.exp(logits - m)                        # padded lanes: exp(-1e30 - m) == 0
    out_ref[...] = e / jnp.sum(e, axis=-1, keepdims=True)


def _prep_params(p):
    """Host/XLA-side weight preprocessing (banded conv matrices, pool/flatten folds)."""
    f32 = jnp.float32
    bf16 = jnp.bfloat16
    w1 = p["conv1_w"].astype(f32)                     # (6, 1, 5, 5)  (cout, cin, kh, kw)
    w2 = p["conv2_w"].astype(f32)                     # (16, 6, 5, 5)

    # conv1 kh-concatenated banded weights: w1cat[kh*32 + wi, 6*w + c] = w1[c, 0, kh, wi - w].
    w1_khkwc = jnp.transpose(w1[:, 0, :, :], (1, 2, 0))            # (kh, kw, c)
    w1b = jnp.zeros((KH, HP, ROW1), f32)
    for w in range(W1):
        w1b = w1b.at[:, w:w + KW, C1_OUT * w:C1_OUT * (w + 1)].set(w1_khkwc)
    w1cat = w1b.reshape(K1, ROW1).astype(bf16)                     # (160, 168)
    b1row = jnp.tile(p["conv1_b"].astype(f32), W1).reshape(1, ROW1)

    # conv2 banded weights with pool1's horizontal average (x 1/4) folded in:
    #   w2b[kh][6*w1i + ci, 16*w2o + co] = 0.25 * w2[co, ci, kh, w1i//2 - w2o]
    w2_khkwcico = jnp.transpose(w2, (2, 3, 1, 0))                  # (kh, kw, ci, co)
    w2b = jnp.zeros((KH, ROW1, ROW2), f32)
    for w2o in range(W2):
        for kw in range(KW):
            for par in range(2):
                w1i = 2 * (w2o + kw) + par
                w2b = w2b.at[:, C1_OUT * w1i:C1_OUT * (w1i + 1),
                             C2_OUT * w2o:C2_OUT * (w2o + 1)].set(
                                 0.25 * w2_khkwcico[:, kw, :, :])
    w2b = w2b.astype(bf16)
    b2row = jnp.tile(p["conv2_b"].astype(f32), W2).reshape(1, ROW2)

    # fc1 with pool2 (both directions, x 1/4) and PyTorch's NCHW flatten fold:
    #   m2[h2][16*w2 + c, :] = 0.25 * fc1_w.T[c*25 + (h2//2)*5 + (w2//2), :]
    fc1_wT = p["fc1_w"].astype(f32).T                              # (400, 120)
    idx = np.empty((H2, ROW2), dtype=np.int32)
    for h2 in range(H2):
        for w2o in range(W2):
            for c in range(C2_OUT):
                idx[h2, w2o * C2_OUT + c] = c * (H2P * W2P) + (h2 // 2) * W2P + (w2o // 2)
    m2_raw = 0.25 * fc1_wT[jnp.asarray(idx)]                       # (10, 160, 120)
    m2 = jnp.zeros((H2, ROW2, FC1P), f32).at[:, :, :FC1].set(m2_raw).astype(bf16)
    fc1b = jnp.zeros((1, FC1P), f32).at[0, :FC1].set(p["fc1_b"].astype(f32))

    # FC head padded to 128 lanes everywhere (zero weights/bias in the padding, except
    # fc3's bias padding = -1e30 so padded softmax probabilities are exactly 0).
    fc2w = jnp.zeros((FC1P, FC2P), f32).at[:FC1, :FC2].set(p["fc2_w"].astype(f32).T)
    fc2b = jnp.zeros((1, FC2P), f32).at[0, :FC2].set(p["fc2_b"].astype(f32))
    fc3w = jnp.zeros((FC2P, FC3P), f32).at[:FC2, :FC3].set(p["fc3_w"].astype(f32).T)
    fc3b = jnp.full((1, FC3P), -1e30, f32).at[0, :FC3].set(p["fc3_b"].astype(f32))

    return (w1cat, b1row, w2b, b2row, m2, fc1b, fc2w, fc2b, fc3w, fc3b)


def _round_up(n, m):
    return ((n + m - 1) // m) * m


@functools.partial(jax.jit, static_argnames=("batch_tile",))
def lenet5_forward(x_nchw, params, *, batch_tile=128):
    """LeNet5 forward: (B, 1, 28, 28) f32 -> (B, 10) softmax probabilities."""
    B = x_nchw.shape[0]
    assert x_nchw.shape[1:] == (1, H_IN, W_IN)
    weights = _prep_params(params)

    # Batch tile: multiple of 16 (bf16 sublane packing), capped at `batch_tile`, and
    # chosen so the 1-D grid has >= 2 steps when the batch allows it (both v7x cores).
    bt = min(batch_tile, max(16, _round_up((_round_up(B, 16) + 1) // 2, 16)))
    bt = _round_up(bt, 16)
    Bp = _round_up(B, bt)
    nb = Bp // bt

    # Input prep in the wrapper (cheap XLA ops, overlapped by the pipeline):
    # zero pad (pad=2) + batch pad, put batch on the sublane axis, and concatenate the
    # 5 kh taps along lanes -> im2row of shape (28, Bp, 160) in bf16.
    x = x_nchw.astype(jnp.float32).reshape(B, H_IN, W_IN)
    xpad = jnp.pad(x, ((0, Bp - B), (PAD, PAD), (PAD, PAD)))          # (Bp, 32, 32)
    win = np.arange(H1)[:, None] + np.arange(KH)[None, :]             # (28, 5) static
    x1 = jnp.transpose(xpad[:, win, :], (1, 0, 2, 3))                 # (28, Bp, 5, 32)
    x1 = x1.reshape(H1, Bp, K1).astype(jnp.bfloat16)                  # (28, Bp, 160)

    def const_spec(shape):
        return pl.BlockSpec(shape, lambda i: (0,) * len(shape))

    out = pl.pallas_call(
        lenet5_kernel,
        out_shape=jax.ShapeDtypeStruct((Bp, FC3P), jnp.float32),
        grid_spec=pltpu.PrefetchScalarGridSpec(
            num_scalar_prefetch=0,
            grid=(nb,),
            in_specs=[
                pl.BlockSpec((H1, bt, K1), lambda i: (0, i, 0)),   # im2row input tile
                const_spec((K1, ROW1)),                            # conv1 weights (kh-concat)
                const_spec((1, ROW1)),                             # conv1 bias row
                const_spec((KH, ROW1, ROW2)),                      # conv2 band (+pool1 h)
                const_spec((1, ROW2)),                             # conv2 bias row
                const_spec((H2, ROW2, FC1P)),                      # fc1 (+pool2+flatten)
                const_spec((1, FC1P)),                             # fc1 bias (padded)
                const_spec((FC1P, FC2P)),                          # fc2 weight (padded)
                const_spec((1, FC2P)),                             # fc2 bias (padded)
                const_spec((FC2P, FC3P)),                          # fc3 weight (padded)
                const_spec((1, FC3P)),                             # fc3 bias (padded)
            ],
            out_specs=pl.BlockSpec((bt, FC3P), lambda i: (i, 0)),
            scratch_shapes=[
                pltpu.VMEM((H1P, bt, ROW1), jnp.bfloat16),   # vertically pooled conv1 rows
                pltpu.VMEM((H2, bt, ROW2), jnp.bfloat16),    # conv2 tanh activations
            ],
        ),
        compiler_params=pltpu.CompilerParams(
            dimension_semantics=("parallel",),
            # Raise the scoped-VMEM cap for large tiles; 48 MiB stays under v7x's
            # 64 MiB physical VMEM and is far below v5e/v6e's 128 MiB.
            vmem_limit_bytes=(48 * 1024 * 1024 if bt >= 64 else None)),
    )(x1, *weights)

    return out[:B, :FC3]


def lenet5_reference(x, p):
    """Pure-JAX reference matching the PyTorch forward semantics."""
    dn = ("NCHW", "OIHW", "NCHW")
    y = lax.conv_general_dilated(x, p["conv1_w"], (1, 1),
                                 ((PAD, PAD), (PAD, PAD)), dimension_numbers=dn)
    y = jnp.tanh(y + p["conv1_b"][None, :, None, None])
    b, c, h, w = y.shape
    y = y.reshape(b, c, h // 2, 2, w // 2, 2).mean(axis=(3, 5))
    y = lax.conv_general_dilated(y, p["conv2_w"], (1, 1),
                                 ((0, 0), (0, 0)), dimension_numbers=dn)
    y = jnp.tanh(y + p["conv2_b"][None, :, None, None])
    b, c, h, w = y.shape
    y = y.reshape(b, c, h // 2, 2, w // 2, 2).mean(axis=(3, 5))
    f = y.reshape(b, -1)
    h1 = jnp.tanh(f @ p["fc1_w"].T + p["fc1_b"])
    h2 = jnp.tanh(h1 @ p["fc2_w"].T + p["fc2_b"])
    logits = h2 @ p["fc3_w"].T + p["fc3_b"]
    return jax.nn.softmax(logits, axis=1)


if __name__ == "__main__":
    key = jax.random.PRNGKey(0)
    ks = jax.random.split(key, 11)
    params = {
        "conv1_w": jax.random.normal(ks[0], (C1_OUT, 1, KH, KW), jnp.float32) * 0.2,
        "conv1_b": jax.random.normal(ks[1], (C1_OUT,), jnp.float32) * 0.1,
        "conv2_w": jax.random.normal(ks[2], (C2_OUT, C1_OUT, KH, KW), jnp.float32) * 0.1,
        "conv2_b": jax.random.normal(ks[3], (C2_OUT,), jnp.float32) * 0.1,
        "fc1_w": jax.random.normal(ks[4], (FC1, C2_OUT * H2P * W2P), jnp.float32) * 0.05,
        "fc1_b": jax.random.normal(ks[5], (FC1,), jnp.float32) * 0.05,
        "fc2_w": jax.random.normal(ks[6], (FC2, FC1), jnp.float32) * 0.05,
        "fc2_b": jax.random.normal(ks[7], (FC2,), jnp.float32) * 0.05,
        "fc3_w": jax.random.normal(ks[8], (FC3, FC2), jnp.float32) * 0.05,
        "fc3_b": jax.random.normal(ks[9], (FC3,), jnp.float32) * 0.05,
    }
    # LeNet5's fc1 hard-codes 16*5*5 features, so the input must be 1x28x28.
    x = jax.random.normal(ks[10], (2, 1, H_IN, W_IN), jnp.float32)

    out = jax.block_until_ready(lenet5_forward(x, params))
    ref = jax.block_until_ready(lenet5_reference(x, params))
    # Tolerance relaxed vs. the pure-f32 version: conv1/conv2/fc1 MXU operands are bf16
    # (f32 accumulation); the FC2/FC3/softmax tail stays f32.
    np.testing.assert_allclose(np.asarray(out), np.asarray(ref), atol=1e-2, rtol=1e-2)
    assert out.shape == (2, FC3)
    print("KERNEL_OK")
</pallas_src>

<mosaic_0001>
module attributes {stable_mosaic.version = 11 : i64} {
  func.func @lenet5_kernel(%arg0: i32, %arg1: memref<28x16x160xbf16, #tpu.memory_space<vmem>>, %arg2: memref<160x168xbf16, #tpu.memory_space<vmem>>, %arg3: memref<1x168xf32, #tpu.memory_space<vmem>>, %arg4: memref<5x168x160xbf16, #tpu.memory_space<vmem>>, %arg5: memref<1x160xf32, #tpu.memory_space<vmem>>, %arg6: memref<10x160x128xbf16, #tpu.memory_space<vmem>>, %arg7: memref<1x128xf32, #tpu.memory_space<vmem>>, %arg8: memref<128x128xf32, #tpu.memory_space<vmem>>, %arg9: memref<1x128xf32, #tpu.memory_space<vmem>>, %arg10: memref<128x128xf32, #tpu.memory_space<vmem>>, %arg11: memref<1x128xf32, #tpu.memory_space<vmem>>, %arg12: memref<16x128xf32, #tpu.memory_space<vmem>>, %arg13: memref<14x16x168xbf16, #tpu.memory_space<vmem>>, %arg14: memref<10x16x160xbf16, #tpu.memory_space<vmem>>) attributes {dimension_semantics = [#tpu.dimension_semantics<parallel>], iteration_bounds = array<i64: 1>, scalar_prefetch = 0 : i64, scratch_operands = 2 : i64, tpu.core_type = #tpu.core_type<tc>, window_params = [{transform_indices = @transform_0, window_bounds = array<i64: 28, 16, 160>}, {pipeline_mode = #tpu.pipeline_mode<synchronous>, transform_indices = @transform_1, window_bounds = array<i64: 160, 168>}, {pipeline_mode = #tpu.pipeline_mode<synchronous>, transform_indices = @transform_2, window_bounds = array<i64: 1, 168>}, {pipeline_mode = #tpu.pipeline_mode<synchronous>, transform_indices = @transform_3, window_bounds = array<i64: 5, 168, 160>}, {pipeline_mode = #tpu.pipeline_mode<synchronous>, transform_indices = @transform_4, window_bounds = array<i64: 1, 160>}, {pipeline_mode = #tpu.pipeline_mode<synchronous>, transform_indices = @transform_5, window_bounds = array<i64: 10, 160, 128>}, {pipeline_mode = #tpu.pipeline_mode<synchronous>, transform_indices = @transform_6, window_bounds = array<i64: 1, 128>}, {pipeline_mode = #tpu.pipeline_mode<synchronous>, transform_indices = @transform_7, window_bounds = array<i64: 128, 128>}, {pipeline_mode = #tpu.pipeline_mode<synchronous>, transform_indices = @transform_8, window_bounds = array<i64: 1, 128>}, {pipeline_mode = #tpu.pipeline_mode<synchronous>, transform_indices = @transform_9, window_bounds = array<i64: 128, 128>}, {pipeline_mode = #tpu.pipeline_mode<synchronous>, transform_indices = @transform_10, window_bounds = array<i64: 1, 128>}, {transform_indices = @transform_11, window_bounds = array<i64: 16, 128>}]} {
    %c0 = arith.constant 0 : index
    %c0_0 = arith.constant 0 : index
    %c0_1 = arith.constant 0 : index
    %0 = vector.load %arg1[%c0, %c0_0, %c0_1] : memref<28x16x160xbf16, #tpu.memory_space<vmem>>, vector<28x16x160xbf16>
    %1 = vector.shape_cast %0 : vector<28x16x160xbf16> to vector<448x160xbf16>
    %c0_2 = arith.constant 0 : index
    %c0_3 = arith.constant 0 : index
    %2 = vector.load %arg2[%c0_2, %c0_3] : memref<160x168xbf16, #tpu.memory_space<vmem>>, vector<160x168xbf16>
    %cst = arith.constant dense<0.000000e+00> : vector<448x168xf32>
    %3 = tpu.matmul %1, %2, %cst {dimension_numbers = #tpu.dot_dimension_numbers<[1], [0], [0], [1], [0, 0, 1, 1], [], []>} : vector<448x160xbf16>, vector<160x168xbf16>, vector<448x168xf32> -> vector<448x168xf32>
    %c0_4 = arith.constant 0 : index
    %c0_5 = arith.constant 0 : index
    %4 = vector.load %arg3[%c0_4, %c0_5] : memref<1x168xf32, #tpu.memory_space<vmem>>, vector<1x168xf32>
    %5 = vector.broadcast %4 : vector<1x168xf32> to vector<448x168xf32>
    %6 = arith.addf %3, %5 : vector<448x168xf32>
    %7 = math.tanh %6 : vector<448x168xf32>
    %8 = vector.shape_cast %7 : vector<448x168xf32> to vector<14x2x16x168xf32>
    %9 = vector.extract_strided_slice %8 {offsets = [0, 0, 0, 0], sizes = [14, 1, 16, 168], strides = [1, 1, 1, 1]} : vector<14x2x16x168xf32> to vector<14x1x16x168xf32>
    %10 = vector.shape_cast %9 : vector<14x1x16x168xf32> to vector<14x16x168xf32>
    %11 = vector.extract_strided_slice %8 {offsets = [0, 1, 0, 0], sizes = [14, 1, 16, 168], strides = [1, 1, 1, 1]} : vector<14x2x16x168xf32> to vector<14x1x16x168xf32>
    %12 = vector.shape_cast %11 : vector<14x1x16x168xf32> to vector<14x16x168xf32>
    %13 = arith.addf %10, %12 : vector<14x16x168xf32>
    %14 = arith.truncf %13 : vector<14x16x168xf32> to vector<14x16x168xbf16>
    %c0_6 = arith.constant 0 : index
    %c0_7 = arith.constant 0 : index
    %c0_8 = arith.constant 0 : index
    %15 = vector.load %arg13[%c0_6, %c0_7, %c0_8] : memref<14x16x168xbf16, #tpu.memory_space<vmem>>, vector<14x16x168xbf16>
    tpu.vector_store %arg13[%c0_6, %c0_7, %c0_8], %14 {strides = array<i32>} : memref<14x16x168xbf16, #tpu.memory_space<vmem>>, vector<14x16x168xbf16>,
    %c0_9 = arith.constant 0 : index
    %c0_10 = arith.constant 0 : index
    %c0_11 = arith.constant 0 : index
    %16 = vector.load %arg13[%c0_9, %c0_10, %c0_11] : memref<14x16x168xbf16, #tpu.memory_space<vmem>>, vector<10x16x168xbf16>
    %17 = vector.shape_cast %16 : vector<10x16x168xbf16> to vector<160x168xbf16>
    %c0_12 = arith.constant 0 : index
    %c0_13 = arith.constant 0 : index
    %c0_14 = arith.constant 0 : index
    %18 = vector.load %arg4[%c0_12, %c0_13, %c0_14] : memref<5x168x160xbf16, #tpu.memory_space<vmem>>, vector<1x168x160xbf16>
    %19 = vector.shape_cast %18 : vector<1x168x160xbf16> to vector<168x160xbf16>
    %cst_15 = arith.constant dense<0.000000e+00> : vector<160x160xf32>
    %20 = tpu.matmul %17, %19, %cst_15 {dimension_numbers = #tpu.dot_dimension_numbers<[1], [0], [0], [1], [0, 0, 1, 1], [], []>} : vector<160x168xbf16>, vector<168x160xbf16>, vector<160x160xf32> -> vector<160x160xf32>
    %c1 = arith.constant 1 : index
    %c0_16 = arith.constant 0 : index
    %c0_17 = arith.constant 0 : index
    %21 = vector.load %arg13[%c1, %c0_16, %c0_17] : memref<14x16x168xbf16, #tpu.memory_space<vmem>>, vector<10x16x168xbf16>
    %22 = vector.shape_cast %21 : vector<10x16x168xbf16> to vector<160x168xbf16>
    %c1_18 = arith.constant 1 : index
    %c0_19 = arith.constant 0 : index
    %c0_20 = arith.constant 0 : index
    %23 = vector.load %arg4[%c1_18, %c0_19, %c0_20] : memref<5x168x160xbf16, #tpu.memory_space<vmem>>, vector<1x168x160xbf16>
    %24 = vector.shape_cast %23 : vector<1x168x160xbf16> to vector<168x160xbf16>
    %cst_21 = arith.constant dense<0.000000e+00> : vector<160x160xf32>
    %25 = tpu.matmul %22, %24, %cst_21 {dimension_numbers = #tpu.dot_dimension_numbers<[1], [0], [0], [1], [0, 0, 1, 1], [], []>} : vector<160x168xbf16>, vector<168x160xbf16>, vector<160x160xf32> -> vector<160x160xf32>
    %26 = arith.addf %20, %25 : vector<160x160xf32>
    %c2 = arith.constant 2 : index
    %c0_22 = arith.constant 0 : index
    %c0_23 = arith.constant 0 : index
    %27 = vector.load %arg13[%c2, %c0_22, %c0_23] : memref<14x16x168xbf16, #tpu.memory_space<vmem>>, vector<10x16x168xbf16>
    %28 = vector.shape_cast %27 : vector<10x16x168xbf16> to vector<160x168xbf16>
    %c2_24 = arith.constant 2 : index
    %c0_25 = arith.constant 0 : index
    %c0_26 = arith.constant 0 : index
    %29 = vector.load %arg4[%c2_24, %c0_25, %c0_26] : memref<5x168x160xbf16, #tpu.memory_space<vmem>>, vector<1x168x160xbf16>
    %30 = vector.shape_cast %29 : vector<1x168x160xbf16> to vector<168x160xbf16>
    %cst_27 = arith.constant dense<0.000000e+00> : vector<160x160xf32>
    %31 = tpu.matmul %28, %30, %cst_27 {dimension_numbers = #tpu.dot_dimension_numbers<[1], [0], [0], [1], [0, 0, 1, 1], [], []>} : vector<160x168xbf16>, vector<168x160xbf16>, vector<160x160xf32> -> vector<160x160xf32>
    %32 = arith.addf %26, %31 : vector<160x160xf32>
    %c3 = arith.constant 3 : index
    %c0_28 = arith.constant 0 : index
    %c0_29 = arith.constant 0 : index
    %33 = vector.load %arg13[%c3, %c0_28, %c0_29] : memref<14x16x168xbf16, #tpu.memory_space<vmem>>, vector<10x16x168xbf16>
    %34 = vector.shape_cast %33 : vector<10x16x168xbf16> to vector<160x168xbf16>
    %c3_30 = arith.constant 3 : index
    %c0_31 = arith.constant 0 : index
    %c0_32 = arith.constant 0 : index
    %35 = vector.load %arg4[%c3_30, %c0_31, %c0_32] : memref<5x168x160xbf16, #tpu.memory_space<vmem>>, vector<1x168x160xbf16>
    %36 = vector.shape_cast %35 : vector<1x168x160xbf16> to vector<168x160xbf16>
    %cst_33 = arith.constant dense<0.000000e+00> : vector<160x160xf32>
    %37 = tpu.matmul %34, %36, %cst_33 {dimension_numbers = #tpu.dot_dimension_numbers<[1], [0], [0], [1], [0, 0, 1, 1], [], []>} : vector<160x168xbf16>, vector<168x160xbf16>, vector<160x160xf32> -> vector<160x160xf32>
    %38 = arith.addf %32, %37 : vector<160x160xf32>
    %c4 = arith.constant 4 : index
    %c0_34 = arith.constant 0 : index
    %c0_35 = arith.constant 0 : index
    %39 = vector.load %arg13[%c4, %c0_34, %c0_35] : memref<14x16x168xbf16, #tpu.memory_space<vmem>>, vector<10x16x168xbf16>
    %40 = vector.shape_cast %39 : vector<10x16x168xbf16> to vector<160x168xbf16>
    %c4_36 = arith.constant 4 : index
    %c0_37 = arith.constant 0 : index
    %c0_38 = arith.constant 0 : index
    %41 = vector.load %arg4[%c4_36, %c0_37, %c0_38] : memref<5x168x160xbf16, #tpu.memory_space<vmem>>, vector<1x168x160xbf16>
    %42 = vector.shape_cast %41 : vector<1x168x160xbf16> to vector<168x160xbf16>
    %cst_39 = arith.constant dense<0.000000e+00> : vector<160x160xf32>
    %43 = tpu.matmul %40, %42, %cst_39 {dimension_numbers = #tpu.dot_dimension_numbers<[1], [0], [0], [1], [0, 0, 1, 1], [], []>} : vector<160x168xbf16>, vector<168x160xbf16>, vector<160x160xf32> -> vector<160x160xf32>
    %44 = arith.addf %38, %43 : vector<160x160xf32>
    %c0_40 = arith.constant 0 : index
    %c0_41 = arith.constant 0 : index
    %45 = vector.load %arg5[%c0_40, %c0_41] : memref<1x160xf32, #tpu.memory_space<vmem>>, vector<1x160xf32>
    %46 = vector.broadcast %45 : vector<1x160xf32> to vector<160x160xf32>
    %47 = arith.addf %44, %46 : vector<160x160xf32>
    %48 = math.tanh %47 : vector<160x160xf32>
    %49 = arith.truncf %48 : vector<160x160xf32> to vector<160x160xbf16>
    %50 = vector.shape_cast %49 : vector<160x160xbf16> to vector<10x16x160xbf16>
    %c0_42 = arith.constant 0 : index
    %c0_43 = arith.constant 0 : index
    %c0_44 = arith.constant 0 : index
    %51 = vector.load %arg14[%c0_42, %c0_43, %c0_44] : memref<10x16x160xbf16, #tpu.memory_space<vmem>>, vector<10x16x160xbf16>
    tpu.vector_store %arg14[%c0_42, %c0_43, %c0_44], %50 {strides = array<i32>} : memref<10x16x160xbf16, #tpu.memory_space<vmem>>, vector<10x16x160xbf16>,
    %c0_45 = arith.constant 0 : index
    %c0_46 = arith.constant 0 : index
    %c0_47 = arith.constant 0 : index
    %52 = vector.load %arg14[%c0_45, %c0_46, %c0_47] : memref<10x16x160xbf16, #tpu.memory_space<vmem>>, vector<1x16x160xbf16>
    %53 = vector.shape_cast %52 : vector<1x16x160xbf16> to vector<16x160xbf16>
    %c0_48 = arith.constant 0 : index
    %c0_49 = arith.constant 0 : index
    %c0_50 = arith.constant 0 : index
    %54 = vector.load %arg6[%c0_48, %c0_49, %c0_50] : memref<10x160x128xbf16, #tpu.memory_space<vmem>>, vector<1x160x128xbf16>
    %55 = vector.shape_cast %54 : vector<1x160x128xbf16> to vector<160x128xbf16>
    %cst_51 = arith.constant dense<0.000000e+00> : vector<16x128xf32>
    %56 = tpu.matmul %53, %55, %cst_51 {dimension_numbers = #tpu.dot_dimension_numbers<[1], [0], [0], [1], [0, 0, 1, 1], [], []>} : vector<16x160xbf16>, vector<160x128xbf16>, vector<16x128xf32> -> vector<16x128xf32>
    %c1_52 = arith.constant 1 : index
    %c0_53 = arith.constant 0 : index
    %c0_54 = arith.constant 0 : index
    %57 = vector.load %arg14[%c1_52, %c0_53, %c0_54] : memref<10x16x160xbf16, #tpu.memory_space<vmem>>, vector<1x16x160xbf16>
    %58 = vector.shape_cast %57 : vector<1x16x160xbf16> to vector<16x160xbf16>
    %c1_55 = arith.constant 1 : index
    %c0_56 = arith.constant 0 : index
    %c0_57 = arith.constant 0 : index
    %59 = vector.load %arg6[%c1_55, %c0_56, %c0_57] : memref<10x160x128xbf16, #tpu.memory_space<vmem>>, vector<1x160x128xbf16>
    %60 = vector.shape_cast %59 : vector<1x160x128xbf16> to vector<160x128xbf16>
    %cst_58 = arith.constant dense<0.000000e+00> : vector<16x128xf32>
    %61 = tpu.matmul %58, %60, %cst_58 {dimension_numbers = #tpu.dot_dimension_numbers<[1], [0], [0], [1], [0, 0, 1, 1], [], []>} : vector<16x160xbf16>, vector<160x128xbf16>, vector<16x128xf32> -> vector<16x128xf32>
    %62 = arith.addf %56, %61 : vector<16x128xf32>
    %c2_59 = arith.constant 2 : index
    %c0_60 = arith.constant 0 : index
    %c0_61 = arith.constant 0 : index
    %63 = vector.load %arg14[%c2_59, %c0_60, %c0_61] : memref<10x16x160xbf16, #tpu.memory_space<vmem>>, vector<1x16x160xbf16>
    %64 = vector.shape_cast %63 : vector<1x16x160xbf16> to vector<16x160xbf16>
    %c2_62 = arith.constant 2 : index
    %c0_63 = arith.constant 0 : index
    %c0_64 = arith.constant 0 : index
    %65 = vector.load %arg6[%c2_62, %c0_63, %c0_64] : memref<10x160x128xbf16, #tpu.memory_space<vmem>>, vector<1x160x128xbf16>
    %66 = vector.shape_cast %65 : vector<1x160x128xbf16> to vector<160x128xbf16>
    %cst_65 = arith.constant dense<0.000000e+00> : vector<16x128xf32>
    %67 = tpu.matmul %64, %66, %cst_65 {dimension_numbers = #tpu.dot_dimension_numbers<[1], [0], [0], [1], [0, 0, 1, 1], [], []>} : vector<16x160xbf16>, vector<160x128xbf16>, vector<16x128xf32> -> vector<16x128xf32>
    %68 = arith.addf %62, %67 : vector<16x128xf32>
    %c3_66 = arith.constant 3 : index
    %c0_67 = arith.constant 0 : index
    %c0_68 = arith.constant 0 : index
    %69 = vector.load %arg14[%c3_66, %c0_67, %c0_68] : memref<10x16x160xbf16, #tpu.memory_space<vmem>>, vector<1x16x160xbf16>
    %70 = vector.shape_cast %69 : vector<1x16x160xbf16> to vector<16x160xbf16>
    %c3_69 = arith.constant 3 : index
    %c0_70 = arith.constant 0 : index
    %c0_71 = arith.constant 0 : index
    %71 = vector.load %arg6[%c3_69, %c0_70, %c0_71] : memref<10x160x128xbf16, #tpu.memory_space<vmem>>, vector<1x160x128xbf16>
    %72 = vector.shape_cast %71 : vector<1x160x128xbf16> to vector<160x128xbf16>
    %cst_72 = arith.constant dense<0.000000e+00> : vector<16x128xf32>
    %73 = tpu.matmul %70, %72, %cst_72 {dimension_numbers = #tpu.dot_dimension_numbers<[1], [0], [0], [1], [0, 0, 1, 1], [], []>} : vector<16x160xbf16>, vector<160x128xbf16>, vector<16x128xf32> -> vector<16x128xf32>
    %74 = arith.addf %68, %73 : vector<16x128xf32>
    %c4_73 = arith.constant 4 : index
    %c0_74 = arith.constant 0 : index
    %c0_75 = arith.constant 0 : index
    %75 = vector.load %arg14[%c4_73, %c0_74, %c0_75] : memref<10x16x160xbf16, #tpu.memory_space<vmem>>, vector<1x16x160xbf16>
    %76 = vector.shape_cast %75 : vector<1x16x160xbf16> to vector<16x160xbf16>
    %c4_76 = arith.constant 4 : index
    %c0_77 = arith.constant 0 : index
    %c0_78 = arith.constant 0 : index
    %77 = vector.load %arg6[%c4_76, %c0_77, %c0_78] : memref<10x160x128xbf16, #tpu.memory_space<vmem>>, vector<1x160x128xbf16>
    %78 = vector.shape_cast %77 : vector<1x160x128xbf16> to vector<160x128xbf16>
    %cst_79 = arith.constant dense<0.000000e+00> : vector<16x128xf32>
    %79 = tpu.matmul %76, %78, %cst_79 {dimension_numbers = #tpu.dot_dimension_numbers<[1], [0], [0], [1], [0, 0, 1, 1], [], []>} : vector<16x160xbf16>, vector<160x128xbf16>, vector<16x128xf32> -> vector<16x128xf32>
    %80 = arith.addf %74, %79 : vector<16x128xf32>
    %c5 = arith.constant 5 : index
    %c0_80 = arith.constant 0 : index
    %c0_81 = arith.constant 0 : index
    %81 = vector.load %arg14[%c5, %c0_80, %c0_81] : memref<10x16x160xbf16, #tpu.memory_space<vmem>>, vector<1x16x160xbf16>
    %82 = vector.shape_cast %81 : vector<1x16x160xbf16> to vector<16x160xbf16>
    %c5_82 = arith.constant 5 : index
    %c0_83 = arith.constant 0 : index
    %c0_84 = arith.constant 0 : index
    %83 = vector.load %arg6[%c5_82, %c0_83, %c0_84] : memref<10x160x128xbf16, #tpu.memory_space<vmem>>, vector<1x160x128xbf16>
    %84 = vector.shape_cast %83 : vector<1x160x128xbf16> to vector<160x128xbf16>
    %cst_85 = arith.constant dense<0.000000e+00> : vector<16x128xf32>
    %85 = tpu.matmul %82, %84, %cst_85 {dimension_numbers = #tpu.dot_dimension_numbers<[1], [0], [0], [1], [0, 0, 1, 1], [], []>} : vector<16x160xbf16>, vector<160x128xbf16>, vector<16x128xf32> -> vector<16x128xf32>
    %86 = arith.addf %80, %85 : vector<16x128xf32>
    %c6 = arith.constant 6 : index
    %c0_86 = arith.constant 0 : index
    %c0_87 = arith.constant 0 : index
    %87 = vector.load %arg14[%c6, %c0_86, %c0_87] : memref<10x16x160xbf16, #tpu.memory_space<vmem>>, vector<1x16x160xbf16>
    %88 = vector.shape_cast %87 : vector<1x16x160xbf16> to vector<16x160xbf16>
    %c6_88 = arith.constant 6 : index
    %c0_89 = arith.constant 0 : index
    %c0_90 = arith.constant 0 : index
    %89 = vector.load %arg6[%c6_88, %c0_89, %c0_90] : memref<10x160x128xbf16, #tpu.memory_space<vmem>>, vector<1x160x128xbf16>
    %90 = vector.shape_cast %89 : vector<1x160x128xbf16> to vector<160x128xbf16>
    %cst_91 = arith.constant dense<0.000000e+00> : vector<16x128xf32>
    %91 = tpu.matmul %88, %90, %cst_91 {dimension_numbers = #tpu.dot_dimension_numbers<[1], [0], [0], [1], [0, 0, 1, 1], [], []>} : vector<16x160xbf16>, vector<160x128xbf16>, vector<16x128xf32> -> vector<16x128xf32>
    %92 = arith.addf %86, %91 : vector<16x128xf32>
    %c7 = arith.constant 7 : index
    %c0_92 = arith.constant 0 : index
    %c0_93 = arith.constant 0 : index
    %93 = vector.load %arg14[%c7, %c0_92, %c0_93] : memref<10x16x160xbf16, #tpu.memory_space<vmem>>, vector<1x16x160xbf16>
    %94 = vector.shape_cast %93 : vector<1x16x160xbf16> to vector<16x160xbf16>
    %c7_94 = arith.constant 7 : index
    %c0_95 = arith.constant 0 : index
    %c0_96 = arith.constant 0 : index
    %95 = vector.load %arg6[%c7_94, %c0_95, %c0_96] : memref<10x160x128xbf16, #tpu.memory_space<vmem>>, vector<1x160x128xbf16>
    %96 = vector.shape_cast %95 : vector<1x160x128xbf16> to vector<160x128xbf16>
    %cst_97 = arith.constant dense<0.000000e+00> : vector<16x128xf32>
    %97 = tpu.matmul %94, %96, %cst_97 {dimension_numbers = #tpu.dot_dimension_numbers<[1], [0], [0], [1], [0, 0, 1, 1], [], []>} : vector<16x160xbf16>, vector<160x128xbf16>, vector<16x128xf32> -> vector<16x128xf32>
    %98 = arith.addf %92, %97 : vector<16x128xf32>
    %c8 = arith.constant 8 : index
    %c0_98 = arith.constant 0 : index
    %c0_99 = arith.constant 0 : index
    %99 = vector.load %arg14[%c8, %c0_98, %c0_99] : memref<10x16x160xbf16, #tpu.memory_space<vmem>>, vector<1x16x160xbf16>
    %100 = vector.shape_cast %99 : vector<1x16x160xbf16> to vector<16x160xbf16>
    %c8_100 = arith.constant 8 : index
    %c0_101 = arith.constant 0 : index
    %c0_102 = arith.constant 0 : index
    %101 = vector.load %arg6[%c8_100, %c0_101, %c0_102] : memref<10x160x128xbf16, #tpu.memory_space<vmem>>, vector<1x160x128xbf16>
    %102 = vector.shape_cast %101 : vector<1x160x128xbf16> to vector<160x128xbf16>
    %cst_103 = arith.constant dense<0.000000e+00> : vector<16x128xf32>
    %103 = tpu.matmul %100, %102, %cst_103 {dimension_numbers = #tpu.dot_dimension_numbers<[1], [0], [0], [1], [0, 0, 1, 1], [], []>} : vector<16x160xbf16>, vector<160x128xbf16>, vector<16x128xf32> -> vector<16x128xf32>
    %104 = arith.addf %98, %103 : vector<16x128xf32>
    %c9 = arith.constant 9 : index
    %c0_104 = arith.constant 0 : index
    %c0_105 = arith.constant 0 : index
    %105 = vector.load %arg14[%c9, %c0_104, %c0_105] : memref<10x16x160xbf16, #tpu.memory_space<vmem>>, vector<1x16x160xbf16>
    %106 = vector.shape_cast %105 : vector<1x16x160xbf16> to vector<16x160xbf16>
    %c9_106 = arith.constant 9 : index
    %c0_107 = arith.constant 0 : index
    %c0_108 = arith.constant 0 : index
    %107 = vector.load %arg6[%c9_106, %c0_107, %c0_108] : memref<10x160x128xbf16, #tpu.memory_space<vmem>>, vector<1x160x128xbf16>
    %108 = vector.shape_cast %107 : vector<1x160x128xbf16> to vector<160x128xbf16>
    %cst_109 = arith.constant dense<0.000000e+00> : vector<16x128xf32>
    %109 = tpu.matmul %106, %108, %cst_109 {dimension_numbers = #tpu.dot_dimension_numbers<[1], [0], [0], [1], [0, 0, 1, 1], [], []>} : vector<16x160xbf16>, vector<160x128xbf16>, vector<16x128xf32> -> vector<16x128xf32>
    %110 = arith.addf %104, %109 : vector<16x128xf32>
    %c0_110 = arith.constant 0 : index
    %c0_111 = arith.constant 0 : index
    %111 = vector.load %arg7[%c0_110, %c0_111] : memref<1x128xf32, #tpu.memory_space<vmem>>, vector<1x128xf32>
    %112 = vector.broadcast %111 : vector<1x128xf32> to vector<16x128xf32>
    %113 = arith.addf %110, %112 : vector<16x128xf32>
    %114 = math.tanh %113 : vector<16x128xf32>
    %c0_112 = arith.constant 0 : index
    %c0_113 = arith.constant 0 : index
    %115 = vector.load %arg8[%c0_112, %c0_113] : memref<128x128xf32, #tpu.memory_space<vmem>>, vector<128x128xf32>
    %cst_114 = arith.constant dense<0.000000e+00> : vector<16x128xf32>
    %116 = tpu.matmul %114, %115, %cst_114 {dimension_numbers = #tpu.dot_dimension_numbers<[1], [0], [0], [1], [0, 0, 1, 1], [], []>} : vector<16x128xf32>, vector<128x128xf32>, vector<16x128xf32> -> vector<16x128xf32>
    %c0_115 = arith.constant 0 : index
    %c0_116 = arith.constant 0 : index
    %117 = vector.load %arg9[%c0_115, %c0_116] : memref<1x128xf32, #tpu.memory_space<vmem>>, vector<1x128xf32>
    %118 = vector.broadcast %117 : vector<1x128xf32> to vector<16x128xf32>
    %119 = arith.addf %116, %118 : vector<16x128xf32>
    %120 = math.tanh %119 : vector<16x128xf32>
    %c0_117 = arith.constant 0 : index
    %c0_118 = arith.constant 0 : index
    %121 = vector.load %arg10[%c0_117, %c0_118] : memref<128x128xf32, #tpu.memory_space<vmem>>, vector<128x128xf32>
    %cst_119 = arith.constant dense<0.000000e+00> : vector<16x128xf32>
    %122 = tpu.matmul %120, %121, %cst_119 {dimension_numbers = #tpu.dot_dimension_numbers<[1], [0], [0], [1], [0, 0, 1, 1], [], []>} : vector<16x128xf32>, vector<128x128xf32>, vector<16x128xf32> -> vector<16x128xf32>
    %c0_120 = arith.constant 0 : index
    %c0_121 = arith.constant 0 : index
    %123 = vector.load %arg11[%c0_120, %c0_121] : memref<1x128xf32, #tpu.memory_space<vmem>>, vector<1x128xf32>
    %124 = vector.broadcast %123 : vector<1x128xf32> to vector<16x128xf32>
    %125 = arith.addf %122, %124 : vector<16x128xf32>
    %cst_122 = arith.constant dense<0xFF800000> : vector<16xf32>
    %126 = vector.multi_reduction <maximumf>, %125, %cst_122 [1] : vector<16x128xf32> to vector<16xf32>
    %127 = vector.shape_cast %126 : vector<16xf32> to vector<16x1xf32>
    %128 = vector.broadcast %127 : vector<16x1xf32> to vector<16x128xf32>
    %129 = arith.subf %125, %128 : vector<16x128xf32>
    %130 = math.exp %129 : vector<16x128xf32>
    %cst_123 = arith.constant dense<0.000000e+00> : vector<16xf32>
    %131 = vector.multi_reduction <add>, %130, %cst_123 [1] : vector<16x128xf32> to vector<16xf32>
    %132 = vector.shape_cast %131 : vector<16xf32> to vector<16x1xf32>
    %133 = vector.broadcast %132 : vector<16x1xf32> to vector<16x128xf32>
    %134 = arith.divf %130, %133 : vector<16x128xf32>
    %c0_124 = arith.constant 0 : index
    %c0_125 = arith.constant 0 : index
    %135 = vector.load %arg12[%c0_124, %c0_125] : memref<16x128xf32, #tpu.memory_space<vmem>>, vector<16x128xf32>
    tpu.vector_store %arg12[%c0_124, %c0_125], %134 {strides = array<i32>} : memref<16x128xf32, #tpu.memory_space<vmem>>, vector<16x128xf32>,
    return
  }
  func.func @transform_0(%arg0: i32) -> (i32, i32, i32) {
    %c0_i32 = arith.constant 0 : i32
    %c0_i32_0 = arith.constant 0 : i32
    %c0_i32_1 = arith.constant 0 : i32
    return %c0_i32, %arg0, %c0_i32_0 : i32, i32, i32
  }
  func.func @transform_1(%arg0: i32) -> (i32, i32) {
    %c0_i32 = arith.constant 0 : i32
    %c0_i32_0 = arith.constant 0 : i32
    %c0_i32_1 = arith.constant 0 : i32
    return %c0_i32, %c0_i32_0 : i32, i32
  }
  func.func @transform_2(%arg0: i32) -> (i32, i32) {
    %c0_i32 = arith.constant 0 : i32
    %c0_i32_0 = arith.constant 0 : i32
    %c0_i32_1 = arith.constant 0 : i32
    return %c0_i32, %c0_i32_0 : i32, i32
  }
  func.func @transform_3(%arg0: i32) -> (i32, i32, i32) {
    %c0_i32 = arith.constant 0 : i32
    %c0_i32_0 = arith.constant 0 : i32
    %c0_i32_1 = arith.constant 0 : i32
    %c0_i32_2 = arith.constant 0 : i32
    return %c0_i32, %c0_i32_0, %c0_i32_1 : i32, i32, i32
  }
  func.func @transform_4(%arg0: i32) -> (i32, i32) {
    %c0_i32 = arith.constant 0 : i32
    %c0_i32_0 = arith.constant 0 : i32
    %c0_i32_1 = arith.constant 0 : i32
    return %c0_i32, %c0_i32_0 : i32, i32
  }
  func.func @transform_5(%arg0: i32) -> (i32, i32, i32) {
    %c0_i32 = arith.constant 0 : i32
    %c0_i32_0 = arith.constant 0 : i32
    %c0_i32_1 = arith.constant 0 : i32
    %c0_i32_2 = arith.constant 0 : i32
    return %c0_i32, %c0_i32_0, %c0_i32_1 : i32, i32, i32
  }
  func.func @transform_6(%arg0: i32) -> (i32, i32) {
    %c0_i32 = arith.constant 0 : i32
    %c0_i32_0 = arith.constant 0 : i32
    %c0_i32_1 = arith.constant 0 : i32
    return %c0_i32, %c0_i32_0 : i32, i32
  }
  func.func @transform_7(%arg0: i32) -> (i32, i32) {
    %c0_i32 = arith.constant 0 : i32
    %c0_i32_0 = arith.constant 0 : i32
    %c0_i32_1 = arith.constant 0 : i32
    return %c0_i32, %c0_i32_0 : i32, i32
  }
  func.func @transform_8(%arg0: i32) -> (i32, i32) {
    %c0_i32 = arith.constant 0 : i32
    %c0_i32_0 = arith.constant 0 : i32
    %c0_i32_1 = arith.constant 0 : i32
    return %c0_i32, %c0_i32_0 : i32, i32
  }
  func.func @transform_9(%arg0: i32) -> (i32, i32) {
    %c0_i32 = arith.constant 0 : i32
    %c0_i32_0 = arith.constant 0 : i32
    %c0_i32_1 = arith.constant 0 : i32
    return %c0_i32, %c0_i32_0 : i32, i32
  }
  func.func @transform_10(%arg0: i32) -> (i32, i32) {
    %c0_i32 = arith.constant 0 : i32
    %c0_i32_0 = arith.constant 0 : i32
    %c0_i32_1 = arith.constant 0 : i32
    return %c0_i32, %c0_i32_0 : i32, i32
  }
  func.func @transform_11(%arg0: i32) -> (i32, i32) {
    %c0_i32 = arith.constant 0 : i32
    %c0_i32_0 = arith.constant 0 : i32
    return %arg0, %c0_i32 : i32, i32
  }
}

</mosaic_0001>

<bundles_post_ra>
// kernel: tile.13
= control target key start
LH: loop header
LB: loop body
LE: loop exit
PB: predicated region body
PF: predicated region fallthrough
CT: control target
= control target key end

     0   :  { %s40_s0 = inlined_call_operand.vmem [shape: f32[6], index: 0, kind: input, shape index: {}]   ;;  %s41_s1 = inlined_call_operand.vmem [shape: f32[28,6], index: 1, kind: output, shape index: {}]  }
   0x1   :  { %v4_v0 = vld [vmem:[%s40_s0] ss:$0 sm:$0xff] }
   0x2   :  { %5 = vst [vmem:[%s41_s1] sm:$0xff] %v4_v0  ;;  %12 = vst [vmem:[%s41_s1 + $0x8] sm:$0xff] %v4_v0 }
   0x3   :  { %13 = vst [vmem:[%s41_s1 + $0x10] sm:$0xff] %v4_v0  ;;  %14 = vst [vmem:[%s41_s1 + $0x18] sm:$0xff] %v4_v0 }

// kernel: tile.14
= control target key start
LH: loop header
LB: loop body
LE: loop exit
PB: predicated region body
PF: predicated region fallthrough
CT: control target
= control target key end

     0   :  { %vm9_vm0 = vcmask 15360   ;;  %s250_s12 = smov 126   ;;  %s251_s13 = smov 114   ;;  %vm3_vm1 = vcmask 48128   ;;  %vm13_vm2 = vcmask 31744   ;;  %vm16_vm3 = vcmask 1048560   ;;  %s380_s0 = inlined_call_operand.vmem [shape: f32[28,6], index: 0, kind: input, shape index: {}]   ;;  %s381_s1 = inlined_call_operand.vmem [shape: f32[1,168], index: 1, kind: output, shape index: {}]  }
   0x1   :  { %v194_v0 = vld [vmem:[%s380_s0 + $0x15] sm:$0x1]   ;;  %v197_v3 = vld [vmem:[%s380_s0 + $0x13] sm:$0x1]   ;;  %v196_v4 = vld [vmem:[%s380_s0 + $0x14] sm:$0x1]  }
   0x2   :  { %v195_v1 = vld [vmem:[%s380_s0 + $0x15] sm:$0x1]   ;;  %26 = vrot.lane.b32.xlu1 %v197_v3, %s251_s13  ;;  %v198_v5 = vld [vmem:[%s380_s0 + $0x12] sm:$0x1]   ;;  %s252_s18 = smov 120   ;;  %s253_s19 = smov 108  }
   0x3   :  { %v10_v2 = vsel %vm9_vm0, %v195_v1, %v194_v0  ;;  %v199_v6 = vld [vmem:[%s380_s0 + $0x11] sm:$0x1]   ;;  %v200_v7 = vld [vmem:[%s380_s0 + $0x10] sm:$0x1]   ;;  %s254_s24 = smov 102   ;;  %s255_s25 = smov 96  }
   0x4   :  { %11 = vrot.lane.b32.xlu0 %v10_v2, %s250_s12  ;;  %v201_v8 = vld [vmem:[%s380_s0 + $0xf] sm:$0x1]   ;;  %v202_v9 = vld [vmem:[%s380_s0 + $0xe] sm:$0x1]   ;;  %s256_s30 = smov 90   ;;  %s257_s2 = smov 84  }
   0x5   :  { %v2_v10 = vld [vmem:[%s380_s0] sm:$0x1]   ;;  %v203_v11 = vld [vmem:[%s380_s0 + $0xd] sm:$0x1]   ;;  %v204_v12 = vld [vmem:[%s380_s0 + $0xc] sm:$0x1]  }
   0x6   :  { %32 = vrot.lane.b32.xlu1 %v198_v5, %s253_s19  ;;  %4 = vst.msk [vmem:[#allocation0] sm:$0x1] %vm3_vm1, %v2_v10   ;;  %s258_s9 = smov 78   ;;  %s259_s10 = smov 72   ;;  %v205_v13 = vld [vmem:[%s380_s0 + $0xb] sm:$0x1]  }
   0x7   :  { %v206_v14 = vld [vmem:[%s380_s0 + $0xa] sm:$0x1]   ;;  %s260_s15 = smov 66   ;;  %s261_s16 = smov 60   ;;  %v207_v15 = vld [vmem:[%s380_s0 + $0x9] sm:$0x1]  }
   0x8   :  { %20 = vrot.lane.b32.xlu0 %v196_v4, %s252_s18  ;;  %v208_v16 = vld [vmem:[%s380_s0 + $0x8] sm:$0x1]   ;;  %s262_s21 = smov 54   ;;  %s263_s22 = smov 48   ;;  %v209_v17 = vld [vmem:[%s380_s0 + $0x7] sm:$0x1]  }
   0x9   :  { %v210_v18 = vld [vmem:[%s380_s0 + $0x6] sm:$0x1]   ;;  %s264_s27 = smov 42   ;;  %s265_s28 = smov 36   ;;  %v211_v19 = vld [vmem:[%s380_s0 + $0x1b] sm:$0x1]  }
   0xa   :  { %44 = vrot.lane.b32.xlu1 %v200_v7, %s255_s25  ;;  %v212_v20 = vld [vmem:[%s380_s0 + $0x5] sm:$0x1]   ;;  %s266_s4 = smov 34   ;;  %s267_s5 = smov 30   ;;  %v213_v21 = vld [vmem:[%s380_s0 + $0x1a] sm:$0x1]  }
   0xb   :  { %v214_v22 = vld [vmem:[%s380_s0 + $0x4] sm:$0x1]   ;;  %s269_s11 = smov 24   ;;  %v215_v23 = vld [vmem:[%s380_s0 + $0x19] sm:$0x1]   ;;  %s271_s17 = smov 18  }
   0xc   :  { %38 = vrot.lane.b32.xlu0 %v199_v6, %s254_s24  ;;  %v216_v24 = vld [vmem:[%s380_s0 + $0x3] sm:$0x1]   ;;  %v217_v25 = vld [vmem:[%s380_s0 + $0x18] sm:$0x1]   ;;  %v218_v26 = vld [vmem:[%s380_s0 + $0x2] sm:$0x1]  }
   0xd   :  { %s273_s23 = smov 12   ;;  %v219_v27 = vld [vmem:[%s380_s0 + $0x17] sm:$0x1]   ;;  %v220_v28 = vld [vmem:[%s380_s0 + $0x1] sm:$0x1]   ;;  %s275_s29 = smov 6  }
   0xe   :  { %56 = vrot.lane.b32.xlu1 %v202_v9, %s257_s2  ;;  %v221_v29 = vld [vmem:[%s380_s0 + $0x16] sm:$0x1]   ;;  %s276_s0 = smov 4   ;;  %vm22_vm4 = vcmask 1032128   ;;  %vm28_vm5 = vcmask 982928   ;;  %vm34_vm6 = vcmask 933728  }
   0xf   :  { %vm40_vm7 = vcmask 884528   ;;  %vm46_vm8 = vcmask 835328   ;;  %vm52_vm9 = vcmask 786128   ;;  %vm58_vm10 = vcmask 736928  }
  0x10   :  { %50 = vrot.lane.b32.xlu0 %v201_v8, %s256_s30  ;;  %vm64_vm11 = vcmask 687728   ;;  %vm70_vm12 = vcmask 638528   ;;  %vm76_vm13 = vcmask 589328   ;;  %vm82_vm14 = vcmask 540128  }
  0x11   :  { %vm88_vm15 = vcmask 490928   ;;  %vm94_vm0 = vcmask 441728   ;;  %vm100_vm1 = vcmask 392528  }
  0x12   :  { %68 = vrot.lane.b32.xlu1 %v204_v12, %s259_s10  ;;  %s268_s10 = smov 28  }
  0x14   :  { %62 = vrot.lane.b32.xlu0 %v203_v11, %s258_s9 }
  0x16   :  { %80 = vrot.lane.b32.xlu1 %v206_v14, %s261_s16  ;;  %s270_s16 = smov 22  }
  0x18   :  { %74 = vrot.lane.b32.xlu0 %v205_v13, %s260_s15 }
  0x1a   :  { %92 = vrot.lane.b32.xlu1 %v208_v16, %s263_s22  ;;  %s272_s22 = smov 16  }
  0x1c   :  { %86 = vrot.lane.b32.xlu0 %v207_v15, %s262_s21 }
  0x1e   :  { %104 = vrot.lane.b32.xlu1 %v210_v18, %s265_s28  ;;  %s274_s28 = smov 10  }
  0x20   :  { %98 = vrot.lane.b32.xlu0 %v209_v17, %s264_s27 }
  0x22   :  { %117 = vrot.lane.b32.xlu1 %v212_v20, %s267_s5 }
  0x24   :  { %110 = vrot.lane.b32.xlu0 %v211_v19, %s266_s4 }
  0x26   :  { %130 = vrot.lane.b32.xlu1 %v214_v22, %s269_s11 }
  0x28   :  { %123 = vrot.lane.b32.xlu0 %v213_v21, %s268_s10 }
  0x2a   :  { %143 = vrot.lane.b32.xlu1 %v216_v24, %s271_s17 }
  0x2c   :  { %136 = vrot.lane.b32.xlu0 %v215_v23, %s270_s16 }
  0x2e   :  { %156 = vrot.lane.b32.xlu1 %v218_v26, %s273_s23 }
  0x30   :  { %149 = vrot.lane.b32.xlu0 %v217_v25, %s272_s22 }
  0x32   :  { %169 = vrot.lane.b32.xlu1 %v220_v28, %s275_s29 }
  0x34   :  { %162 = vrot.lane.b32.xlu0 %v219_v27, %s274_s28 }
  0x38   :  { %175 = vrot.lane.b32.xlu0 %v221_v29, %s276_s0 }
  0x74   :  { %v27_v31 = vpop.permute.xlu1 %26  }
  0x76   :  { %v12_v30 = vpop.permute.xlu0 %11  }
  0x77   :  { %15 = vst.msk [vmem:[#allocation0 + $0x8] sm:$0x1] %vm13_vm2, %v12_v30   ;;  %vm106_vm2 = vcmask 343328  }
  0x78   :  { %17 = vst.msk [vmem:[#allocation0] sm:$0x1] %vm16_vm3, %v12_v30   ;;  %v33_v33 = vpop.permute.xlu1 %32   ;;  %vm112_vm3 = vcmask 326928  }
  0x7a   :  { %v21_v32 = vpop.permute.xlu0 %20  }
  0x7b   :  { %23 = vst.msk [vmem:[#allocation0] sm:$0x1] %vm22_vm4, %v21_v32   ;;  %vm119_vm4 = vcmask 294128  }
  0x7c   :  { %29 = vst.msk [vmem:[#allocation0] sm:$0x1] %vm28_vm5, %v27_v31   ;;  %v45_v35 = vpop.permute.xlu1 %44   ;;  %vm125_vm5 = vcmask 277728  }
  0x7d   :  { %35 = vst.msk [vmem:[#allocation0] sm:$0x1] %vm34_vm6, %v33_v33   ;;  %vm132_vm6 = vcmask 244928  }
  0x7e   :  { %v39_v34 = vpop.permute.xlu0 %38  }
  0x7f   :  { %41 = vst.msk [vmem:[#allocation0] sm:$0x1] %vm40_vm7, %v39_v34   ;;  %vm138_vm7 = vcmask 228528  }
  0x80   :  { %47 = vst.msk [vmem:[#allocation0] sm:$0x1] %vm46_vm8, %v45_v35   ;;  %v57_v37 = vpop.permute.xlu1 %56   ;;  %vm145_vm8 = vcmask 195728  }
  0x82   :  { %v51_v36 = vpop.permute.xlu0 %50  }
  0x83   :  { %53 = vst.msk [vmem:[#allocation0] sm:$0x1] %vm52_vm9, %v51_v36   ;;  %vm151_vm9 = vcmask 179328  }
  0x84   :  { %59 = vst.msk [vmem:[#allocation0] sm:$0x1] %vm58_vm10, %v57_v37   ;;  %v69_v39 = vpop.permute.xlu1 %68   ;;  %vm158_vm10 = vcmask 146528  }
  0x86   :  { %v63_v38 = vpop.permute.xlu0 %62  }
  0x87   :  { %65 = vst.msk [vmem:[#allocation0] sm:$0x1] %vm64_vm11, %v63_v38   ;;  %vm164_vm11 = vcmask 130128  }
  0x88   :  { %71 = vst.msk [vmem:[#allocation0] sm:$0x1] %vm70_vm12, %v69_v39   ;;  %v81_v41 = vpop.permute.xlu1 %80   ;;  %vm171_vm12 = vcmask 97328  }
  0x8a   :  { %v75_v40 = vpop.permute.xlu0 %74  }
  0x8b   :  { %77 = vst.msk [vmem:[#allocation0] sm:$0x1] %vm76_vm13, %v75_v40   ;;  %vm177_vm13 = vcmask 80928  }
  0x8c   :  { %83 = vst.msk [vmem:[#allocation0] sm:$0x1] %vm82_vm14, %v81_v41   ;;  %v93_v43 = vpop.permute.xlu1 %92  }
  0x8e   :  { %v87_v42 = vpop.permute.xlu0 %86  }
  0x8f   :  { %89 = vst.msk [vmem:[#allocation0] sm:$0x1] %vm88_vm15, %v87_v42  }
  0x90   :  { %95 = vst.msk [vmem:[#allocation0] sm:$0x1] %vm94_vm0, %v93_v43   ;;  %v105_v45 = vpop.permute.xlu1 %104  }
  0x92   :  { %v99_v44 = vpop.permute.xlu0 %98  }
  0x93   :  { %101 = vst.msk [vmem:[#allocation0] sm:$0x1] %vm100_vm1, %v99_v44  }
  0x94   :  { %107 = vst.msk [vmem:[#allocation0] sm:$0x1] %vm106_vm2, %v105_v45   ;;  %v118_v47 = vpop.permute.xlu1 %117  }
  0x95   :  { %120 = vst.msk [vmem:[#allocation0] sm:$0x1] %vm119_vm4, %v118_v47  }
  0x96   :  { %v111_v46 = vpop.permute.xlu0 %110  }
  0x97   :  { %114 = vst.msk [vmem:[#allocation0 + $0x8] sm:$0x1] %vm112_vm3, %v111_v46  }
  0x98   :  { %v131_v49 = vpop.permute.xlu1 %130  }
  0x99   :  { %133 = vst.msk [vmem:[#allocation0] sm:$0x1] %vm132_vm6, %v131_v49  }
  0x9a   :  { %v124_v48 = vpop.permute.xlu0 %123  }
  0x9b   :  { %127 = vst.msk [vmem:[#allocation0 + $0x8] sm:$0x1] %vm125_vm5, %v124_v48  }
  0x9c   :  { %v144_v51 = vpop.permute.xlu1 %143  }
  0x9d   :  { %146 = vst.msk [vmem:[#allocation0] sm:$0x1] %vm145_vm8, %v144_v51  }
  0x9e   :  { %v137_v50 = vpop.permute.xlu0 %136  }
  0x9f   :  { %140 = vst.msk [vmem:[#allocation0 + $0x8] sm:$0x1] %vm138_vm7, %v137_v50  }
  0xa0   :  { %v157_v53 = vpop.permute.xlu1 %156  }
  0xa1   :  { %159 = vst.msk [vmem:[#allocation0] sm:$0x1] %vm158_vm10, %v157_v53  }
  0xa2   :  { %v150_v52 = vpop.permute.xlu0 %149  }
  0xa3   :  { %153 = vst.msk [vmem:[#allocation0 + $0x8] sm:$0x1] %vm151_vm9, %v150_v52  }
  0xa4   :  { %v170_v55 = vpop.permute.xlu1 %169  }
  0xa5   :  { %172 = vst.msk [vmem:[#allocation0] sm:$0x1] %vm171_vm12, %v170_v55  }
  0xa6   :  { %v163_v54 = vpop.permute.xlu0 %162  }
  0xa7   :  { %166 = vst.msk [vmem:[#allocation0 + $0x8] sm:$0x1] %vm164_vm11, %v163_v54  }
  0xaa   :  { %v176_v56 = vpop.permute.xlu0 %175  }
  0xab   :  { %179 = vst.msk [vmem:[#allocation0 + $0x8] sm:$0x1] %vm177_vm13, %v176_v56  }
  0xac   :  { %v184_v57 = vld [vmem:[#allocation0] sm:$0x1] }
  0xad   :  { %187 = vst [vmem:[%s381_s1] sm:$0x1] %v184_v57 }
  0xb2   :  { %v189_v58 = vld [vmem:[#allocation0 + $0x8] sm:$0x1] }
  0xb3   :  { %222 = vst [vmem:[%s381_s1 + $0x1] sm:$0x1] %v189_v58 }

// kernel: tile.18
= control target key start
LH: loop header
LB: loop body
LE: loop exit
PB: predicated region body
PF: predicated region fallthrough
CT: control target
= control target key end

     0   :  { %s28_s0 = inlined_call_operand.vmem [shape: f32[16], index: 0, kind: input, shape index: {}]   ;;  %s29_s1 = inlined_call_operand.vmem [shape: f32[10,16], index: 1, kind: output, shape index: {}]  }
   0x1   :  { %v4_v0 = vld [vmem:[%s28_s0] ss:$0 sm:$0xff] }
   0x2   :  { %5 = vst [vmem:[%s29_s1] sm:$0xff] %v4_v0  ;;  %8 = vst [vmem:[%s29_s1 + $0x8] sm:$0xff] %v4_v0 }

// kernel: tile.19
= control target key start
LH: loop header
LB: loop body
LE: loop exit
PB: predicated region body
PF: predicated region fallthrough
CT: control target
= control target key end

     0   :  { %s78_s10 = smov 112   ;;  %s79_s11 = smov 80   ;;  %vm4_vm0 = vcmask 130048   ;;  %vm10_vm1 = vcmask 1048448   ;;  %vm16_vm2 = vcmask 917248   ;;  %vm22_vm3 = vcmask 786048   ;;  %s125_s0 = inlined_call_operand.vmem [shape: f32[10,16], index: 0, kind: input, shape index: {}]   ;;  %s126_s1 = inlined_call_operand.vmem [shape: f32[1,160], index: 1, kind: output, shape index: {}]  }
   0x1   :  { %v63_v0 = vld [vmem:[%s125_s0 + $0x7] sm:$0x1]   ;;  %v65_v1 = vld [vmem:[%s125_s0 + $0x5] sm:$0x1]   ;;  %v64_v2 = vld [vmem:[%s125_s0 + $0x6] sm:$0x1]  }
   0x2   :  { %8 = vrot.lane.b32.xlu0 %v63_v0, %s78_s10  ;;  %20 = vrot.lane.b32.xlu1 %v65_v1, %s79_s11  ;;  %v66_v3 = vld [vmem:[%s125_s0 + $0x4] sm:$0x1]   ;;  %s2_s16 = smov 3  ;;  %s80_s17 = smov 96   ;;  %v67_v5 = vld [vmem:[%s125_s0 + $0x3] sm:$0x1]  }
   0x3   :  { %s81_s18 = smov 64   ;;  %v3_v4 = vld [vmem:[%s125_s0] ss:$8 sm:%s2_s16]   ;;  %v68_v6 = vld [vmem:[%s125_s0 + $0x2] sm:$0x1]   ;;  %s43_s25 = smov 3 }
   0x4   :  { %5 = vst.msk [vmem:[#allocation0] ss:$8 sm:$0x3] %vm4_vm0, %v3_v4   ;;  %s82_s26 = smov 48   ;;  %s83_s27 = smov 32   ;;  %vm28_vm4 = vcmask 654848  }
   0x5   :  { %v69_v7 = vld [vmem:[%s125_s0 + $0x1] ss:$8 sm:%s43_s25]   ;;  %s84_s0 = smov 16   ;;  %vm34_vm5 = vcmask 523648   ;;  %vm40_vm6 = vcmask 392448   ;;  %vm47_vm7 = vcmask 261248  }
   0x6   :  { %14 = vrot.lane.b32.xlu0 %v64_v2, %s80_s17  ;;  %26 = vrot.lane.b32.xlu1 %v66_v3, %s81_s18 }
   0xa   :  { %32 = vrot.lane.b32.xlu0 %v67_v5, %s82_s26  ;;  %38 = vrot.lane.b32.xlu1 %v68_v6, %s83_s27 }
   0xe   :  { %45 = vrot.lane.b32.xlu0 %v69_v7, %s84_s0 }
  0x74   :  { %v9_v8 = vpop.permute.xlu0 %8   ;;  %v21_v9 = vpop.permute.xlu1 %20  }
  0x75   :  { %11 = vst.msk [vmem:[#allocation0] sm:$0x1] %vm10_vm1, %v9_v8  }
  0x78   :  { %v15_v10 = vpop.permute.xlu0 %14   ;;  %v27_v11 = vpop.permute.xlu1 %26  }
  0x79   :  { %17 = vst.msk [vmem:[#allocation0] sm:$0x1] %vm16_vm2, %v15_v10  }
  0x7a   :  { %23 = vst.msk [vmem:[#allocation0] sm:$0x1] %vm22_vm3, %v21_v9  }
  0x7b   :  { %29 = vst.msk [vmem:[#allocation0] sm:$0x1] %vm28_vm4, %v27_v11  }
  0x7c   :  { %v33_v12 = vpop.permute.xlu0 %32   ;;  %v39_v13 = vpop.permute.xlu1 %38  }
  0x7d   :  { %35 = vst.msk [vmem:[#allocation0] sm:$0x1] %vm34_vm5, %v33_v12  }
  0x7e   :  { %41 = vst.msk [vmem:[#allocation0] sm:$0x1] %vm40_vm6, %v39_v13  }
  0x80   :  { %v46_v14 = vpop.permute.xlu0 %45  }
  0x81   :  { %48 = vst.msk [vmem:[#allocation0] ss:$8 sm:$0x3] %vm47_vm7, %v46_v14  }
  0x88   :  { %v53_v15 = vld [vmem:[#allocation0] sm:$0x1]  ;;  %v58_v16 = vld [vmem:[#allocation0 + $0x8] sm:$0x1] }
  0x89   :  { %56 = vst [vmem:[%s126_s1] sm:$0x1] %v53_v15  ;;  %70 = vst [vmem:[%s126_s1 + $0x1] sm:$0x1] %v58_v16 }

// kernel: lenet5_forward.1
= control target key start
LH: loop header
LB: loop body
LE: loop exit
PB: predicated region body
PF: predicated region fallthrough
CT: control target
= control target key end

     0   :  { %vm479_vm0 = vcmask 261120   ;;  %vm1213_vm1 = vcmask 1043456   ;;  %vm1214_vm2 = vcmask 326660   ;;  %vm1523_vm4 = vcmask 326656   ;;  %s9097_s1 = inlined_call_operand.vmem [shape: bf16[160,168], index: 1, kind: input, shape index: {}]   ;;  %s9098_s0 = inlined_call_operand.vmem [shape: bf16[28,16,160], index: 0, kind: input, shape index: {}]   ;;  %s9099_s3 = inlined_call_operand.vmem [shape: bf16[5,168,160], index: 3, kind: input, shape index: {}]   ;;  %s9100_s2 = inlined_call_operand.vmem [shape: f32[1,168], index: 2, kind: input, shape index: {}]   ;;  %s9101_s5 = inlined_call_operand.vmem [shape: bf16[10,160,128], index: 5, kind: input, shape index: {}]   ;;  %s9102_s4 = inlined_call_operand.vmem [shape: f32[1,160], index: 4, kind: input, shape index: {}]   ;;  %s9103_s7 = inlined_call_operand.vmem [shape: f32[128,128], index: 7, kind: input, shape index: {}]   ;;  %s9104_s9 = inlined_call_operand.vmem [shape: f32[128,128], index: 9, kind: input, shape index: {}]   ;;  %s9105_s6 = inlined_call_operand.vmem [shape: f32[1,128], index: 6, kind: input, shape index: {}]   ;;  %s9106_s8 = inlined_call_operand.vmem [shape: f32[1,128], index: 8, kind: input, shape index: {}]   ;;  %s9107_s10 = inlined_call_operand.vmem [shape: f32[1,128], index: 10, kind: input, shape index: {}]   ;;  %s9108_s11 = inlined_call_operand.vmem [shape: f32[16,128], index: 11, kind: output, shape index: {}]  }
   0x1   :  { %v6218_v0 = vld [vmem:[%s9097_s1 + $0x74] ss:$8 sps:$4 sm:$0xff]   ;;  %v6220_v1 = vld [vmem:[%s9097_s1 + $0x70] ss:$8 sps:$4 sm:$0xff]   ;;  %v6221_v2 = vld [vmem:[%s9097_s1 + $0x64] ss:$8 sps:$4 sm:$0xff]  }
   0x2   :  { %564 = vmatprep.subr.bf16.mxu0 %v6218_v0  ;;  %v6223_v3 = vld [vmem:[%s9097_s1 + $0x60] ss:$8 sps:$4 sm:$0xff]   ;;  %v6224_v4 = vld [vmem:[%s9097_s1 + $0x54] ss:$8 sps:$4 sm:$0xff]   ;;  %v6226_v5 = vld [vmem:[%s9097_s1 + $0x50] ss:$8 sps:$4 sm:$0xff]  }
   0x3   :  { %565 = vmatpush1.bf16.msra.mxu0 %v6220_v1  ;;  %v6227_v6 = vld [vmem:[%s9097_s1 + $0x44] ss:$8 sps:$4 sm:$0xff]   ;;  %v6229_v7 = vld [vmem:[%s9097_s1 + $0x40] ss:$8 sps:$4 sm:$0xff]   ;;  %v6230_v8 = vld [vmem:[%s9097_s1 + $0x34] ss:$8 sps:$4 sm:$0xff]  }
   0x4   :  { %566 = vmatprep.subr.bf16.mxu0 %v6221_v2  ;;  %v6250_v9 = vld [vmem:[%s9098_s0 + $0x4] ss:$8 sps:$4 sm:$0xff]   ;;  %v6232_v10 = vld [vmem:[%s9097_s1 + $0x30] ss:$8 sps:$4 sm:$0xff]   ;;  %v6235_v12 = vld [vmem:[%s9097_s1 + $0x20] ss:$8 sps:$4 sm:$0xff]  }
   0x5   :  { %v6233_v11 = vld [vmem:[%s9097_s1 + $0x24] ss:$8 sps:$4 sm:$0xff]   ;;  %5325 = vmatprep.mubr.msk.bf16.mxu0 %vm479_vm0, %v6250_v9  ;;  %v6236_v13 = vld [vmem:[%s9097_s1 + $0x14] ss:$8 sps:$4 sm:$0xff]   ;;  %v6238_v14 = vld [vmem:[%s9097_s1 + $0x10] ss:$8 sps:$4 sm:$0xff]  }
   0x6   :  { %v6239_v15 = vld [vmem:[%s9097_s1 + $0x4] ss:$8 sps:$4 sm:$0xff]   ;;  %v6241_v16 = vld [vmem:[%s9097_s1] ss:$8 sps:$4 sm:$0xff]   ;;  %v6242_v17 = vld [vmem:[%s9097_s1 + $0x94] ss:$8 sps:$4 sm:$0xff]  }
   0x7   :  { %567 = vmatpush1.bf16.msra.mxu0 %v6223_v3  ;;  %v6244_v18 = vld [vmem:[%s9097_s1 + $0x90] ss:$8 sps:$4 sm:$0xff]   ;;  %v6245_v19 = vld [vmem:[%s9097_s1 + $0x84] ss:$8 sps:$4 sm:$0xff]   ;;  %v6247_v20 = vld [vmem:[%s9097_s1 + $0x80] ss:$8 sps:$4 sm:$0xff]  }
   0x8   :  { %568 = vmatprep.subr.bf16.mxu0 %v6224_v4  ;;  %v6248_v21 = vld [vmem:[%s9098_s0] ss:$8 sps:$4 sm:$0xff]   ;;  %v6251_v22 = vld [vmem:[%s9098_s0 + $0x14] ss:$8 sps:$4 sm:$0xff]   ;;  %v6253_v23 = vld [vmem:[%s9098_s0 + $0x10] ss:$8 sps:$4 sm:$0xff]  }
   0x9   :  { %v6254_v24 = vld [vmem:[%s9098_s0 + $0x24] ss:$8 sps:$4 sm:$0xff]   ;;  %v6256_v25 = vld [vmem:[%s9098_s0 + $0x20] ss:$8 sps:$4 sm:$0xff]   ;;  %v6257_v26 = vld [vmem:[%s9098_s0 + $0x34] ss:$8 sps:$4 sm:$0xff]  }
   0xa   :  { %v6259_v27 = vld [vmem:[%s9098_s0 + $0x30] ss:$8 sps:$4 sm:$0xff]   ;;  %v6260_v28 = vld [vmem:[%s9098_s0 + $0x44] ss:$8 sps:$4 sm:$0xff]   ;;  %v6262_v29 = vld [vmem:[%s9098_s0 + $0x40] ss:$8 sps:$4 sm:$0xff]  }
   0xb   :  { %569 = vmatpush1.bf16.msra.mxu0 %v6226_v5  ;;  %v6263_v30 = vld [vmem:[%s9098_s0 + $0x54] ss:$8 sps:$4 sm:$0xff]   ;;  %v6265_v31 = vld [vmem:[%s9098_s0 + $0x50] ss:$8 sps:$4 sm:$0xff]   ;;  %v6266_v32 = vld [vmem:[%s9098_s0 + $0x64] ss:$8 sps:$4 sm:$0xff]  }
   0xc   :  { %570 = vmatprep.subr.bf16.mxu0 %v6227_v6  ;;  %v6268_v33 = vld [vmem:[%s9098_s0 + $0x60] ss:$8 sps:$4 sm:$0xff]   ;;  %v6269_v34 = vld [vmem:[%s9098_s0 + $0x74] ss:$8 sps:$4 sm:$0xff]   ;;  %v6271_v35 = vld [vmem:[%s9098_s0 + $0x70] ss:$8 sps:$4 sm:$0xff]  }
   0xd   :  { %v6272_v36 = vld [vmem:[%s9098_s0 + $0x84] ss:$8 sps:$4 sm:$0xff]   ;;  %v6274_v37 = vld [vmem:[%s9098_s0 + $0x80] ss:$8 sps:$4 sm:$0xff]   ;;  %v6275_v38 = vld [vmem:[%s9098_s0 + $0x94] ss:$8 sps:$4 sm:$0xff]  }
   0xe   :  { %v6277_v39 = vld [vmem:[%s9098_s0 + $0x90] ss:$8 sps:$4 sm:$0xff]   ;;  %v6278_v40 = vld [vmem:[%s9098_s0 + $0xa4] ss:$8 sps:$4 sm:$0xff]   ;;  %v6280_v41 = vld [vmem:[%s9098_s0 + $0xa0] ss:$8 sps:$4 sm:$0xff]  }
   0xf   :  { %571 = vmatpush1.bf16.msra.mxu0 %v6229_v7  ;;  %v6281_v42 = vld [vmem:[%s9098_s0 + $0xb4] ss:$8 sps:$4 sm:$0xff]   ;;  %v6316_v44 = vld [vmem:[%s9099_s3 + $0x118] ss:$8 sps:$4 sm:$0xff]   ;;  %v6284_v46 = vld [vmem:[%s9098_s0 + $0xc4] ss:$8 sps:$4 sm:$0xff]  }
  0x10   :  { %572 = vmatprep.subr.bf16.mxu0 %v6230_v8  ;;  %v6314_v43 = vld [vmem:[%s9099_s3 + $0x11c] ss:$8 sps:$4 sm:$0xff]   ;;  %v6283_v45 = vld [vmem:[%s9098_s0 + $0xb0] ss:$8 sps:$4 sm:$0xff]   ;;  %v6317_v47 = vld [vmem:[%s9099_s3 + $0x10c] ss:$8 sps:$4 sm:$0xff]  }
  0x11   :  { %1560 = vmatprep.subr.bf16.mxu1 %v6314_v43  ;;  %v6319_v48 = vld [vmem:[%s9099_s3 + $0x108] ss:$8 sps:$4 sm:$0xff]   ;;  %v6320_v49 = vld [vmem:[%s9099_s3 + $0xfc] ss:$8 sps:$4 sm:$0xff]   ;;  %v6322_v50 = vld [vmem:[%s9099_s3 + $0xf8] ss:$8 sps:$4 sm:$0xff]  }
  0x12   :  { %1561 = vmatpush1.bf16.msra.mxu1 %v6316_v44  ;;  %v6286_v51 = vld [vmem:[%s9098_s0 + $0xc0] ss:$8 sps:$4 sm:$0xff]   ;;  %v6287_v52 = vld [vmem:[%s9098_s0 + $0xd4] ss:$8 sps:$4 sm:$0xff]   ;;  %v6289_v57 = vld [vmem:[%s9098_s0 + $0xd0] ss:$8 sps:$4 sm:$0xff]  }
  0x13   :  { %573 = vmatpush1.bf16.msra.mxu0 %v6232_v10  ;;  %1562 = vmatprep.subr.bf16.mxu1 %v6317_v47  ;;  %v6323_v53 = vld [vmem:[%s9099_s3 + $0xec] ss:$8 sps:$4 sm:$0xff]   ;;  %v6325_v54 = vld [vmem:[%s9099_s3 + $0xe8] ss:$8 sps:$4 sm:$0xff]   ;;  %v6326_v55 = vld [vmem:[%s9099_s3 + $0xdc] ss:$8 sps:$4 sm:$0xff]  }
  0x14   :  { %574 = vmatprep.subr.bf16.mxu0 %v6233_v11  ;;  %v6328_v56 = vld [vmem:[%s9099_s3 + $0xd8] ss:$8 sps:$4 sm:$0xff]   ;;  %v6290_v58 = vld [vmem:[%s9098_s0 + $0xe4] ss:$8 sps:$4 sm:$0xff]   ;;  %v6331_v60 = vld [vmem:[%s9099_s3 + $0xc8] ss:$8 sps:$4 sm:$0xff]  }
  0x15   :  { %v6329_v59 = vld [vmem:[%s9099_s3 + $0xcc] ss:$8 sps:$4 sm:$0xff]   ;;  %v6332_v61 = vld [vmem:[%s9099_s3 + $0xbc] ss:$8 sps:$4 sm:$0xff]   ;;  %v6334_v62 = vld [vmem:[%s9099_s3 + $0xb8] ss:$8 sps:$4 sm:$0xff]  }
  0x16   :  { %1563 = vmatpush1.bf16.msra.mxu1 %v6319_v48  ;;  %v6292_v63 = vld [vmem:[%s9098_s0 + $0xe0] ss:$8 sps:$4 sm:$0xff]   ;;  %v6293_v0 = vld [vmem:[%s9098_s0 + $0xf4] ss:$8 sps:$4 sm:$0xff]   ;;  %v6295_v9 = vld [vmem:[%s9098_s0 + $0xf0] ss:$8 sps:$4 sm:$0xff]  }
  0x17   :  { %575 = vmatpush1.bf16.msra.mxu0 %v6235_v12  ;;  %1564 = vmatprep.subr.bf16.mxu1 %v6320_v49  ;;  %v6337_v1 = vld [vmem:[%s9099_s3 + $0xac] ss:$8 sps:$4 sm:$0xff]   ;;  %v6339_v2 = vld [vmem:[%s9099_s3 + $0xa8] ss:$8 sps:$4 sm:$0xff]   ;;  %v6348_v11 = vld [vmem:[%s9099_s3 + $0x13c] ss:$8 sps:$4 sm:$0xff]  }
  0x18   :  { %576 = vmatprep.subr.bf16.mxu0 %v6236_v13  ;;  %v5401_v3 = vld [vmem:[%s9099_s3 + $0x148] sm:$0xff]  ;;  %v6352_v12 = vld [vmem:[%s9099_s3 + $0x25c] ss:$8 sps:$4 sm:$0xff]   ;;  %v6350_v13 = vld [vmem:[%s9099_s3 + $0x258] ss:$8 sps:$4 sm:$0xff]   ;;  %vm3610_vm5 = vcmask 261124  }
  0x19   :  { %v5443_v4 = vcombine.high %v5401_v3, %v5401_v3  ;;  %v6343_v5 = vld [vmem:[%s9099_s3 + $0x26c] ss:$8 sps:$4 sm:$0xff]   ;;  %v5442_v6 = vcombine.low %v5401_v3, %v5401_v3  ;;  %v6341_v7 = vld [vmem:[%s9099_s3 + $0x268] ss:$8 sps:$4 sm:$0xff]   ;;  %v6397_v43 = vld [vmem:[%s9099_s3 + $0x27c] ss:$8 sps:$4 sm:$0xff]  }
  0x1a   :  { %1565 = vmatpush1.bf16.msra.mxu1 %v6322_v50  ;;  %v6296_v10 = vld [vmem:[%s9098_s0 + $0x104] ss:$8 sps:$4 sm:$0xff]   ;;  %v6395_v44 = vld [vmem:[%s9099_s3 + $0x278] ss:$8 sps:$4 sm:$0xff]   ;;  %vm7486_vm3 = vmor %vm1214_vm2, %vm1213_vm1 }
  0x1b   :  { %577 = vmatpush1.bf16.msra.mxu0 %v6238_v14  ;;  %1566 = vmatprep.subr.bf16.mxu1 %v6323_v53  ;;  %v1555_v8 = vsel %vm1213_vm1, %v5442_v6, 0  ;;  %v6353_v14 = vld [vmem:[%s9099_s3 + $0x138] ss:$8 sps:$4 sm:$0xff]   ;;  %v6335_v48 = vld [vmem:[%s9098_s0 + $0x164] ss:$8 sps:$4 sm:$0xff]   ;;  %vm8502_vm6 = vmor %vm3610_vm5, %vm1213_vm1 }
  0x1c   :  { %578 = vmatprep.subr.bf16.mxu0 %v6239_v15  ;;  %v6354_v15 = vld [vmem:[%s9099_s3 + $0x12c] ss:$8 sps:$4 sm:$0xff]   ;;  %v6313_v47 = vld [vmem:[%s9098_s0 + $0x150] ss:$8 sps:$4 sm:$0xff]   ;;  %v83_v49 = vld [vmem:[%s9098_s0 + $0x160] sm:$0xff] }
  0x1d   :  { %v84_v50 = vld [vmem:[%s9098_s0 + $0x168] sm:$0xff]  ;;  %v6347_v53 = vld [vmem:[%s9098_s0 + $0x170] ss:$8 sps:$4 sm:$0xff]  }
  0x1e   :  { %1567 = vmatpush1.bf16.msra.mxu1 %v6325_v54  ;;  %v6360_v54 = vld [vmem:[%s9098_s0 + $0x184] ss:$8 sps:$4 sm:$0xff]  }
  0x1f   :  { %579 = vmatpush1.bf16.msra.mxu0 %v6241_v16  ;;  %1568 = vmatprep.subr.bf16.mxu1 %v6326_v55  ;;  %v6358_v16 = vld [vmem:[%s9099_s3 + $0x24c] ss:$8 sps:$4 sm:$0xff]   ;;  %v117_v55 = vlaneseq }
  0x20   :  { %592 = vmatprep.subr.bf16.mxu0 %v6242_v17  ;;  %v6356_v17 = vld [vmem:[%s9099_s3 + $0x248] ss:$8 sps:$4 sm:$0xff]   ;;  %v6380_v6 = vld [vmem:[%s9098_s0 + $0x1a4] ss:$8 sps:$4 sm:$0xff]  }
  0x22   :  { %1569 = vmatpush1.bf16.msra.mxu1 %v6328_v56  ;;  %v87_v56 = vld [vmem:[%s9098_s0 + $0x180] sm:$0xff] }
  0x23   :  { %593 = vmatpush2.bf16.msra.mxu0 %v6244_v18  ;;  %1570 = vmatprep.subr.bf16.mxu1 %v6329_v59  ;;  %v6359_v18 = vld [vmem:[%s9099_s3 + $0x128] ss:$8 sps:$4 sm:$0xff]  }
  0x24   :  { %594 = vmatprep.subr.bf16.mxu0 %v6245_v19  ;;  %v6298_v19 = vld [vmem:[%s9098_s0 + $0x100] ss:$8 sps:$4 sm:$0xff]  }
  0x26   :  { %1571 = vmatpush1.bf16.msra.mxu1 %v6331_v60  ;;  %v6371_v60 = vld [vmem:[%s9098_s0 + $0x194] ss:$8 sps:$4 sm:$0xff]  }
  0x27   :  { %595 = vmatpush2.bf16.msra.mxu0 %v6247_v20  ;;  %1572 = vmatprep.subr.bf16.mxu1 %v6332_v61  ;;  %v6367_v20 = vld [vmem:[%s9099_s3 + $0x23c] ss:$8 sps:$4 sm:$0xff]  }
  0x28   :  { %2778 = vmatprep.subr.bf16.mxu0 %v6343_v5  ;;  %v6373_v5 = vld [vmem:[%s9098_s0 + $0x190] ss:$8 sps:$4 sm:$0xff]  }
  0x2a   :  { %597 = vmatmul.mubr.bf16.vlgmr.msra.gmra.mxu0 %v6248_v21  ;;  %1573 = vmatpush1.bf16.msra.mxu1 %v6334_v62  ;;  %v6365_v21 = vld [vmem:[%s9099_s3 + $0x238] ss:$8 sps:$4 sm:$0xff]  }
  0x2b   :  { %5326 = vmatprep.mubr.msk.bf16.mxu0 %vm479_vm0, %v6251_v22  ;;  %1574 = vmatprep.subr.bf16.mxu1 %v6337_v1  ;;  %v6299_v22 = vld [vmem:[%s9098_s0 + $0x114] ss:$8 sps:$4 sm:$0xff]   ;;  %v115_v62 = vld [vmem:[%s9100_s2] sm:$0x3] }
  0x2c   :  { %2779 = vmatpush1.bf16.msra.mxu0 %v6341_v7 }
  0x2d   :  { %2780 = vmatprep.subr.bf16.mxu0 %v6352_v12  ;;  %v91_v12 = vld [vmem:[%s9098_s0 + $0x1a0] sm:$0xff] }
  0x2e   :  { %1575 = vmatpush1.bf16.msra.mxu1 %v6339_v2 }
  0x2f   :  { %5444 = vmatprep.subr.msk.bf16.mxu1 %vm1213_vm1, %v5443_v4 }
  0x30   :  { %2781 = vmatpush1.bf16.msra.mxu0 %v6350_v13  ;;  %v92_v13 = vld [vmem:[%s9098_s0 + $0x1a8] sm:$0xff] }
  0x31   :  { %2782 = vmatprep.subr.bf16.mxu0 %v6358_v16 }
  0x32   :  { %607 = vmatmul.mubr.bf16.gmra.mxu0 %v6253_v23  ;;  %1587 = vmatpush2.bf16.msra.mxu1 %v1555_v8  ;;  %v6370_v23 = vld [vmem:[%s9099_s3 + $0x22c] ss:$8 sps:$4 sm:$0xff]  }
  0x33   :  { %5327 = vmatprep.mubr.msk.bf16.mxu0 %vm479_vm0, %v6254_v24  ;;  %1588 = vmatprep.subr.bf16.mxu1 %v6348_v11  ;;  %v6368_v24 = vld [vmem:[%s9099_s3 + $0x228] ss:$8 sps:$4 sm:$0xff]  }
  0x34   :  { %2783 = vmatpush1.bf16.msra.mxu0 %v6356_v17 }
  0x35   :  { %2784 = vmatprep.subr.bf16.mxu0 %v6367_v20 }
  0x36   :  { %1589 = vmatpush2.bf16.msra.mxu1 %v6353_v14 }
  0x37   :  { %1590 = vmatprep.subr.bf16.mxu1 %v6354_v15 }
  0x38   :  { %2785 = vmatpush1.bf16.msra.mxu0 %v6365_v21  ;;  %v6389_v21 = vld [vmem:[%s9098_s0 + $0x1b4] ss:$8 sps:$4 sm:$0xff]  }
  0x39   :  { %2786 = vmatprep.subr.bf16.mxu0 %v6370_v23 }
  0x3a   :  { %617 = vmatmul.mubr.bf16.gmra.mxu0 %v6256_v25  ;;  %1591 = vmatpush2.bf16.msra.mxu1 %v6359_v18  ;;  %v6376_v25 = vld [vmem:[%s9099_s3 + $0x21c] ss:$8 sps:$4 sm:$0xff]  }
  0x3b   :  { %5328 = vmatprep.mubr.msk.bf16.mxu0 %vm479_vm0, %v6257_v26  ;;  %v6301_v26 = vld [vmem:[%s9098_s0 + $0x110] ss:$8 sps:$4 sm:$0xff]  }
  0x3c   :  { %2787 = vmatpush1.bf16.msra.mxu0 %v6368_v24 }
  0x3d   :  { %2788 = vmatprep.subr.bf16.mxu0 %v6376_v25 }
  0x42   :  { %627 = vmatmul.mubr.bf16.gmra.mxu0 %v6259_v27  ;;  %v6374_v27 = vld [vmem:[%s9099_s3 + $0x218] ss:$8 sps:$4 sm:$0xff]  }
  0x43   :  { %5329 = vmatprep.mubr.msk.bf16.mxu0 %vm479_vm0, %v6260_v28  ;;  %v6302_v28 = vld [vmem:[%s9098_s0 + $0x124] ss:$8 sps:$4 sm:$0xff]   ;;  %2789 = vmatpush1.bf16.msra.mxu0 %v6374_v27 }
  0x4a   :  { %637 = vmatmul.mubr.bf16.gmra.mxu0 %v6262_v29  ;;  %v6379_v29 = vld [vmem:[%s9099_s3 + $0x20c] ss:$8 sps:$4 sm:$0xff]  }
  0x4b   :  { %5330 = vmatprep.mubr.msk.bf16.mxu0 %vm479_vm0, %v6263_v30  ;;  %v6377_v30 = vld [vmem:[%s9099_s3 + $0x208] ss:$8 sps:$4 sm:$0xff]   ;;  %2790 = vmatprep.subr.bf16.mxu0 %v6379_v29 }
  0x4c   :  { %2791 = vmatpush1.bf16.msra.mxu0 %v6377_v30 }
  0x52   :  { %647 = vmatmul.mubr.bf16.gmra.mxu0 %v6265_v31  ;;  %v6386_v31 = vld [vmem:[%s9099_s3 + $0x1fc] ss:$8 sps:$4 sm:$0xff]  }
  0x53   :  { %5331 = vmatprep.mubr.msk.bf16.mxu0 %vm479_vm0, %v6266_v32  ;;  %v6304_v32 = vld [vmem:[%s9098_s0 + $0x120] ss:$8 sps:$4 sm:$0xff]   ;;  %2792 = vmatprep.subr.bf16.mxu0 %v6386_v31 }
  0x5a   :  { %657 = vmatmul.mubr.bf16.gmra.mxu0 %v6268_v33  ;;  %v6384_v33 = vld [vmem:[%s9099_s3 + $0x1f8] ss:$8 sps:$4 sm:$0xff]  }
  0x5b   :  { %5332 = vmatprep.mubr.msk.bf16.mxu0 %vm479_vm0, %v6269_v34  ;;  %v6305_v34 = vld [vmem:[%s9098_s0 + $0x134] ss:$8 sps:$4 sm:$0xff]   ;;  %2793 = vmatpush1.bf16.msra.mxu0 %v6384_v33 }
  0x62   :  { %667 = vmatmul.mubr.bf16.gmra.mxu0 %v6271_v35  ;;  %v5602_v35 = vld [vmem:[%s9099_s3 + $0x298] sm:$0xff] }
  0x63   :  { %5333 = vmatprep.mubr.msk.bf16.mxu0 %vm479_vm0, %v6272_v36  ;;  %v5644_v36 = vcombine.high %v5602_v35, %v5602_v35 }
  0x65   :  { %5645 = vmatprep.subr.msk.bf16.mxu0 %vm1213_vm1, %v5644_v36 }
  0x6a   :  { %677 = vmatmul.mubr.bf16.gmra.mxu0 %v6274_v37  ;;  %v5643_v37 = vcombine.low %v5602_v35, %v5602_v35 }
  0x6b   :  { %5334 = vmatprep.mubr.msk.bf16.mxu0 %vm479_vm0, %v6275_v38 }
  0x6c   :  { %v2773_v38 = vsel %vm1213_vm1, %v5643_v37, 0 }
  0x6d   :  { %2805 = vmatpush2.bf16.msra.mxu0 %v2773_v38 }
  0x72   :  { %687 = vmatmul.mubr.bf16.gmra.mxu0 %v6277_v39  ;;  %v6394_v39 = vld [vmem:[%s9099_s3 + $0x28c] ss:$8 sps:$4 sm:$0xff]  }
  0x73   :  { %5335 = vmatprep.mubr.msk.bf16.mxu0 %vm479_vm0, %v6278_v40  ;;  %v6307_v40 = vld [vmem:[%s9098_s0 + $0x130] ss:$8 sps:$4 sm:$0xff]   ;;  %2806 = vmatprep.subr.bf16.mxu0 %v6394_v39 }
  0x7a   :  { %697 = vmatmul.mubr.bf16.gmra.mxu0 %v6280_v41  ;;  %v6392_v41 = vld [vmem:[%s9099_s3 + $0x288] ss:$8 sps:$4 sm:$0xff]  }
  0x7b   :  { %5336 = vmatprep.mubr.msk.bf16.mxu0 %vm479_vm0, %v6281_v42  ;;  %v6308_v42 = vld [vmem:[%s9098_s0 + $0x144] ss:$8 sps:$4 sm:$0xff]   ;;  %2807 = vmatpush2.bf16.msra.mxu0 %v6392_v41 }
  0x7c   :  { %2808 = vmatprep.subr.bf16.mxu0 %v6397_v43 }
  0x7f   :  { %2809 = vmatpush2.bf16.msra.mxu0 %v6395_v44 }
  0x82   :  { %707 = vmatmul.mubr.bf16.gmra.mxu0 %v6283_v45  ;;  %v6310_v45 = vld [vmem:[%s9098_s0 + $0x140] ss:$8 sps:$4 sm:$0xff]  }
  0x83   :  { %5337 = vmatprep.mubr.msk.bf16.mxu0 %vm479_vm0, %v6284_v46  ;;  %v6311_v46 = vld [vmem:[%s9098_s0 + $0x154] ss:$8 sps:$4 sm:$0xff]  }
  0x8a   :  { %717 = vmatmul.mubr.bf16.gmra.mxu0 %v6286_v51  ;;  %v5293_v51 = vcombine.low %v83_v49, %v84_v50 }
  0x8b   :  { %5338 = vmatprep.mubr.msk.bf16.mxu0 %vm479_vm0, %v6287_v52  ;;  %v6345_v52 = vld [vmem:[%s9098_s0 + $0x174] ss:$8 sps:$4 sm:$0xff]  }
  0x92   :  { %727 = vmatmul.mubr.bf16.gmra.mxu0 %v6289_v57  ;;  %v88_v57 = vld [vmem:[%s9098_s0 + $0x188] sm:$0xff] }
  0x93   :  { %5339 = vmatprep.mubr.msk.bf16.mxu0 %vm479_vm0, %v6290_v58  ;;  %v7430_v58 = vshrl.u32 %v117_v55, 7  ;;  %v5297_v59 = vcombine.low %v87_v56, %v88_v57 }
  0x95   :  { %9115 = vst [vmem:[#allocation4_spill] sm:$0xff] %v7430_v58  ;;  %v9110_v61 = vsub.s32 0, %v7430_v58 }
  0x97   :  { %v7443_v1 = vrot.slane %v115_v62, %v9110_v61 }
  0x9a   :  { %737 = vmatmul.mubr.bf16.gmra.mxu0 %v6292_v63 }
  0x9b   :  { %5340 = vmatprep.mubr.msk.bf16.mxu0 %vm479_vm0, %v6293_v0  ;;  %v9109_v0 = vsub.s32 1, %v7430_v58 }
  0x9d   :  { %v7447_v3 = vrot.slane %v115_v62, %v9109_v0 }
  0xa2   :  { %747 = vmatmul.mubr.bf16.gmra.mxu0 %v6295_v9 }
  0xa3   :  { %5341 = vmatprep.mubr.msk.bf16.mxu0 %vm479_vm0, %v6296_v10 }
  0xaa   :  { %757 = vmatmul.mubr.bf16.gmra.mxu0 %v6298_v19  ;;  %v5301_v19 = vcombine.low %v91_v12, %v92_v13 }
  0xab   :  { %5342 = vmatprep.mubr.msk.bf16.mxu0 %vm479_vm0, %v6299_v22 }
  0xb2   :  { %767 = vmatmul.mubr.bf16.gmra.mxu0 %v6301_v26  ;;  %v6407_v26 = vld [vmem:[%s9099_s3 + $0x74] ss:$8 sps:$4 sm:$0xff]  }
  0xb3   :  { %5343 = vmatprep.mubr.msk.bf16.mxu0 %vm479_vm0, %v6302_v28  ;;  %v6391_v28 = vld [vmem:[%s9098_s0 + $0x1b0] ss:$8 sps:$4 sm:$0xff]   ;;  %1924 = vmatprep.subr.bf16.mxu1 %v6407_v26 }
  0xba   :  { %777 = vmatmul.mubr.bf16.gmra.mxu0 %v6304_v32 }
  0xbb   :  { %5344 = vmatprep.mubr.msk.bf16.mxu0 %vm479_vm0, %v6305_v34 }
  0xc2   :  { %787 = vmatmul.mubr.bf16.gmra.mxu0 %v6307_v40 }
  0xc3   :  { %5345 = vmatprep.mubr.msk.bf16.mxu0 %vm479_vm0, %v6308_v42 }
  0xca   :  { %797 = vmatmul.mubr.bf16.gmra.mxu0 %v6310_v45  ;;  %v6481_v45 = vld [vmem:[%s9099_s3 + $0x1d0] ss:$8 sps:$4 sm:$0xff]  }
  0xcb   :  { %5346 = vmatprep.mubr.msk.bf16.mxu0 %vm479_vm0, %v6311_v46 }
  0xd2   :  { %807 = vmatmul.mubr.bf16.gmra.mxu0 %v6313_v47 }
  0xd3   :  { %5347 = vmatprep.mubr.msk.bf16.mxu0 %vm479_vm0, %v6335_v48 }
  0xda   :  { %817 = vmatmul.mubr.bf16.gmra.mxu0 %v5293_v51 }
  0xdb   :  { %5348 = vmatprep.mubr.msk.bf16.mxu0 %vm479_vm0, %v6345_v52 }
  0xe2   :  { %827 = vmatmul.mubr.bf16.gmra.mxu0 %v6347_v53 }
  0xe3   :  { %5349 = vmatprep.mubr.msk.bf16.mxu0 %vm479_vm0, %v6360_v54 }
  0xea   :  { %v598_v63 = vpop.f32.mrf.mxu0  ;;  %837 = vmatmul.mubr.bf16.gmra.mxu0 %v5297_v59 }
  0xeb   :  { %5350 = vmatprep.mubr.msk.bf16.mxu0 %vm479_vm0, %v6371_v60  ;;  %v599_v7 = vadd.f32 %v598_v63, %v7443_v1 }
  0xec   :  { %v600_v2 = vpop.f32.mrf.mxu0 }
  0xed   :  { %v601_v9 = vadd.f32 %v600_v2, %v7447_v3  ;;  %6676 = vtanh.f32 %v599_v7 }
  0xee   :  { %v602_v4 = vpop.f32.mrf.mxu0 }
  0xef   :  { %v603_v14 = vadd.f32 %v602_v4, %v7443_v1 }
  0xf0   :  { %v604_v8 = vpop.f32.mrf.mxu0 }
  0xf1   :  { %v605_v17 = vadd.f32 %v604_v8, %v7447_v3 }
  0xf2   :  { %v608_v10 = vpop.f32.mrf.mxu0  ;;  %847 = vmatmul.mubr.bf16.gmra.mxu0 %v6373_v5 }
  0xf3   :  { %v609_v11 = vadd.f32 %v608_v10, %v7443_v1  ;;  %5351 = vmatprep.mubr.msk.bf16.mxu0 %vm479_vm0, %v6380_v6 }
  0xf4   :  { %v610_v15 = vpop.f32.mrf.mxu0 }
  0xf5   :  { %6678 = vtanh.f32 %v609_v11  ;;  %v611_v16 = vadd.f32 %v610_v15, %v7447_v3 }
  0xf6   :  { %6680 = vtanh.f32 %v601_v9  ;;  %v612_v18 = vpop.f32.mrf.mxu0 }
  0xf7   :  { %6682 = vtanh.f32 %v611_v16  ;;  %v613_v20 = vadd.f32 %v612_v18, %v7443_v1 }
  0xf8   :  { %6684 = vtanh.f32 %v603_v14  ;;  %v614_v22 = vpop.f32.mrf.mxu0 }
  0xf9   :  { %6686 = vtanh.f32 %v613_v20  ;;  %v615_v23 = vadd.f32 %v614_v22, %v7447_v3 }
  0xfa   :  { %6688 = vtanh.f32 %v605_v17  ;;  %v618_v24 = vpop.f32.mrf.mxu0  ;;  %857 = vmatmul.mubr.bf16.gmra.mxu0 %v5301_v19  ;;  %v6677_v31 = vpop.eup %6676 }
  0xfb   :  { %6690 = vtanh.f32 %v615_v23  ;;  %5352 = vmatprep.mubr.msk.bf16.mxu0 %vm479_vm0, %v6389_v21  ;;  %v619_v29 = vadd.f32 %v618_v24, %v7443_v1 }
  0xfc   :  { %v620_v25 = vpop.f32.mrf.mxu0 }
  0xfd   :  { %v621_v33 = vadd.f32 %v620_v25, %v7447_v3  ;;  %6692 = vtanh.f32 %v619_v29 }
  0xfe   :  { %v622_v27 = vpop.f32.mrf.mxu0 }
  0xff   :  { %v623_v38 = vadd.f32 %v622_v27, %v7443_v1 }
 0x100   :  { %v624_v30 = vpop.f32.mrf.mxu0 }
 0x101   :  { %v625_v46 = vadd.f32 %v624_v30, %v7447_v3 }
 0x102   :  { %v6679_v32 = vpop.eup %6678  ;;  %v628_v34 = vpop.f32.mrf.mxu0  ;;  %867 = vmatmul.mubr.bf16.gmra.mxu0 %v6391_v28 }
 0x103   :  { %v6681_v35 = vpop.eup %6680  ;;  %v629_v36 = vadd.f32 %v628_v34, %v7443_v1  ;;  %v989_v41 = vadd.f32 %v6679_v32, %v6677_v31 }
 0x104   :  { %v6683_v37 = vpop.eup %6682  ;;  %v630_v39 = vpop.f32.mrf.mxu0 }
 0x105   :  { %v6685_v40 = vpop.eup %6684  ;;  %v990_v42 = vadd.f32 %v6683_v37, %v6681_v35  ;;  %6694 = vtanh.f32 %v629_v36  ;;  %v631_v43 = vadd.f32 %v630_v39, %v7447_v3  ;;  %v6405_v39 = vld [vmem:[%s9099_s3 + $0x70] ss:$8 sps:$4 sm:$0xff]  }
 0x106   :  { %v6687_v44 = vpop.eup %6686  ;;  %6696 = vtanh.f32 %v621_v33  ;;  %v632_v47 = vpop.f32.mrf.mxu0 }
 0x107   :  { %v6689_v48 = vpop.eup %6688  ;;  %v6063_v49 = vpack.c.bf16 %v990_v42, %v989_v41  ;;  %6698 = vtanh.f32 %v631_v43  ;;  %v633_v50 = vadd.f32 %v632_v47, %v7443_v1  ;;  %v991_v53 = vadd.f32 %v6687_v44, %v6685_v40 }
 0x108   :  { %v6691_v51 = vpop.eup %6690  ;;  %6700 = vtanh.f32 %v623_v38  ;;  %v634_v52 = vpop.f32.mrf.mxu0 }
 0x109   :  { %1216 = vst.msk [vmem:[#allocation2] sm:$0xff] %vm7486_vm3, %v6063_v49  ;;  %v992_v54 = vadd.f32 %v6691_v51, %v6689_v48  ;;  %6702 = vtanh.f32 %v633_v50  ;;  %v635_v55 = vadd.f32 %v634_v52, %v7447_v3  ;;  %v6412_v50 = vld [vmem:[%s9099_s3 + $0x64] ss:$8 sps:$4 sm:$0xff]  }
 0x10a   :  { %6704 = vtanh.f32 %v625_v46  ;;  %v638_v56 = vpop.f32.mrf.mxu0  ;;  %v6693_v2 = vpop.eup %6692 }
 0x10b   :  { %v6064_v57 = vpack.c.bf16 %v992_v54, %v991_v53  ;;  %6706 = vtanh.f32 %v635_v55  ;;  %v639_v62 = vadd.f32 %v638_v56, %v7443_v1 }
 0x10c   :  { %v640_v59 = vpop.f32.mrf.mxu0 }
 0x10d   :  { %1217 = vst.msk [vmem:[#allocation2 + $0x8] sm:$0xff] %vm7486_vm3, %v6064_v57  ;;  %v641_v5 = vadd.f32 %v640_v59, %v7447_v3  ;;  %6708 = vtanh.f32 %v639_v62 }
 0x10e   :  { %v642_v60 = vpop.f32.mrf.mxu0 }
 0x10f   :  { %v643_v10 = vadd.f32 %v642_v60, %v7443_v1  ;;  %v6410_v60 = vld [vmem:[%s9099_s3 + $0x60] ss:$8 sps:$4 sm:$0xff]  }
 0x110   :  { %v644_v63 = vpop.f32.mrf.mxu0 }
 0x111   :  { %v645_v17 = vadd.f32 %v644_v63, %v7447_v3 }
 0x112   :  { %v6695_v4 = vpop.eup %6694  ;;  %v648_v6 = vpop.f32.mrf.mxu0 }
 0x113   :  { %v6697_v7 = vpop.eup %6696  ;;  %v649_v8 = vadd.f32 %v648_v6, %v7443_v1  ;;  %v993_v13 = vadd.f32 %v6695_v4, %v6693_v2  ;;  %v6415_v4 = vld [vmem:[%s9099_s3 + $0x54] ss:$8 sps:$4 sm:$0xff]  }
 0x114   :  { %v6699_v9 = vpop.eup %6698  ;;  %v650_v11 = vpop.f32.mrf.mxu0 }
 0x115   :  { %v6701_v12 = vpop.eup %6700  ;;  %v994_v14 = vadd.f32 %v6699_v9, %v6697_v7  ;;  %6710 = vtanh.f32 %v649_v8  ;;  %v651_v15 = vadd.f32 %v650_v11, %v7447_v3  ;;  %v6413_v8 = vld [vmem:[%s9099_s3 + $0x50] ss:$8 sps:$4 sm:$0xff]   ;;  %v6418_v9 = vld [vmem:[%s9099_s3 + $0x44] ss:$8 sps:$4 sm:$0xff]  }
 0x116   :  { %v6703_v16 = vpop.eup %6702  ;;  %6712 = vtanh.f32 %v641_v5  ;;  %v652_v18 = vpop.f32.mrf.mxu0 }
 0x117   :  { %v6705_v19 = vpop.eup %6704  ;;  %v6065_v20 = vpack.c.bf16 %v994_v14, %v993_v13  ;;  %6714 = vtanh.f32 %v651_v15  ;;  %v653_v21 = vadd.f32 %v652_v18, %v7443_v1  ;;  %v995_v24 = vadd.f32 %v6703_v16, %v6701_v12  ;;  %v6416_v13 = vld [vmem:[%s9099_s3 + $0x40] ss:$8 sps:$4 sm:$0xff]   ;;  %v6423_v15 = vld [vmem:[%s9099_s3 + $0x34] ss:$8 sps:$4 sm:$0xff]  }
 0x118   :  { %v6707_v22 = vpop.eup %6706  ;;  %6716 = vtanh.f32 %v643_v10  ;;  %v654_v23 = vpop.f32.mrf.mxu0 }
 0x119   :  { %1218 = vst.msk [vmem:[#allocation2 + $0x10] sm:$0xff] %vm7486_vm3, %v6065_v20  ;;  %v996_v25 = vadd.f32 %v6707_v22, %v6705_v19  ;;  %6718 = vtanh.f32 %v653_v21  ;;  %v655_v26 = vadd.f32 %v654_v23, %v7447_v3  ;;  %v6421_v22 = vld [vmem:[%s9099_s3 + $0x30] ss:$8 sps:$4 sm:$0xff]  }
 0x11a   :  { %6720 = vtanh.f32 %v645_v17  ;;  %v658_v27 = vpop.f32.mrf.mxu0  ;;  %v6709_v33 = vpop.eup %6708 }
 0x11b   :  { %v6066_v28 = vpack.c.bf16 %v996_v25, %v995_v24  ;;  %6722 = vtanh.f32 %v655_v26  ;;  %v659_v31 = vadd.f32 %v658_v27, %v7443_v1 }
 0x11c   :  { %v660_v29 = vpop.f32.mrf.mxu0 }
 0x11d   :  { %1219 = vst.msk [vmem:[#allocation2 + $0x18] sm:$0xff] %vm7486_vm3, %v6066_v28  ;;  %v661_v35 = vadd.f32 %v660_v29, %v7447_v3  ;;  %6724 = vtanh.f32 %v659_v31 }
 0x11e   :  { %v662_v30 = vpop.f32.mrf.mxu0 }
 0x11f   :  { %v663_v41 = vadd.f32 %v662_v30, %v7443_v1 }
 0x120   :  { %v664_v32 = vpop.f32.mrf.mxu0 }
 0x121   :  { %v665_v52 = vadd.f32 %v664_v32, %v7447_v3 }
 0x122   :  { %v6711_v34 = vpop.eup %6710  ;;  %v668_v36 = vpop.f32.mrf.mxu0 }
 0x123   :  { %v6713_v37 = vpop.eup %6712  ;;  %v669_v38 = vadd.f32 %v668_v36, %v7443_v1  ;;  %v997_v47 = vadd.f32 %v6711_v34, %v6709_v33  ;;  %v6426_v33 = vld [vmem:[%s9099_s3 + $0x24] ss:$8 sps:$4 sm:$0xff]  }
 0x124   :  { %v6715_v40 = vpop.eup %6714  ;;  %v670_v42 = vpop.f32.mrf.mxu0  ;;  %v6362_v43 = vld [vmem:[#allocation2 + $0x10] ss:$8 sps:$4 sm:$0xff]   ;;  %v6364_v44 = vld [vmem:[#allocation2 + $0x14] ss:$8 sps:$4 sm:$0xff]  }
 0x125   :  { %v6717_v46 = vpop.eup %6716  ;;  %v998_v48 = vadd.f32 %v6715_v40, %v6713_v37  ;;  %6726 = vtanh.f32 %v669_v38  ;;  %v671_v49 = vadd.f32 %v670_v42, %v7447_v3  ;;  %5445 = vmatprep.mubr.msk.bf16.mxu1 %vm1523_vm4, %v6364_v44  ;;  %v6424_v42 = vld [vmem:[%s9099_s3 + $0x20] ss:$8 sps:$4 sm:$0xff]  }
 0x126   :  { %v6719_v51 = vpop.eup %6718  ;;  %6728 = vtanh.f32 %v661_v35  ;;  %v672_v53 = vpop.f32.mrf.mxu0  ;;  %1593 = vmatmul.mubr.bf16.vlgmr.msra.gmra.mxu1 %v6362_v43 }
 0x127   :  { %v6721_v54 = vpop.eup %6720  ;;  %v6067_v55 = vpack.c.bf16 %v998_v48, %v997_v47  ;;  %6730 = vtanh.f32 %v671_v49  ;;  %v673_v56 = vadd.f32 %v672_v53, %v7443_v1  ;;  %1925 = vmatpush1.bf16.msra.mxu1 %v6405_v39  ;;  %v999_v62 = vadd.f32 %v6719_v51, %v6717_v46  ;;  %v6431_v47 = vld [vmem:[%s9099_s3 + $0x14] ss:$8 sps:$4 sm:$0xff]   ;;  %v6429_v51 = vld [vmem:[%s9099_s3 + $0x10] ss:$8 sps:$4 sm:$0xff]   ;;  %v1284_v53 = vld [vmem:[%s9099_s3 + $0xa0] sm:$0xff] }
 0x128   :  { %v6723_v57 = vpop.eup %6722  ;;  %6732 = vtanh.f32 %v663_v41  ;;  %v674_v59 = vpop.f32.mrf.mxu0  ;;  %1926 = vmatprep.subr.bf16.mxu1 %v6412_v50 }
 0x129   :  { %1220 = vst.msk [vmem:[#allocation2 + $0x20] sm:$0xff] %vm7486_vm3, %v6067_v55  ;;  %v1000_v63 = vadd.f32 %v6723_v57, %v6721_v54  ;;  %6734 = vtanh.f32 %v673_v56  ;;  %v675_v2 = vadd.f32 %v674_v59, %v7447_v3  ;;  %v6432_v57 = vld [vmem:[%s9099_s3] ss:$8 sps:$4 sm:$0xff]   ;;  %v5495_v59 = vcombine.low %v1284_v53, %v1284_v53 }
 0x12a   :  { %6736 = vtanh.f32 %v665_v52  ;;  %v678_v5 = vpop.f32.mrf.mxu0  ;;  %v6725_v14 = vpop.eup %6724  ;;  %v6434_v52 = vld [vmem:[%s9099_s3 + $0x4] ss:$8 sps:$4 sm:$0xff]  }
 0x12b   :  { %v6068_v6 = vpack.c.bf16 %v1000_v63, %v999_v62  ;;  %6738 = vtanh.f32 %v675_v2  ;;  %1927 = vmatpush1.bf16.msra.mxu1 %v6410_v60  ;;  %v679_v11 = vadd.f32 %v678_v5, %v7443_v1  ;;  %v5496_v62 = vcombine.high %v1284_v53, %v1284_v53 }
 0x12c   :  { %v680_v7 = vpop.f32.mrf.mxu0  ;;  %1928 = vmatprep.subr.bf16.mxu1 %v6415_v4 }
 0x12d   :  { %1221 = vst.msk [vmem:[#allocation2 + $0x28] sm:$0xff] %vm7486_vm3, %v6068_v6  ;;  %v681_v17 = vadd.f32 %v680_v7, %v7447_v3  ;;  %6740 = vtanh.f32 %v679_v11 }
 0x12e   :  { %v682_v10 = vpop.f32.mrf.mxu0 }
 0x12f   :  { %1929 = vmatpush1.bf16.msra.mxu1 %v6413_v8  ;;  %v683_v25 = vadd.f32 %v682_v10, %v7443_v1 }
 0x130   :  { %v684_v12 = vpop.f32.mrf.mxu0  ;;  %1930 = vmatprep.subr.bf16.mxu1 %v6418_v9  ;;  %v1288_v21 = vld [vmem:[#allocation2 + $0x20] sm:$0xff] }
 0x131   :  { %v685_v35 = vadd.f32 %v684_v12, %v7447_v3  ;;  %v1919_v12 = vsel %vm1213_vm1, %v5495_v59, 0 }
 0x132   :  { %v6727_v16 = vpop.eup %6726  ;;  %v688_v18 = vpop.f32.mrf.mxu0 }
 0x133   :  { %v6729_v19 = vpop.eup %6728  ;;  %v689_v20 = vadd.f32 %v688_v18, %v7443_v1  ;;  %v1001_v24 = vadd.f32 %v6727_v16, %v6725_v14  ;;  %1931 = vmatpush1.bf16.msra.mxu1 %v6416_v13 }
 0x134   :  { %v6731_v23 = vpop.eup %6730  ;;  %v690_v26 = vpop.f32.mrf.mxu0  ;;  %v1289_v27 = vld [vmem:[#allocation2 + $0x28] sm:$0xff]  ;;  %1932 = vmatprep.subr.bf16.mxu1 %v6423_v15 }
 0x135   :  { %v7553_v28 = vld [vmem:[#allocation2 + $0x24] ss:$8 sps:$4 sm:$0xff]   ;;  %v6733_v29 = vpop.eup %6732  ;;  %v1002_v30 = vadd.f32 %v6731_v23, %v6729_v19  ;;  %6742 = vtanh.f32 %v689_v20  ;;  %v691_v31 = vadd.f32 %v690_v26, %v7447_v3  ;;  %v7556_v32 = vcombine.low %v1288_v21, %v1289_v27  ;;  %v6440_v26 = vld [vmem:[%s9099_s3 + $0x90] ss:$8 sps:$4 sm:$0xff]  }
 0x136   :  { %v6735_v34 = vpop.eup %6734  ;;  %6744 = vtanh.f32 %v681_v17  ;;  %v692_v36 = vpop.f32.mrf.mxu0  ;;  %5446 = vmatprep.mubr.msk.bf16.mxu1 %vm1523_vm4, %v7553_v28  ;;  %v6442_v17 = vld [vmem:[%s9099_s3 + $0x94] ss:$8 sps:$4 sm:$0xff]  }
 0x137   :  { %v6737_v37 = vpop.eup %6736  ;;  %v6069_v38 = vpack.c.bf16 %v1002_v30, %v1001_v24  ;;  %6746 = vtanh.f32 %v691_v31  ;;  %v693_v39 = vadd.f32 %v692_v36, %v7443_v1  ;;  %1603 = vmatmul.mubr.bf16.gmra.mxu1 %v7556_v32  ;;  %v1003_v43 = vadd.f32 %v6735_v34, %v6733_v29  ;;  %v6448_v31 = vld [vmem:[%s9099_s3 + $0x84] ss:$8 sps:$4 sm:$0xff]   ;;  %v6446_v36 = vld [vmem:[%s9099_s3 + $0x80] ss:$8 sps:$4 sm:$0xff]  }
 0x138   :  { %v6739_v40 = vpop.eup %6738  ;;  %6748 = vtanh.f32 %v683_v25  ;;  %v694_v41 = vpop.f32.mrf.mxu0  ;;  %1933 = vmatpush1.bf16.msra.mxu1 %v6421_v22 }
 0x139   :  { %1222 = vst.msk [vmem:[#allocation2 + $0x30] sm:$0xff] %vm7486_vm3, %v6069_v38  ;;  %v1004_v44 = vadd.f32 %v6739_v40, %v6737_v37  ;;  %6750 = vtanh.f32 %v693_v39  ;;  %v695_v46 = vadd.f32 %v694_v41, %v7447_v3  ;;  %1934 = vmatprep.subr.bf16.mxu1 %v6426_v33  ;;  %v6454_v37 = vld [vmem:[%s9099_s3 + $0x1c4] ss:$8 sps:$4 sm:$0xff]  }
 0x13a   :  { %6752 = vtanh.f32 %v685_v35  ;;  %v698_v48 = vpop.f32.mrf.mxu0  ;;  %v6741_v60 = vpop.eup %6740 }
 0x13b   :  { %v6070_v49 = vpack.c.bf16 %v1004_v44, %v1003_v43  ;;  %6754 = vtanh.f32 %v695_v46  ;;  %v699_v55 = vadd.f32 %v698_v48, %v7443_v1 }
 0x13c   :  { %v700_v50 = vpop.f32.mrf.mxu0  ;;  %1935 = vmatpush1.bf16.msra.mxu1 %v6424_v42 }
 0x13d   :  { %1223 = vst.msk [vmem:[#allocation2 + $0x38] sm:$0xff] %vm7486_vm3, %v6070_v49  ;;  %1936 = vmatprep.subr.bf16.mxu1 %v6431_v47  ;;  %v701_v2 = vadd.f32 %v700_v50, %v7447_v3  ;;  %6756 = vtanh.f32 %v699_v55 }
 0x13e   :  { %v702_v54 = vpop.f32.mrf.mxu0 }
 0x13f   :  { %v703_v8 = vadd.f32 %v702_v54, %v7443_v1 }
 0x140   :  { %v704_v56 = vpop.f32.mrf.mxu0  ;;  %1937 = vmatpush1.bf16.msra.mxu1 %v6429_v51 }
 0x141   :  { %1938 = vmatprep.subr.bf16.mxu1 %v6434_v52  ;;  %v705_v19 = vadd.f32 %v704_v56, %v7447_v3 }
 0x142   :  { %v6743_v63 = vpop.eup %6742  ;;  %v708_v4 = vpop.f32.mrf.mxu0 }
 0x143   :  { %v6745_v5 = vpop.eup %6744  ;;  %v709_v6 = vadd.f32 %v708_v4, %v7443_v1  ;;  %v1005_v14 = vadd.f32 %v6743_v63, %v6741_v60 }
 0x144   :  { %v6747_v7 = vpop.eup %6746  ;;  %v710_v9 = vpop.f32.mrf.mxu0  ;;  %v7593_v10 = vld [vmem:[#allocation2 + $0x34] ss:$8 sps:$4 sm:$0xff]   ;;  %v7595_v11 = vld [vmem:[#allocation2 + $0x30] ss:$8 sps:$4 sm:$0xff]   ;;  %1939 = vmatpush1.bf16.msra.mxu1 %v6432_v57 }
 0x145   :  { %v6749_v13 = vpop.eup %6748  ;;  %v1006_v15 = vadd.f32 %v6747_v7, %v6745_v5  ;;  %6758 = vtanh.f32 %v709_v6  ;;  %v711_v16 = vadd.f32 %v710_v9, %v7447_v3  ;;  %5497 = vmatprep.subr.msk.bf16.mxu1 %vm1213_vm1, %v5496_v62  ;;  %5447 = vmatprep.mubr.msk.bf16.mxu1 %vm1523_vm4, %v7593_v10 }
 0x146   :  { %v6751_v18 = vpop.eup %6750  ;;  %6760 = vtanh.f32 %v701_v2  ;;  %v712_v20 = vpop.f32.mrf.mxu0  ;;  %5646 = vmatprep.mubr.msk.bf16.mxu0 %vm1523_vm4, %v7593_v10  ;;  %1613 = vmatmul.mubr.bf16.gmra.mxu1 %v7595_v11 }
 0x147   :  { %v6753_v21 = vpop.eup %6752  ;;  %v6071_v22 = vpack.c.bf16 %v1006_v15, %v1005_v14  ;;  %6762 = vtanh.f32 %v711_v16  ;;  %v713_v23 = vadd.f32 %v712_v20, %v7443_v1  ;;  %2811 = vmatmul.mubr.bf16.vlgmr.msra.gmra.mxu0 %v7595_v11  ;;  %v1007_v27 = vadd.f32 %v6751_v18, %v6749_v13 }
 0x148   :  { %v6755_v24 = vpop.eup %6754  ;;  %6764 = vtanh.f32 %v703_v8  ;;  %v714_v25 = vpop.f32.mrf.mxu0  ;;  %1951 = vmatpush2.bf16.msra.mxu1 %v1919_v12 }
 0x149   :  { %1224 = vst.msk [vmem:[#allocation2 + $0x40] sm:$0xff] %vm7486_vm3, %v6071_v22  ;;  %v1008_v29 = vadd.f32 %v6755_v24, %v6753_v21  ;;  %6766 = vtanh.f32 %v713_v23  ;;  %v715_v30 = vadd.f32 %v714_v25, %v7447_v3  ;;  %1952 = vmatprep.subr.bf16.mxu1 %v6442_v17 }
 0x14a   :  { %6768 = vtanh.f32 %v705_v19  ;;  %v718_v33 = vpop.f32.mrf.mxu0  ;;  %v6757_v41 = vpop.eup %6756 }
 0x14b   :  { %v6072_v34 = vpack.c.bf16 %v1008_v29, %v1007_v27  ;;  %6770 = vtanh.f32 %v715_v30  ;;  %v719_v39 = vadd.f32 %v718_v33, %v7443_v1 }
 0x14c   :  { %v720_v35 = vpop.f32.mrf.mxu0  ;;  %1953 = vmatpush2.bf16.msra.mxu1 %v6440_v26 }
 0x14d   :  { %1225 = vst.msk [vmem:[#allocation2 + $0x48] sm:$0xff] %vm7486_vm3, %v6072_v34  ;;  %1954 = vmatprep.subr.bf16.mxu1 %v6448_v31  ;;  %v721_v43 = vadd.f32 %v720_v35, %v7447_v3  ;;  %6772 = vtanh.f32 %v719_v39 }
 0x14e   :  { %v722_v38 = vpop.f32.mrf.mxu0 }
 0x14f   :  { %v723_v51 = vadd.f32 %v722_v38, %v7443_v1 }
 0x150   :  { %v724_v40 = vpop.f32.mrf.mxu0  ;;  %1955 = vmatpush2.bf16.msra.mxu1 %v6446_v36  ;;  %v1292_v48 = vld [vmem:[#allocation2 + $0x40] sm:$0xff] }
 0x151   :  { %2331 = vmatprep.subr.bf16.mxu1 %v6454_v37  ;;  %v725_v62 = vadd.f32 %v724_v40, %v7447_v3 }
 0x152   :  { %v6759_v42 = vpop.eup %6758  ;;  %v728_v44 = vpop.f32.mrf.mxu0 }
 0x153   :  { %v6761_v46 = vpop.eup %6760  ;;  %v729_v47 = vadd.f32 %v728_v44, %v7443_v1  ;;  %v1009_v50 = vadd.f32 %v6759_v42, %v6757_v41 }
 0x154   :  { %v6763_v49 = vpop.eup %6762  ;;  %v730_v52 = vpop.f32.mrf.mxu0  ;;  %v1293_v53 = vld [vmem:[#allocation2 + $0x48] sm:$0xff] }
 0x155   :  { %v7632_v54 = vld [vmem:[#allocation2 + $0x44] ss:$8 sps:$4 sm:$0xff]   ;;  %v6765_v55 = vpop.eup %6764  ;;  %v1010_v56 = vadd.f32 %v6763_v49, %v6761_v46  ;;  %6774 = vtanh.f32 %v729_v47  ;;  %v731_v57 = vadd.f32 %v730_v52, %v7447_v3  ;;  %v7635_v59 = vcombine.low %v1292_v48, %v1293_v53 }
 0x156   :  { %v6767_v60 = vpop.eup %6766  ;;  %6776 = vtanh.f32 %v721_v43  ;;  %v732_v63 = vpop.f32.mrf.mxu0  ;;  %5448 = vmatprep.mubr.msk.bf16.mxu1 %vm1523_vm4, %v7632_v54  ;;  %5647 = vmatprep.mubr.msk.bf16.mxu0 %vm1523_vm4, %v7632_v54 }
 0x157   :  { %v6769_v2 = vpop.eup %6768  ;;  %v6073_v4 = vpack.c.bf16 %v1010_v56, %v1009_v50  ;;  %6778 = vtanh.f32 %v731_v57  ;;  %v733_v5 = vadd.f32 %v732_v63, %v7443_v1  ;;  %1623 = vmatmul.mubr.bf16.gmra.mxu1 %v7635_v59  ;;  %2821 = vmatmul.mubr.bf16.gmra.mxu0 %v7635_v59  ;;  %v1011_v8 = vadd.f32 %v6767_v60, %v6765_v55 }
 0x158   :  { %v6771_v6 = vpop.eup %6770  ;;  %6780 = vtanh.f32 %v723_v51  ;;  %v734_v7 = vpop.f32.mrf.mxu0 }
 0x159   :  { %1226 = vst.msk [vmem:[#allocation2 + $0x50] sm:$0xff] %vm7486_vm3, %v6073_v4  ;;  %v1012_v9 = vadd.f32 %v6771_v6, %v6769_v2  ;;  %6782 = vtanh.f32 %v733_v5  ;;  %v735_v12 = vadd.f32 %v734_v7, %v7447_v3 }
 0x15a   :  { %6784 = vtanh.f32 %v725_v62  ;;  %v738_v13 = vpop.f32.mrf.mxu0  ;;  %v6773_v19 = vpop.eup %6772 }
 0x15b   :  { %v6074_v14 = vpack.c.bf16 %v1012_v9, %v1011_v8  ;;  %6786 = vtanh.f32 %v735_v12  ;;  %v739_v17 = vadd.f32 %v738_v13, %v7443_v1 }
 0x15c   :  { %v740_v15 = vpop.f32.mrf.mxu0 }
 0x15d   :  { %1227 = vst.msk [vmem:[#allocation2 + $0x58] sm:$0xff] %vm7486_vm3, %v6074_v14  ;;  %v741_v21 = vadd.f32 %v740_v15, %v7447_v3  ;;  %6788 = vtanh.f32 %v739_v17 }
 0x15e   :  { %v742_v16 = vpop.f32.mrf.mxu0 }
 0x15f   :  { %v743_v29 = vadd.f32 %v742_v16, %v7443_v1 }
 0x160   :  { %v744_v18 = vpop.f32.mrf.mxu0  ;;  %v1294_v25 = vld [vmem:[#allocation2 + $0x50] sm:$0xff] }
 0x161   :  { %v745_v39 = vadd.f32 %v744_v18, %v7447_v3 }
 0x162   :  { %v6775_v20 = vpop.eup %6774  ;;  %v748_v22 = vpop.f32.mrf.mxu0 }
 0x163   :  { %v6777_v23 = vpop.eup %6776  ;;  %v749_v24 = vadd.f32 %v748_v22, %v7443_v1  ;;  %v1013_v27 = vadd.f32 %v6775_v20, %v6773_v19 }
 0x164   :  { %v6779_v26 = vpop.eup %6778  ;;  %v750_v30 = vpop.f32.mrf.mxu0  ;;  %v1295_v31 = vld [vmem:[#allocation2 + $0x58] sm:$0xff] }
 0x165   :  { %v7654_v33 = vld [vmem:[#allocation2 + $0x54] ss:$8 sps:$4 sm:$0xff]   ;;  %v6781_v34 = vpop.eup %6780  ;;  %v1014_v35 = vadd.f32 %v6779_v26, %v6777_v23  ;;  %6790 = vtanh.f32 %v749_v24  ;;  %v751_v36 = vadd.f32 %v750_v30, %v7447_v3  ;;  %v7657_v37 = vcombine.low %v1294_v25, %v1295_v31 }
 0x166   :  { %v6783_v38 = vpop.eup %6782  ;;  %6792 = vtanh.f32 %v741_v21  ;;  %v752_v40 = vpop.f32.mrf.mxu0  ;;  %5449 = vmatprep.mubr.msk.bf16.mxu1 %vm1523_vm4, %v7654_v33  ;;  %5648 = vmatprep.mubr.msk.bf16.mxu0 %vm1523_vm4, %v7654_v33 }
 0x167   :  { %v6785_v41 = vpop.eup %6784  ;;  %v6075_v42 = vpack.c.bf16 %v1014_v35, %v1013_v27  ;;  %6794 = vtanh.f32 %v751_v36  ;;  %v753_v43 = vadd.f32 %v752_v40, %v7443_v1  ;;  %1633 = vmatmul.mubr.bf16.gmra.mxu1 %v7657_v37  ;;  %2831 = vmatmul.mubr.bf16.gmra.mxu0 %v7657_v37  ;;  %v1015_v47 = vadd.f32 %v6783_v38, %v6781_v34 }
 0x168   :  { %v6787_v44 = vpop.eup %6786  ;;  %6796 = vtanh.f32 %v743_v29  ;;  %v754_v46 = vpop.f32.mrf.mxu0 }
 0x169   :  { %1228 = vst.msk [vmem:[#allocation2 + $0x60] sm:$0xff] %vm7486_vm3, %v6075_v42  ;;  %v1016_v48 = vadd.f32 %v6787_v44, %v6785_v41  ;;  %6798 = vtanh.f32 %v753_v43  ;;  %v755_v49 = vadd.f32 %v754_v46, %v7447_v3 }
 0x16a   :  { %6800 = vtanh.f32 %v745_v39  ;;  %v758_v50 = vpop.f32.mrf.mxu0  ;;  %v6789_v57 = vpop.eup %6788 }
 0x16b   :  { %v6076_v51 = vpack.c.bf16 %v1016_v48, %v1015_v47  ;;  %6802 = vtanh.f32 %v755_v49  ;;  %v759_v55 = vadd.f32 %v758_v50, %v7443_v1 }
 0x16c   :  { %v760_v52 = vpop.f32.mrf.mxu0 }
 0x16d   :  { %1229 = vst.msk [vmem:[#allocation2 + $0x68] sm:$0xff] %vm7486_vm3, %v6076_v51  ;;  %v761_v62 = vadd.f32 %v760_v52, %v7447_v3  ;;  %6804 = vtanh.f32 %v759_v55 }
 0x16e   :  { %v762_v53 = vpop.f32.mrf.mxu0 }
 0x16f   :  { %v763_v8 = vadd.f32 %v762_v53, %v7443_v1 }
 0x170   :  { %v764_v56 = vpop.f32.mrf.mxu0  ;;  %v1296_v5 = vld [vmem:[#allocation2 + $0x60] sm:$0xff] }
 0x171   :  { %v765_v19 = vadd.f32 %v764_v56, %v7447_v3 }
 0x172   :  { %v6791_v60 = vpop.eup %6790  ;;  %v768_v63 = vpop.f32.mrf.mxu0 }
 0x173   :  { %v6793_v2 = vpop.eup %6792  ;;  %v769_v4 = vadd.f32 %v768_v63, %v7443_v1  ;;  %v1017_v7 = vadd.f32 %v6791_v60, %v6789_v57 }
 0x174   :  { %v6795_v6 = vpop.eup %6794  ;;  %v770_v9 = vpop.f32.mrf.mxu0  ;;  %v1297_v12 = vld [vmem:[#allocation2 + $0x68] sm:$0xff] }
 0x175   :  { %v7676_v13 = vld [vmem:[#allocation2 + $0x64] ss:$8 sps:$4 sm:$0xff]   ;;  %v6797_v14 = vpop.eup %6796  ;;  %v1018_v15 = vadd.f32 %v6795_v6, %v6793_v2  ;;  %6806 = vtanh.f32 %v769_v4  ;;  %v771_v16 = vadd.f32 %v770_v9, %v7447_v3  ;;  %v7679_v17 = vcombine.low %v1296_v5, %v1297_v12 }
 0x176   :  { %v6799_v18 = vpop.eup %6798  ;;  %6808 = vtanh.f32 %v761_v62  ;;  %v772_v20 = vpop.f32.mrf.mxu0  ;;  %5450 = vmatprep.mubr.msk.bf16.mxu1 %vm1523_vm4, %v7676_v13  ;;  %5649 = vmatprep.mubr.msk.bf16.mxu0 %vm1523_vm4, %v7676_v13 }
 0x177   :  { %v6801_v21 = vpop.eup %6800  ;;  %v6077_v22 = vpack.c.bf16 %v1018_v15, %v1017_v7  ;;  %6810 = vtanh.f32 %v771_v16  ;;  %v773_v23 = vadd.f32 %v772_v20, %v7443_v1  ;;  %1643 = vmatmul.mubr.bf16.gmra.mxu1 %v7679_v17  ;;  %2841 = vmatmul.mubr.bf16.gmra.mxu0 %v7679_v17  ;;  %v1019_v26 = vadd.f32 %v6799_v18, %v6797_v14 }
 0x178   :  { %v6803_v24 = vpop.eup %6802  ;;  %6812 = vtanh.f32 %v763_v8  ;;  %v774_v25 = vpop.f32.mrf.mxu0 }
 0x179   :  { %1230 = vst.msk [vmem:[#allocation2 + $0x70] sm:$0xff] %vm7486_vm3, %v6077_v22  ;;  %v1020_v27 = vadd.f32 %v6803_v24, %v6801_v21  ;;  %6814 = vtanh.f32 %v773_v23  ;;  %v775_v29 = vadd.f32 %v774_v25, %v7447_v3 }
 0x17a   :  { %6816 = vtanh.f32 %v765_v19  ;;  %v778_v30 = vpop.f32.mrf.mxu0  ;;  %v6805_v39 = vpop.eup %6804 }
 0x17b   :  { %v6078_v31 = vpack.c.bf16 %v1020_v27, %v1019_v26  ;;  %6818 = vtanh.f32 %v775_v29  ;;  %v779_v36 = vadd.f32 %v778_v30, %v7443_v1 }
 0x17c   :  { %v780_v34 = vpop.f32.mrf.mxu0 }
 0x17d   :  { %1231 = vst.msk [vmem:[#allocation2 + $0x78] sm:$0xff] %vm7486_vm3, %v6078_v31  ;;  %v781_v41 = vadd.f32 %v780_v34, %v7447_v3  ;;  %6820 = vtanh.f32 %v779_v36 }
 0x17e   :  { %v782_v35 = vpop.f32.mrf.mxu0 }
 0x17f   :  { %v783_v49 = vadd.f32 %v782_v35, %v7443_v1 }
 0x180   :  { %v784_v38 = vpop.f32.mrf.mxu0  ;;  %v1298_v46 = vld [vmem:[#allocation2 + $0x70] sm:$0xff] }
 0x181   :  { %v785_v62 = vadd.f32 %v784_v38, %v7447_v3 }
 0x182   :  { %v6807_v40 = vpop.eup %6806  ;;  %v788_v42 = vpop.f32.mrf.mxu0 }
 0x183   :  { %v6809_v43 = vpop.eup %6808  ;;  %v789_v44 = vadd.f32 %v788_v42, %v7443_v1  ;;  %v1021_v48 = vadd.f32 %v6807_v40, %v6805_v39 }
 0x184   :  { %v6811_v47 = vpop.eup %6810  ;;  %v790_v50 = vpop.f32.mrf.mxu0  ;;  %v1299_v51 = vld [vmem:[#allocation2 + $0x78] sm:$0xff] }
 0x185   :  { %v7698_v52 = vld [vmem:[#allocation2 + $0x74] ss:$8 sps:$4 sm:$0xff]   ;;  %v6813_v53 = vpop.eup %6812  ;;  %v1022_v55 = vadd.f32 %v6811_v47, %v6809_v43  ;;  %6822 = vtanh.f32 %v789_v44  ;;  %v791_v56 = vadd.f32 %v790_v50, %v7447_v3  ;;  %v7701_v57 = vcombine.low %v1298_v46, %v1299_v51 }
 0x186   :  { %v6815_v60 = vpop.eup %6814  ;;  %6824 = vtanh.f32 %v781_v41  ;;  %v792_v63 = vpop.f32.mrf.mxu0  ;;  %5451 = vmatprep.mubr.msk.bf16.mxu1 %vm1523_vm4, %v7698_v52  ;;  %5650 = vmatprep.mubr.msk.bf16.mxu0 %vm1523_vm4, %v7698_v52 }
 0x187   :  { %v6817_v2 = vpop.eup %6816  ;;  %v6079_v4 = vpack.c.bf16 %v1022_v55, %v1021_v48  ;;  %6826 = vtanh.f32 %v791_v56  ;;  %v793_v5 = vadd.f32 %v792_v63, %v7443_v1  ;;  %1653 = vmatmul.mubr.bf16.gmra.mxu1 %v7701_v57  ;;  %2851 = vmatmul.mubr.bf16.gmra.mxu0 %v7701_v57  ;;  %v1023_v8 = vadd.f32 %v6815_v60, %v6813_v53 }
 0x188   :  { %v6819_v6 = vpop.eup %6818  ;;  %6828 = vtanh.f32 %v783_v49  ;;  %v794_v7 = vpop.f32.mrf.mxu0 }
 0x189   :  { %1232 = vst.msk [vmem:[#allocation2 + $0x80] sm:$0xff] %vm7486_vm3, %v6079_v4  ;;  %v1024_v9 = vadd.f32 %v6819_v6, %v6817_v2  ;;  %6830 = vtanh.f32 %v793_v5  ;;  %v795_v12 = vadd.f32 %v794_v7, %v7447_v3 }
 0x18a   :  { %6832 = vtanh.f32 %v785_v62  ;;  %v798_v14 = vpop.f32.mrf.mxu0  ;;  %v6821_v21 = vpop.eup %6820 }
 0x18b   :  { %v6080_v15 = vpack.c.bf16 %v1024_v9, %v1023_v8  ;;  %6834 = vtanh.f32 %v795_v12  ;;  %v799_v19 = vadd.f32 %v798_v14, %v7443_v1 }
 0x18c   :  { %v800_v16 = vpop.f32.mrf.mxu0 }
 0x18d   :  { %1233 = vst.msk [vmem:[#allocation2 + $0x88] sm:$0xff] %vm7486_vm3, %v6080_v15  ;;  %v801_v23 = vadd.f32 %v800_v16, %v7447_v3  ;;  %6836 = vtanh.f32 %v799_v19 }
 0x18e   :  { %v802_v18 = vpop.f32.mrf.mxu0 }
 0x18f   :  { %v803_v31 = vadd.f32 %v802_v18, %v7443_v1 }
 0x190   :  { %v804_v20 = vpop.f32.mrf.mxu0  ;;  %v1300_v27 = vld [vmem:[#allocation2 + $0x80] sm:$0xff] }
 0x191   :  { %v805_v43 = vadd.f32 %v804_v20, %v7447_v3 }
 0x192   :  { %v6823_v22 = vpop.eup %6822  ;;  %v808_v24 = vpop.f32.mrf.mxu0 }
 0x193   :  { %v6825_v25 = vpop.eup %6824  ;;  %v809_v26 = vadd.f32 %v808_v24, %v7443_v1  ;;  %v1025_v30 = vadd.f32 %v6823_v22, %v6821_v21 }
 0x194   :  { %v6827_v29 = vpop.eup %6826  ;;  %v810_v34 = vpop.f32.mrf.mxu0  ;;  %v1301_v35 = vld [vmem:[#allocation2 + $0x88] sm:$0xff] }
 0x195   :  { %v7720_v36 = vld [vmem:[#allocation2 + $0x84] ss:$8 sps:$4 sm:$0xff]   ;;  %v6829_v38 = vpop.eup %6828  ;;  %v1026_v39 = vadd.f32 %v6827_v29, %v6825_v25  ;;  %6838 = vtanh.f32 %v809_v26  ;;  %v811_v40 = vadd.f32 %v810_v34, %v7447_v3  ;;  %v7723_v41 = vcombine.low %v1300_v27, %v1301_v35 }
 0x196   :  { %v6831_v42 = vpop.eup %6830  ;;  %6840 = vtanh.f32 %v801_v23  ;;  %v812_v44 = vpop.f32.mrf.mxu0  ;;  %5452 = vmatprep.mubr.msk.bf16.mxu1 %vm1523_vm4, %v7720_v36  ;;  %5651 = vmatprep.mubr.msk.bf16.mxu0 %vm1523_vm4, %v7720_v36 }
 0x197   :  { %v6833_v46 = vpop.eup %6832  ;;  %v6081_v47 = vpack.c.bf16 %v1026_v39, %v1025_v30  ;;  %6842 = vtanh.f32 %v811_v40  ;;  %v813_v48 = vadd.f32 %v812_v44, %v7443_v1  ;;  %1663 = vmatmul.mubr.bf16.gmra.mxu1 %v7723_v41  ;;  %2861 = vmatmul.mubr.bf16.gmra.mxu0 %v7723_v41  ;;  %v1027_v51 = vadd.f32 %v6831_v42, %v6829_v38 }
 0x198   :  { %v6835_v49 = vpop.eup %6834  ;;  %6844 = vtanh.f32 %v803_v31  ;;  %v814_v50 = vpop.f32.mrf.mxu0 }
 0x199   :  { %1234 = vst.msk [vmem:[#allocation2 + $0x90] sm:$0xff] %vm7486_vm3, %v6081_v47  ;;  %v1028_v53 = vadd.f32 %v6835_v49, %v6833_v46  ;;  %6846 = vtanh.f32 %v813_v48  ;;  %v815_v55 = vadd.f32 %v814_v50, %v7447_v3 }
 0x19a   :  { %6848 = vtanh.f32 %v805_v43  ;;  %v818_v56 = vpop.f32.mrf.mxu0  ;;  %v6837_v6 = vpop.eup %6836 }
 0x19b   :  { %v6082_v60 = vpack.c.bf16 %v1028_v53, %v1027_v51  ;;  %6850 = vtanh.f32 %v815_v55  ;;  %v819_v2 = vadd.f32 %v818_v56, %v7443_v1 }
 0x19c   :  { %v820_v62 = vpop.f32.mrf.mxu0 }
 0x19d   :  { %1235 = vst.msk [vmem:[#allocation2 + $0x98] sm:$0xff] %vm7486_vm3, %v6082_v60  ;;  %v821_v4 = vadd.f32 %v820_v62, %v7447_v3  ;;  %6852 = vtanh.f32 %v819_v2 }
 0x19e   :  { %v822_v63 = vpop.f32.mrf.mxu0 }
 0x19f   :  { %v823_v8 = vadd.f32 %v822_v63, %v7443_v1  ;;  %6854 = vtanh.f32 %v821_v4 }
 0x1a0   :  { %v824_v5 = vpop.f32.mrf.mxu0 }
 0x1a1   :  { %v825_v19 = vadd.f32 %v824_v5, %v7447_v3 }
 0x1a2   :  { %v6839_v7 = vpop.eup %6838  ;;  %v828_v9 = vpop.f32.mrf.mxu0 }
 0x1a3   :  { %v6841_v12 = vpop.eup %6840  ;;  %v829_v14 = vadd.f32 %v828_v9, %v7443_v1  ;;  %v1029_v22 = vadd.f32 %v6839_v7, %v6837_v6 }
 0x1a4   :  { %v6843_v15 = vpop.eup %6842  ;;  %v7742_v16 = vld [vmem:[#allocation2 + $0x94] ss:$8 sps:$4 sm:$0xff]   ;;  %v7744_v18 = vld [vmem:[#allocation2 + $0x90] ss:$8 sps:$4 sm:$0xff]   ;;  %v830_v20 = vpop.f32.mrf.mxu0 }
 0x1a5   :  { %v6845_v21 = vpop.eup %6844  ;;  %v1030_v23 = vadd.f32 %v6843_v15, %v6841_v12  ;;  %6856 = vtanh.f32 %v829_v14  ;;  %v831_v24 = vadd.f32 %v830_v20, %v7447_v3  ;;  %5453 = vmatprep.mubr.msk.bf16.mxu1 %vm1523_vm4, %v7742_v16  ;;  %5652 = vmatprep.mubr.msk.bf16.mxu0 %vm1523_vm4, %v7742_v16  ;;  %v6451_v14 = vld [vmem:[#allocation2 + $0x4] ss:$8 sps:$4 sm:$0xff]  }
 0x1a6   :  { %v6847_v25 = vpop.eup %6846  ;;  %6858 = vtanh.f32 %v823_v8  ;;  %v832_v26 = vpop.f32.mrf.mxu0  ;;  %1673 = vmatmul.mubr.bf16.gmra.mxu1 %v7744_v18  ;;  %2871 = vmatmul.mubr.bf16.gmra.mxu0 %v7744_v18 }
 0x1a7   :  { %v6849_v27 = vpop.eup %6848  ;;  %v6083_v29 = vpack.c.bf16 %v1030_v23, %v1029_v22  ;;  %6860 = vtanh.f32 %v831_v24  ;;  %v833_v30 = vadd.f32 %v832_v26, %v7443_v1  ;;  %v1031_v35 = vadd.f32 %v6847_v25, %v6845_v21 }
 0x1a8   :  { %v6851_v31 = vpop.eup %6850  ;;  %6862 = vtanh.f32 %v825_v19  ;;  %v834_v34 = vpop.f32.mrf.mxu0 }
 0x1a9   :  { %1236 = vst.msk [vmem:[#allocation2 + $0xa0] sm:$0xff] %vm7486_vm3, %v6083_v29  ;;  %v1032_v38 = vadd.f32 %v6851_v31, %v6849_v27  ;;  %6864 = vtanh.f32 %v833_v30  ;;  %v835_v39 = vadd.f32 %v834_v34, %v7447_v3  ;;  %v6452_v29 = vld [vmem:[%s9099_s3 + $0x1c0] ss:$8 sps:$4 sm:$0xff]   ;;  %v6457_v34 = vld [vmem:[%s9099_s3 + $0x1b4] ss:$8 sps:$4 sm:$0xff]  }
 0x1aa   :  { %v838_v40 = vpop.f32.mrf.mxu0  ;;  %v6853_v47 = vpop.eup %6852  ;;  %v6449_v31 = vld [vmem:[#allocation2] ss:$8 sps:$4 sm:$0xff]  }
 0x1ab   :  { %v6084_v42 = vpack.c.bf16 %v1032_v38, %v1031_v35  ;;  %6866 = vtanh.f32 %v835_v39  ;;  %v839_v46 = vadd.f32 %v838_v40, %v7443_v1  ;;  %v6996_v40 = vld [vmem:[#allocation2 + $0x14] ss:$8 sps:$4 sm:$0xff]  }
 0x1ac   :  { %v840_v43 = vpop.f32.mrf.mxu0  ;;  %v6855_v50 = vpop.eup %6854 }
 0x1ad   :  { %1237 = vst.msk [vmem:[#allocation2 + $0xa8] sm:$0xff] %vm7486_vm3, %v6084_v42  ;;  %v841_v48 = vadd.f32 %v840_v43, %v7447_v3  ;;  %6868 = vtanh.f32 %v839_v46  ;;  %v6455_v42 = vld [vmem:[%s9099_s3 + $0x1b0] ss:$8 sps:$4 sm:$0xff]  }
 0x1ae   :  { %v842_v44 = vpop.f32.mrf.mxu0 }
 0x1af   :  { %v843_v53 = vadd.f32 %v842_v44, %v7443_v1  ;;  %6870 = vtanh.f32 %v841_v48 }
 0x1b0   :  { %v844_v49 = vpop.f32.mrf.mxu0 }
 0x1b1   :  { %v845_v5 = vadd.f32 %v844_v49, %v7447_v3 }
 0x1b2   :  { %v6857_v51 = vpop.eup %6856  ;;  %v848_v55 = vpop.f32.mrf.mxu0 }
 0x1b3   :  { %v6859_v56 = vpop.eup %6858  ;;  %v1033_v60 = vadd.f32 %v6857_v51, %v6853_v47  ;;  %v849_v62 = vadd.f32 %v848_v55, %v7443_v1  ;;  %v6460_v47 = vld [vmem:[%s9099_s3 + $0x1a4] ss:$8 sps:$4 sm:$0xff]  }
 0x1b4   :  { %v6861_v63 = vpop.eup %6860  ;;  %v7764_v2 = vld [vmem:[#allocation2 + $0xa4] ss:$8 sps:$4 sm:$0xff]   ;;  %v7766_v4 = vld [vmem:[#allocation2 + $0xa0] ss:$8 sps:$4 sm:$0xff]   ;;  %v850_v6 = vpop.f32.mrf.mxu0 }
 0x1b5   :  { %v6863_v7 = vpop.eup %6862  ;;  %v1034_v8 = vadd.f32 %v6861_v63, %v6855_v50  ;;  %6872 = vtanh.f32 %v849_v62  ;;  %v851_v9 = vadd.f32 %v850_v6, %v7447_v3  ;;  %5454 = vmatprep.mubr.msk.bf16.mxu1 %vm1523_vm4, %v7764_v2  ;;  %5653 = vmatprep.mubr.msk.bf16.mxu0 %vm1523_vm4, %v7764_v2 }
 0x1b6   :  { %v6865_v12 = vpop.eup %6864  ;;  %6874 = vtanh.f32 %v843_v53  ;;  %v852_v15 = vpop.f32.mrf.mxu0  ;;  %1683 = vmatmul.mubr.bf16.gmra.mxu1 %v7766_v4  ;;  %2881 = vmatmul.mubr.bf16.gmra.mxu0 %v7766_v4  ;;  %v6458_v53 = vld [vmem:[%s9099_s3 + $0x1a0] ss:$8 sps:$4 sm:$0xff]  }
 0x1b7   :  { %v6085_v19 = vpack.c.bf16 %v1034_v8, %v1033_v60  ;;  %v1035_v20 = vadd.f32 %v6865_v12, %v6859_v56  ;;  %6876 = vtanh.f32 %v851_v9  ;;  %v853_v21 = vadd.f32 %v852_v15, %v7443_v1  ;;  %5498 = vmatprep.mubr.msk.bf16.mxu1 %vm1523_vm4, %v6451_v14  ;;  %v6463_v8 = vld [vmem:[%s9099_s3 + $0x194] ss:$8 sps:$4 sm:$0xff]  }
 0x1b8   :  { %v6867_v22 = vpop.eup %6866  ;;  %6878 = vtanh.f32 %v845_v5  ;;  %v854_v23 = vpop.f32.mrf.mxu0 }
 0x1b9   :  { %1238 = vst.msk [vmem:[#allocation2 + $0xb0] sm:$0xff] %vm7486_vm3, %v6085_v19  ;;  %v1036_v24 = vadd.f32 %v6867_v22, %v6863_v7  ;;  %6880 = vtanh.f32 %v853_v21  ;;  %v855_v25 = vadd.f32 %v854_v23, %v7447_v3  ;;  %v6997_v19 = vld [vmem:[#allocation2 + $0x10] ss:$8 sps:$4 sm:$0xff]  }
 0x1ba   :  { %v858_v26 = vpop.f32.mrf.mxu0  ;;  %v6869_v39 = vpop.eup %6868 }
 0x1bb   :  { %v6086_v27 = vpack.c.bf16 %v1036_v24, %v1035_v20  ;;  %6882 = vtanh.f32 %v855_v25  ;;  %v859_v38 = vadd.f32 %v858_v26, %v7443_v1  ;;  %v6461_v24 = vld [vmem:[%s9099_s3 + $0x190] ss:$8 sps:$4 sm:$0xff]   ;;  %v6466_v26 = vld [vmem:[%s9099_s3 + $0x184] ss:$8 sps:$4 sm:$0xff]  }
 0x1bc   :  { %v860_v30 = vpop.f32.mrf.mxu0  ;;  %v6871_v46 = vpop.eup %6870 }
 0x1bd   :  { %1239 = vst.msk [vmem:[#allocation2 + $0xb8] sm:$0xff] %vm7486_vm3, %v6086_v27  ;;  %v861_v43 = vadd.f32 %v860_v30, %v7447_v3  ;;  %6884 = vtanh.f32 %v859_v38  ;;  %v6469_v30 = vld [vmem:[%s9099_s3 + $0x174] ss:$8 sps:$4 sm:$0xff]  }
 0x1be   :  { %v862_v35 = vpop.f32.mrf.mxu0  ;;  %1957 = vmatmul.mubr.bf16.vlgmr.msra.gmra.mxu1 %v6449_v31 }
 0x1bf   :  { %2332 = vmatpush1.bf16.msra.mxu1 %v6452_v29  ;;  %5499 = vmatprep.mubr.msk.bf16.mxu1 %vm1523_vm4, %v6996_v40  ;;  %v863_v49 = vadd.f32 %v862_v35, %v7443_v1  ;;  %6886 = vtanh.f32 %v861_v43  ;;  %v6464_v29 = vld [vmem:[%s9099_s3 + $0x180] ss:$8 sps:$4 sm:$0xff]   ;;  %v6472_v35 = vld [vmem:[%s9099_s3 + $0x164] ss:$8 sps:$4 sm:$0xff]   ;;  %v6475_v43 = vld [vmem:[%s9099_s3 + $0x154] ss:$8 sps:$4 sm:$0xff]  }
 0x1c0   :  { %v864_v44 = vpop.f32.mrf.mxu0  ;;  %2333 = vmatprep.subr.bf16.mxu1 %v6457_v34 }
 0x1c1   :  { %v865_v62 = vadd.f32 %v864_v44, %v7447_v3 }
 0x1c2   :  { %v6873_v48 = vpop.eup %6872  ;;  %v868_v50 = vpop.f32.mrf.mxu0 }
 0x1c3   :  { %v6875_v51 = vpop.eup %6874  ;;  %v1037_v55 = vadd.f32 %v6873_v48, %v6869_v39  ;;  %v869_v56 = vadd.f32 %v868_v50, %v7443_v1  ;;  %2334 = vmatpush1.bf16.msra.mxu1 %v6455_v42 }
 0x1c4   :  { %v6877_v60 = vpop.eup %6876  ;;  %v870_v63 = vpop.f32.mrf.mxu0  ;;  %v7804_v5 = vld [vmem:[#allocation2 + $0xb4] ss:$8 sps:$4 sm:$0xff]   ;;  %v7806_v6 = vld [vmem:[#allocation2 + $0xb0] ss:$8 sps:$4 sm:$0xff]   ;;  %2335 = vmatprep.subr.bf16.mxu1 %v6460_v47 }
 0x1c5   :  { %v6879_v7 = vpop.eup %6878  ;;  %v1038_v9 = vadd.f32 %v6877_v60, %v6871_v46  ;;  %6888 = vtanh.f32 %v869_v56  ;;  %v871_v12 = vadd.f32 %v870_v63, %v7447_v3  ;;  %5654 = vmatprep.mubr.msk.bf16.mxu0 %vm1523_vm4, %v7804_v5  ;;  %v5528_v47 = vld [vmem:[%s9099_s3 + $0x1f0] sm:$0xff]  ;;  %v6480_v63 = vld [vmem:[%s9099_s3 + $0x1e4] ss:$8 sps:$4 sm:$0xff]  }
 0x1c6   :  { %v6881_v14 = vpop.eup %6880  ;;  %6890 = vtanh.f32 %v863_v49  ;;  %v872_v15 = vpop.f32.mrf.mxu0  ;;  %1967 = vmatmul.mubr.bf16.gmra.mxu1 %v6997_v19  ;;  %2891 = vmatmul.mubr.bf16.gmra.mxu0 %v7806_v6  ;;  %v5570_v56 = vcombine.high %v5528_v47, %v5528_v47  ;;  %v5569_v60 = vcombine.low %v5528_v47, %v5528_v47  ;;  %v6514_v47 = vld [vmem:[%s9099_s3 + $0x2b0] ss:$8 sps:$4 sm:$0xff]  }
 0x1c7   :  { %v6087_v20 = vpack.c.bf16 %v1038_v9, %v1037_v55  ;;  %v1039_v21 = vadd.f32 %v6881_v14, %v6875_v51  ;;  %6892 = vtanh.f32 %v871_v12  ;;  %v873_v22 = vadd.f32 %v872_v15, %v7443_v1  ;;  %5500 = vmatprep.mubr.msk.bf16.mxu1 %vm1523_vm4, %v7553_v28  ;;  %2336 = vmatpush1.bf16.msra.mxu1 %v6458_v53  ;;  %v6473_v53 = vld [vmem:[%s9099_s3 + $0x150] ss:$8 sps:$4 sm:$0xff]   ;;  %v6486_v14 = vld [vmem:[#allocation2 + $0x24] ss:$8 sps:$4 sm:$0xff]  }
 0x1c8   :  { %v6883_v23 = vpop.eup %6882  ;;  %6894 = vtanh.f32 %v865_v62  ;;  %v874_v25 = vpop.f32.mrf.mxu0  ;;  %2337 = vmatprep.subr.bf16.mxu1 %v6463_v8  ;;  %v2326_v62 = vsel %vm1213_vm1, %v5569_v60, 0  ;;  %v6483_v8 = vld [vmem:[%s9099_s3 + $0x1d4] ss:$8 sps:$4 sm:$0xff]  }
 0x1c9   :  { %1240 = vst.msk [vmem:[#allocation2 + $0xc0] sm:$0xff] %vm7486_vm3, %v6087_v20  ;;  %v1040_v1 = vadd.f32 %v6883_v23, %v6879_v7  ;;  %6896 = vtanh.f32 %v873_v22  ;;  %v875_v27 = vadd.f32 %v874_v25, %v7447_v3  ;;  %v6467_v3 = vld [vmem:[%s9099_s3 + $0x170] ss:$8 sps:$4 sm:$0xff]   ;;  %v6478_v7 = vld [vmem:[%s9099_s3 + $0x1e0] ss:$8 sps:$4 sm:$0xff]  }
 0x1ca   :  { %v6885_v31 = vpop.eup %6884  ;;  %v6487_v20 = vld [vmem:[%s9099_s3 + $0x310] ss:$8 sps:$4 sm:$0xff]   ;;  %v6494_v22 = vld [vmem:[%s9099_s3 + $0x304] ss:$8 sps:$4 sm:$0xff]   ;;  %v6490_v23 = vld [vmem:[#allocation2 + $0x34] ss:$8 sps:$4 sm:$0xff]  }
 0x1cb   :  { %v6088_v28 = vpack.c.bf16 %v1040_v1, %v1039_v21  ;;  %6898 = vtanh.f32 %v875_v27  ;;  %2338 = vmatpush1.bf16.msra.mxu1 %v6461_v24  ;;  %v6484_v21 = vld [vmem:[#allocation2 + $0x20] ss:$8 sps:$4 sm:$0xff]   ;;  %v6498_v27 = vld [vmem:[%s9099_s3 + $0x2f0] ss:$8 sps:$4 sm:$0xff]  }
 0x1cc   :  { %2339 = vmatprep.subr.bf16.mxu1 %v6466_v26  ;;  %v6887_v34 = vpop.eup %6886  ;;  %v6492_v25 = vld [vmem:[%s9099_s3 + $0x300] ss:$8 sps:$4 sm:$0xff]   ;;  %v6500_v26 = vld [vmem:[%s9099_s3 + $0x2f4] ss:$8 sps:$4 sm:$0xff]  }
 0x1cd   :  { %1241 = vst.msk [vmem:[#allocation2 + $0xc8] sm:$0xff] %vm7486_vm3, %v6088_v28 }
 0x1ce   :  { %1977 = vmatmul.mubr.bf16.gmra.mxu1 %v7556_v32  ;;  %v6470_v32 = vld [vmem:[%s9099_s3 + $0x160] ss:$8 sps:$4 sm:$0xff]  }
 0x1cf   :  { %5501 = vmatprep.mubr.msk.bf16.mxu1 %vm1523_vm4, %v7593_v10  ;;  %2340 = vmatpush1.bf16.msra.mxu1 %v6464_v29  ;;  %v6495_v29 = vld [vmem:[#allocation2 + $0x30] ss:$8 sps:$4 sm:$0xff]  }
 0x1d0   :  { %2341 = vmatprep.subr.bf16.mxu1 %v6469_v30  ;;  %v6506_v30 = vld [vmem:[%s9099_s3 + $0x2e4] ss:$8 sps:$4 sm:$0xff]  }
 0x1d2   :  { %v6889_v38 = vpop.eup %6888 }
 0x1d3   :  { %v6891_v39 = vpop.eup %6890  ;;  %v1041_v40 = vadd.f32 %v6889_v38, %v6885_v31  ;;  %2342 = vmatpush1.bf16.msra.mxu1 %v6467_v3  ;;  %v7941_v31 = vld [vmem:[#allocation2 + $0x44] ss:$8 sps:$4 sm:$0xff]   ;;  %v6504_v3 = vld [vmem:[%s9099_s3 + $0x2e0] ss:$8 sps:$4 sm:$0xff]   ;;  %v6508_v38 = vld [vmem:[%s9099_s3 + $0x2d0] ss:$8 sps:$4 sm:$0xff]  }
 0x1d4   :  { %v6893_v42 = vpop.eup %6892  ;;  %2343 = vmatprep.subr.bf16.mxu1 %v6472_v35  ;;  %v7854_v50 = vld [vmem:[#allocation2 + $0xc4] ss:$8 sps:$4 sm:$0xff]   ;;  %v7861_v55 = vld [vmem:[#allocation2 + $0xc0] ss:$8 sps:$4 sm:$0xff]   ;;  %v6510_v35 = vld [vmem:[%s9099_s3 + $0x2d4] ss:$8 sps:$4 sm:$0xff]  }
 0x1d5   :  { %v6895_v10 = vpop.eup %6894  ;;  %v1042_v44 = vadd.f32 %v6893_v42, %v6887_v34  ;;  %5655 = vmatprep.mubr.msk.bf16.mxu0 %vm1523_vm4, %v7854_v50  ;;  %v6513_v42 = vld [vmem:[%s9099_s3 + $0x2c4] ss:$8 sps:$4 sm:$0xff]  }
 0x1d6   :  { %v6897_v46 = vpop.eup %6896  ;;  %1987 = vmatmul.mubr.bf16.gmra.mxu1 %v7595_v11  ;;  %2901 = vmatmul.mubr.bf16.gmra.mxu0 %v7861_v55 }
 0x1d7   :  { %v6089_v48 = vpack.c.bf16 %v1042_v44, %v1041_v40  ;;  %v1043_v49 = vadd.f32 %v6897_v46, %v6891_v39  ;;  %5502 = vmatprep.mubr.msk.bf16.mxu1 %vm1523_vm4, %v7632_v54  ;;  %2344 = vmatpush1.bf16.msra.mxu1 %v6470_v32  ;;  %v7958_v40 = vld [vmem:[#allocation2 + $0x40] ss:$8 sps:$4 sm:$0xff]   ;;  %v7963_v32 = vld [vmem:[#allocation2 + $0x54] ss:$8 sps:$4 sm:$0xff]  }
 0x1d8   :  { %v6899_v51 = vpop.eup %6898  ;;  %2345 = vmatprep.subr.bf16.mxu1 %v6475_v43  ;;  %v6516_v44 = vld [vmem:[%s9099_s3 + $0x2b4] ss:$8 sps:$4 sm:$0xff]  }
 0x1d9   :  { %1242 = vst.msk [vmem:[#allocation2 + $0xd0] sm:$0xff] %vm7486_vm3, %v6089_v48  ;;  %v1044_v11 = vadd.f32 %v6899_v51, %v6895_v10  ;;  %v6511_v10 = vld [vmem:[%s9099_s3 + $0x2c0] ss:$8 sps:$4 sm:$0xff]   ;;  %v6507_v48 = vld [vmem:[#allocation2 + $0x50] ss:$8 sps:$4 sm:$0xff]  }
 0x1da   :  { %v5676_v51 = vld [vmem:[%s9099_s3 + $0x340] sm:$0xff] }
 0x1db   :  { %v6090_v54 = vpack.c.bf16 %v1044_v11, %v1043_v49  ;;  %2346 = vmatpush1.bf16.msra.mxu1 %v6473_v53  ;;  %v6521_v49 = vld [vmem:[%s9099_s3 + $0x2a4] ss:$8 sps:$4 sm:$0xff]   ;;  %v5718_v60 = vcombine.high %v5676_v51, %v5676_v51  ;;  %v5717_v11 = vcombine.low %v5676_v51, %v5676_v51 }
 0x1dc   :  { %5571 = vmatprep.subr.msk.bf16.mxu1 %vm1213_vm1, %v5570_v56  ;;  %v6519_v56 = vld [vmem:[%s9099_s3 + $0x2a0] ss:$8 sps:$4 sm:$0xff]  }
 0x1dd   :  { %1243 = vst.msk [vmem:[#allocation2 + $0xd8] sm:$0xff] %vm7486_vm3, %v6090_v54 }
 0x1de   :  { %1997 = vmatmul.mubr.bf16.gmra.mxu1 %v7635_v59  ;;  %v6489_v59 = vld [vmem:[%s9099_s3 + $0x314] ss:$8 sps:$4 sm:$0xff]  }
 0x1df   :  { %5503 = vmatprep.mubr.msk.bf16.mxu1 %vm1523_vm4, %v7654_v33  ;;  %2358 = vmatpush2.bf16.msra.mxu1 %v2326_v62  ;;  %v3220_v62 = vsel %vm1213_vm1, %v5717_v11, 0 }
 0x1e0   :  { %2359 = vmatprep.subr.bf16.mxu1 %v6480_v63  ;;  %v6527_v63 = vld [vmem:[%s9099_s3 + $0x334] ss:$8 sps:$4 sm:$0xff]  }
 0x1e3   :  { %2360 = vmatpush2.bf16.msra.mxu1 %v6478_v7  ;;  %v6525_v7 = vld [vmem:[%s9099_s3 + $0x330] ss:$8 sps:$4 sm:$0xff]  }
 0x1e4   :  { %2361 = vmatprep.subr.bf16.mxu1 %v6483_v8 }
 0x1e6   :  { %2007 = vmatmul.mubr.bf16.gmra.mxu1 %v7657_v37  ;;  %v7899_v33 = vpop.f32.mrf.mxu1 }
 0x1e7   :  { %5504 = vmatprep.mubr.msk.bf16.mxu1 %vm1523_vm4, %v7676_v13  ;;  %2362 = vmatpush2.bf16.msra.mxu1 %v6481_v45  ;;  %v6530_v45 = vld [vmem:[%s9099_s3 + $0x324] ss:$8 sps:$4 sm:$0xff]  }
 0x1e8   :  { %3225 = vmatprep.subr.bf16.mxu1 %v6489_v59  ;;  %v7901_v9 = vpop.f32.mrf.mxu1 }
 0x1ea   :  { %v7906_v37 = vpop.f32.mrf.mxu1 }
 0x1ec   :  { %v7908_v12 = vpop.f32.mrf.mxu1 }
 0x1ee   :  { %2017 = vmatmul.mubr.bf16.gmra.mxu1 %v7679_v17 }
 0x1ef   :  { %5505 = vmatprep.mubr.msk.bf16.mxu1 %vm1523_vm4, %v7698_v52 }
 0x1f6   :  { %2027 = vmatmul.mubr.bf16.gmra.mxu1 %v7701_v57 }
 0x1f7   :  { %5506 = vmatprep.mubr.msk.bf16.mxu1 %vm1523_vm4, %v7720_v36  ;;  %v7910_v15 = vpop.f32.mrf.mxu1 }
 0x1f9   :  { %v7914_v19 = vpop.f32.mrf.mxu1 }
 0x1fb   :  { %v7922_v24 = vpop.f32.mrf.mxu1 }
 0x1fd   :  { %v7931_v1 = vpop.f32.mrf.mxu1 }
 0x1fe   :  { %2037 = vmatmul.mubr.bf16.gmra.mxu1 %v7723_v41 }
 0x1ff   :  { %5507 = vmatprep.mubr.msk.bf16.mxu1 %vm1523_vm4, %v7742_v16 }
 0x206   :  { %2047 = vmatmul.mubr.bf16.gmra.mxu1 %v7744_v18  ;;  %v7936_v28 = vpop.f32.mrf.mxu1 }
 0x207   :  { %5572 = vmatprep.mubr.msk.bf16.mxu1 %vm1523_vm4, %v6486_v14 }
 0x208   :  { %v7948_v34 = vpop.f32.mrf.mxu1 }
 0x20a   :  { %v7956_v39 = vpop.f32.mrf.mxu1 }
 0x20c   :  { %v7971_v43 = vpop.f32.mrf.mxu1 }
 0x20d   :  { %9118 = vst [vmem:[#allocation5_spill] sm:$0xff] %v7971_v43  ;;  %v6556_v43 = vld [vmem:[%s9101_s5 + $0x60] sm:$0xff]  }
 0x20e   :  { %2364 = vmatmul.mubr.bf16.vlgmr.msra.gmra.mxu1 %v6484_v21 }
 0x20f   :  { %3226 = vmatpush1.bf16.msra.mxu1 %v6487_v20  ;;  %5573 = vmatprep.mubr.msk.bf16.mxu1 %vm1523_vm4, %v6490_v23 }
 0x210   :  { %3227 = vmatprep.subr.bf16.mxu1 %v6494_v22 }
 0x213   :  { %3228 = vmatpush1.bf16.msra.mxu1 %v6492_v25 }
 0x214   :  { %3229 = vmatprep.subr.bf16.mxu1 %v6500_v26 }
 0x216   :  { %2374 = vmatmul.mubr.bf16.gmra.mxu1 %v6495_v29 }
 0x217   :  { %5574 = vmatprep.mubr.msk.bf16.mxu1 %vm1523_vm4, %v7941_v31  ;;  %3230 = vmatpush1.bf16.msra.mxu1 %v6498_v27  ;;  %v7976_v46 = vpop.f32.mrf.mxu1 }
 0x218   :  { %3231 = vmatprep.subr.bf16.mxu1 %v6506_v30  ;;  %v6534_v30 = vld [vmem:[#allocation2 + $0x64] ss:$8 sps:$4 sm:$0xff]  }
 0x219   :  { %v7987_v53 = vpop.f32.mrf.mxu1 }
 0x21b   :  { %3232 = vmatpush1.bf16.msra.mxu1 %v6504_v3  ;;  %v7994_v54 = vpop.f32.mrf.mxu1 }
 0x21c   :  { %3233 = vmatprep.subr.bf16.mxu1 %v6510_v35 }
 0x21e   :  { %2384 = vmatmul.mubr.bf16.gmra.mxu1 %v7958_v40 }
 0x21f   :  { %5575 = vmatprep.mubr.msk.bf16.mxu1 %vm1523_vm4, %v7963_v32  ;;  %3234 = vmatpush1.bf16.msra.mxu1 %v6508_v38  ;;  %v6536_v38 = vld [vmem:[#allocation2 + $0x60] ss:$8 sps:$4 sm:$0xff]  }
 0x220   :  { %3235 = vmatprep.subr.bf16.mxu1 %v6513_v42  ;;  %v6537_v42 = vld [vmem:[#allocation2 + $0x74] ss:$8 sps:$4 sm:$0xff]  }
 0x223   :  { %3236 = vmatpush1.bf16.msra.mxu1 %v6511_v10  ;;  %v6539_v10 = vld [vmem:[#allocation2 + $0x70] ss:$8 sps:$4 sm:$0xff]  }
 0x224   :  { %3237 = vmatprep.subr.bf16.mxu1 %v6516_v44  ;;  %v6540_v44 = vld [vmem:[#allocation2 + $0x84] ss:$8 sps:$4 sm:$0xff]  }
 0x226   :  { %2394 = vmatmul.mubr.bf16.gmra.mxu1 %v6507_v48 }
 0x227   :  { %5576 = vmatprep.mubr.msk.bf16.mxu1 %vm1523_vm4, %v7676_v13  ;;  %3238 = vmatpush1.bf16.msra.mxu1 %v6514_v47  ;;  %v8001_v13 = vpop.f32.mrf.mxu1 }
 0x228   :  { %3239 = vmatprep.subr.bf16.mxu1 %v6521_v49  ;;  %9119 = vst [vmem:[#allocation6_spill] sm:$0xff] %v8001_v13  ;;  %v6557_v13 = vld [vmem:[%s9101_s5 + $0x10] sm:$0xff]  }
 0x229   :  { %v8009_v8 = vpop.f32.mrf.mxu1 }
 0x22b   :  { %3240 = vmatpush1.bf16.msra.mxu1 %v6519_v56  ;;  %v8017_v59 = vpop.f32.mrf.mxu1  ;;  %v6542_v56 = vld [vmem:[#allocation2 + $0x80] ss:$8 sps:$4 sm:$0xff]  }
 0x22c   :  { %5719 = vmatprep.subr.msk.bf16.mxu1 %vm1213_vm1, %v5718_v60  ;;  %v9113_v60 = vmov 0  }
 0x22d   :  { %3750 = vmatprep.subr.bf16.mxu0 %v9113_v60 }
 0x22e   :  { %2404 = vmatmul.mubr.bf16.gmra.mxu1 %v7679_v17  ;;  %v6528_v17 = vld [vmem:[%s9099_s3 + $0x320] ss:$8 sps:$4 sm:$0xff]  }
 0x22f   :  { %5577 = vmatprep.mubr.msk.bf16.mxu1 %vm1523_vm4, %v7698_v52  ;;  %3252 = vmatpush2.bf16.msra.mxu1 %v3220_v62  ;;  %v8022_v52 = vpop.f32.mrf.mxu1  ;;  %v6546_v62 = vld [vmem:[%s9101_s5 + $0x88] sm:$0xff]  }
 0x230   :  { %3253 = vmatprep.subr.bf16.mxu1 %v6527_v63  ;;  %v6547_v63 = vld [vmem:[%s9101_s5 + $0x38] sm:$0xff]   ;;  %3751 = vmatpush1.bf16.msra.mxu0 %v6546_v62 }
 0x231   :  { %v8024_v14 = vpop.f32.mrf.mxu1  ;;  %3752 = vmatprep.subr.bf16.mxu0 %v9113_v60 }
 0x232   :  { %9120 = vst [vmem:[#allocation7_spill] sm:$0xff] %v8024_v14 }
 0x233   :  { %3254 = vmatpush2.bf16.msra.mxu1 %v6525_v7 }
 0x234   :  { %3255 = vmatprep.subr.bf16.mxu1 %v6530_v45 }
 0x236   :  { %2414 = vmatmul.mubr.bf16.gmra.mxu1 %v7701_v57 }
 0x237   :  { %5578 = vmatprep.mubr.msk.bf16.mxu1 %vm1523_vm4, %v7720_v36  ;;  %3256 = vmatpush2.bf16.msra.mxu1 %v6528_v17  ;;  %v8026_v20 = vpop.f32.mrf.mxu1 }
 0x238   :  { %3863 = vmatprep.subr.bf16.mxu1 %v9113_v60 }
 0x239   :  { %v8031_v21 = vpop.f32.mrf.mxu1 }
 0x23b   :  { %v8033_v22 = vpop.f32.mrf.mxu1 }
 0x23d   :  { %v8038_v57 = vpop.f32.mrf.mxu1 }
 0x23e   :  { %2424 = vmatmul.mubr.bf16.gmra.mxu1 %v7723_v41  ;;  %9121 = vst [vmem:[#allocation8_spill] sm:$0xff] %v8038_v57 }
 0x23f   :  { %5579 = vmatprep.mubr.msk.bf16.mxu1 %vm1523_vm4, %v7742_v16 }
 0x246   :  { %2434 = vmatmul.mubr.bf16.gmra.mxu1 %v7744_v18 }
 0x247   :  { %5580 = vmatprep.mubr.msk.bf16.mxu1 %vm1523_vm4, %v7764_v2  ;;  %v8040_v36 = vpop.f32.mrf.mxu1 }
 0x249   :  { %v8045_v41 = vpop.f32.mrf.mxu1 }
 0x24b   :  { %v8047_v23 = vpop.f32.mrf.mxu1 }
 0x24d   :  { %v8052_v25 = vpop.f32.mrf.mxu1 }
 0x24e   :  { %2444 = vmatmul.mubr.bf16.gmra.mxu1 %v7766_v4  ;;  %9122 = vst [vmem:[#allocation9_spill] sm:$0xff] %v8052_v25  ;;  %v6555_v25 = vld [vmem:[%s9101_s5 + $0x18] sm:$0xff]  }
 0x24f   :  { %5581 = vmatprep.mubr.msk.bf16.mxu1 %vm1523_vm4, %v7804_v5 }
 0x256   :  { %2454 = vmatmul.mubr.bf16.gmra.mxu1 %v7806_v6 }
 0x257   :  { %5720 = vmatprep.mubr.msk.bf16.mxu1 %vm1523_vm4, %v7941_v31  ;;  %v8054_v26 = vpop.f32.mrf.mxu1 }
 0x259   :  { %v8056_v27 = vpop.f32.mrf.mxu1 }
 0x25a   :  { %9123 = vst [vmem:[#allocation10_spill] sm:$0xff] %v8056_v27 }
 0x25b   :  { %v8061_v29 = vpop.f32.mrf.mxu1 }
 0x25d   :  { %v8063_v3 = vpop.f32.mrf.mxu1 }
 0x25e   :  { %3258 = vmatmul.mubr.bf16.vlgmr.msra.gmra.mxu1 %v7958_v40 }
 0x25f   :  { %5721 = vmatprep.mubr.msk.bf16.mxu1 %vm1523_vm4, %v7963_v32  ;;  %3864 = vmatpush1.bf16.msra.mxu1 %v6547_v63 }
 0x260   :  { %3865 = vmatprep.subr.bf16.mxu1 %v9113_v60 }
 0x266   :  { %3268 = vmatmul.mubr.bf16.gmra.mxu1 %v6507_v48  ;;  %v8066_v31 = vpop.f32.mrf.mxu1 }
 0x267   :  { %5722 = vmatprep.mubr.msk.bf16.mxu1 %vm1523_vm4, %v6534_v30 }
 0x268   :  { %v8068_v35 = vpop.f32.mrf.mxu1 }
 0x269   :  { %9124 = vst [vmem:[#allocation11_spill] sm:$0xff] %v8068_v35 }
 0x26a   :  { %v8071_v40 = vpop.f32.mrf.mxu1 }
 0x26b   :  { %9125 = vst [vmem:[#allocation12_spill] sm:$0xff] %v8071_v40 }
 0x26c   :  { %v8073_v32 = vpop.f32.mrf.mxu1 }
 0x26d   :  { %9126 = vst [vmem:[#allocation13_spill] sm:$0xff] %v8073_v32 }
 0x26e   :  { %3278 = vmatmul.mubr.bf16.gmra.mxu1 %v6536_v38  ;;  %v6549_v38 = vld [vmem:[%s9101_s5 + $0x30] sm:$0xff]  }
 0x26f   :  { %5723 = vmatprep.mubr.msk.bf16.mxu1 %vm1523_vm4, %v6537_v42  ;;  %3866 = vmatpush1.bf16.msra.mxu1 %v6549_v38  ;;  %v6553_v38 = vld [vmem:[%s9101_s5 + $0x20] sm:$0xff]  }
 0x270   :  { %3867 = vmatprep.subr.bf16.mxu1 %v9113_v60 }
 0x276   :  { %v8075_v47 = vpop.f32.mrf.mxu1  ;;  %3288 = vmatmul.mubr.bf16.gmra.mxu1 %v6539_v10 }
 0x277   :  { %9127 = vst [vmem:[#allocation14_spill] sm:$0xff] %v8075_v47  ;;  %5724 = vmatprep.mubr.msk.bf16.mxu1 %vm1523_vm4, %v6540_v44 }
 0x278   :  { %v8078_v48 = vpop.f32.mrf.mxu1 }
 0x279   :  { %9128 = vst [vmem:[#allocation15_spill] sm:$0xff] %v8078_v48 }
 0x27a   :  { %v8080_v49 = vpop.f32.mrf.mxu1 }
 0x27b   :  { %9129 = vst [vmem:[#allocation16_spill] sm:$0xff] %v8080_v49 }
 0x27c   :  { %v8082_v51 = vpop.f32.mrf.mxu1 }
 0x27d   :  { %9130 = vst [vmem:[#allocation17_spill] sm:$0xff] %v8082_v51  ;;  %v6563_v51 = vld [vmem:[%s9101_s5 + $0x48] sm:$0xff]  }
 0x27e   :  { %v8086_v11 = vpop.f32.mrf.mxu1  ;;  %3298 = vmatmul.mubr.bf16.gmra.mxu1 %v6542_v56  ;;  %v6551_v56 = vld [vmem:[%s9101_s5 + $0x28] sm:$0xff]  }
 0x27f   :  { %5725 = vmatprep.mubr.msk.bf16.mxu1 %vm1523_vm4, %v7742_v16  ;;  %v6548_v16 = vld [vmem:[%s9101_s5 + $0x80] sm:$0xff]   ;;  %3868 = vmatpush1.bf16.msra.mxu1 %v6551_v56  ;;  %v6543_v56 = vld [vmem:[#allocation2 + $0xd4] ss:$8 sps:$4 sm:$0xff]  }
 0x280   :  { %v8096_v7 = vpop.f32.mrf.mxu1  ;;  %3753 = vmatpush1.bf16.msra.mxu0 %v6548_v16  ;;  %3869 = vmatprep.subr.bf16.mxu1 %v9113_v60 }
 0x281   :  { %3754 = vmatprep.subr.bf16.mxu0 %v9113_v60 }
 0x282   :  { %v8099_v45 = vpop.f32.mrf.mxu1 }
 0x283   :  { %3870 = vmatpush1.bf16.msra.mxu1 %v6553_v38  ;;  %v6545_v38 = vld [vmem:[#allocation2 + $0xd0] ss:$8 sps:$4 sm:$0xff]  }
 0x284   :  { %v8102_v17 = vpop.f32.mrf.mxu1  ;;  %3871 = vmatprep.subr.bf16.mxu1 %v9113_v60 }
 0x286   :  { %v8107_v30 = vpop.f32.mrf.mxu1  ;;  %3308 = vmatmul.mubr.bf16.gmra.mxu1 %v7744_v18  ;;  %v6550_v18 = vld [vmem:[%s9101_s5 + $0x78] sm:$0xff]  }
 0x287   :  { %5726 = vmatprep.mubr.msk.bf16.mxu1 %vm1523_vm4, %v7764_v2  ;;  %3755 = vmatpush1.bf16.msra.mxu0 %v6550_v18 }
 0x288   :  { %v8115_v42 = vpop.f32.mrf.mxu1  ;;  %3756 = vmatprep.subr.bf16.mxu0 %v9113_v60  ;;  %3872 = vmatpush1.bf16.msra.mxu1 %v6555_v25 }
 0x289   :  { %3873 = vmatprep.subr.bf16.mxu1 %v9113_v60 }
 0x28a   :  { %v8118_v10 = vpop.f32.mrf.mxu1 }
 0x28c   :  { %v8121_v44 = vpop.f32.mrf.mxu1  ;;  %3874 = vmatpush1.bf16.msra.mxu1 %v6557_v13  ;;  %v6561_v13 = vld [vmem:[%s9101_s5] sm:$0xff]  }
 0x28d   :  { %3875 = vmatprep.subr.bf16.mxu1 %v9113_v60 }
 0x28e   :  { %v8126_v2 = vpop.f32.mrf.mxu1  ;;  %3318 = vmatmul.mubr.bf16.gmra.mxu1 %v7766_v4  ;;  %v6552_v4 = vld [vmem:[%s9101_s5 + $0x70] sm:$0xff]  }
 0x28f   :  { %5727 = vmatprep.mubr.msk.bf16.mxu1 %vm1523_vm4, %v7804_v5  ;;  %3757 = vmatpush1.bf16.msra.mxu0 %v6552_v4 }
 0x290   :  { %v8134_v62 = vpop.f32.mrf.mxu1  ;;  %3758 = vmatprep.subr.bf16.mxu0 %v9113_v60 }
 0x292   :  { %v8137_v63 = vpop.f32.mrf.mxu1 }
 0x294   :  { %v8140_v16 = vpop.f32.mrf.mxu1 }
 0x295   :  { %9131 = vst [vmem:[#allocation18_spill] sm:$0xff] %v8140_v16 }
 0x296   :  { %v8145_v5 = vpop.f32.mrf.mxu1  ;;  %3328 = vmatmul.mubr.bf16.gmra.mxu1 %v7806_v6  ;;  %v6554_v6 = vld [vmem:[%s9101_s5 + $0x68] sm:$0xff]  }
 0x297   :  { %5728 = vmatprep.mubr.msk.bf16.mxu1 %vm1523_vm4, %v7854_v50  ;;  %3759 = vmatpush1.bf16.msra.mxu0 %v6554_v6 }
 0x298   :  { %v8153_v18 = vpop.f32.mrf.mxu1  ;;  %3760 = vmatprep.subr.bf16.mxu0 %v9113_v60 }
 0x29a   :  { %v8156_v0 = vpop.f32.mrf.mxu1 }
 0x29b   :  { %3761 = vmatpush1.bf16.msra.mxu0 %v6556_v43 }
 0x29c   :  { %v8159_v61 = vpop.f32.mrf.mxu1  ;;  %3762 = vmatprep.subr.bf16.mxu0 %v9113_v60 }
 0x29d   :  { %9132 = vst [vmem:[#allocation19_spill] sm:$0xff] %v8159_v61 }
 0x29e   :  { %v8164_v50 = vpop.f32.mrf.mxu1  ;;  %3338 = vmatmul.mubr.bf16.gmra.mxu1 %v7861_v55 }
 0x29f   :  { %5729 = vmatprep.mubr.msk.bf16.mxu1 %vm1523_vm4, %v6543_v56 }
 0x2a0   :  { %v8168_v4 = vpop.f32.mrf.mxu1 }
 0x2a2   :  { %v8171_v27 = vpop.f32.mrf.mxu1 }
 0x2a4   :  { %v8176_v57 = vpop.f32.mrf.mxu1 }
 0x2a5   :  { %9133 = vst [vmem:[#allocation20_spill] sm:$0xff] %v8176_v57 }
 0x2a6   :  { %v8178_v14 = vpop.f32.mrf.mxu1  ;;  %3348 = vmatmul.mubr.bf16.gmra.mxu1 %v6545_v38  ;;  %v6559_v38 = vld [vmem:[%s9101_s5 + $0x8] sm:$0xff]  }
 0x2a7   :  { %3876 = vmatpush1.bf16.msra.mxu1 %v6559_v38 }
 0x2a8   :  { %v8181_v55 = vpop.f32.mrf.mxu1  ;;  %3877 = vmatprep.subr.bf16.mxu1 %v9113_v60 }
 0x2aa   :  { %v8183_v56 = vpop.f32.mrf.mxu1 }
 0x2ab   :  { %3878 = vmatpush1.bf16.msra.mxu1 %v6561_v13  ;;  %v6560_v13 = vld [vmem:[%s9101_s5 + $0x50] sm:$0xff]  }
 0x2ac   :  { %v8185_v6 = vpop.f32.mrf.mxu1  ;;  %3891 = vmatprep.subr.bf16.mxu1 %v9113_v60 }
 0x2ad   :  { %9134 = vst [vmem:[#allocation21_spill] sm:$0xff] %v8185_v6 }
 0x2ae   :  { %v8187_v61 = vpop.f32.mrf.mxu1 }
 0x2af   :  { %3892 = vmatpush2.bf16.msra.mxu1 %v6563_v51  ;;  %v6562_v51 = vld [vmem:[%s9101_s5 + $0x98] sm:$0xff]  }
 0x2b0   :  { %v8192_v16 = vpop.f32.mrf.mxu1  ;;  %3893 = vmatprep.subr.bf16.mxu1 %v9113_v60 }
 0x2b2   :  { %v8195_v25 = vpop.f32.mrf.mxu1 }
 0x2b4   :  { %v8200_v57 = vpop.f32.mrf.mxu1 }
 0x2b5   :  { %9135 = vst [vmem:[#allocation22_spill] sm:$0xff] %v8200_v57  ;;  %v6558_v57 = vld [vmem:[%s9101_s5 + $0x58] sm:$0xff]  }
 0x2b6   :  { %v8203_v6 = vpop.f32.mrf.mxu1  ;;  %3763 = vmatpush1.bf16.msra.mxu0 %v6558_v57 }
 0x2b7   :  { %3764 = vmatprep.subr.bf16.mxu0 %v9113_v60 }
 0x2b8   :  { %v8211_v58 = vpop.f32.mrf.mxu1 }
 0x2b9   :  { %9136 = vst [vmem:[#allocation23_spill] sm:$0xff] %v8211_v58  ;;  %v6564_v58 = vld [vmem:[%s9101_s5 + $0x40] sm:$0xff]  }
 0x2ba   :  { %v8215_v38 = vpop.f32.mrf.mxu1  ;;  %3765 = vmatpush1.bf16.msra.mxu0 %v6560_v13  ;;  %3894 = vmatpush2.bf16.msra.mxu1 %v6564_v58  ;;  %v6568_v58 = vld [vmem:[%s9101_s5 + $0x90] sm:$0xff]  }
 0x2bb   :  { %3778 = vmatprep.subr.bf16.mxu0 %v9113_v60  ;;  %4139 = vmatprep.subr.bf16.mxu1 %v9113_v60 }
 0x2bc   :  { %v8223_v49 = vpop.f32.mrf.mxu1 }
 0x2be   :  { %v8227_v43 = vpop.f32.mrf.mxu1  ;;  %3779 = vmatpush2.bf16.msra.mxu0 %v6562_v51  ;;  %v1959_v51 = vadd.f32 %v8086_v11, %v7899_v33  ;;  %v1969_v33 = vadd.f32 %v8107_v30, %v7910_v15 }
 0x2bf   :  { %9137 = vst [vmem:[#allocation24_spill] sm:$0xff] %v8227_v43  ;;  %3780 = vmatprep.subr.bf16.mxu0 %v9113_v60 }
 0x2c0   :  { %v8235_v48 = vpop.f32.mrf.mxu1 }
 0x2c1   :  { %9138 = vst [vmem:[#allocation25_spill] sm:$0xff] %v8235_v48 }
 0x2c2   :  { %v8239_v57 = vpop.f32.mrf.mxu1  ;;  %3781 = vmatpush2.bf16.msra.mxu0 %v6568_v58 }
 0x2c3   :  { %9139 = vst [vmem:[#allocation26_spill] sm:$0xff] %v8239_v57  ;;  %4000 = vmatprep.subr.bf16.mxu0 %v9113_v60 }
 0x2c4   :  { %v8244_v47 = vpop.f32.mrf.mxu1 }
 0x2c5   :  { %9140 = vst [vmem:[#allocation27_spill] sm:$0xff] %v8244_v47 }
 0x2c6   :  { %v8247_v32 = vpop.f32.mrf.mxu1 }
 0x2c7   :  { %9141 = vst [vmem:[#allocation28_spill] sm:$0xff] %v8247_v32  ;;  %v1961_v32 = vadd.f32 %v8096_v7, %v7901_v9 }
 0x2c8   :  { %v8252_v13 = vpop.f32.mrf.mxu1 }
 0x2c9   :  { %9142 = vst [vmem:[#allocation29_spill] sm:$0xff] %v8252_v13  ;;  %v1963_v13 = vadd.f32 %v8099_v45, %v7906_v37 }
 0x2ca   :  { %v8255_v57 = vpop.f32.mrf.mxu1 }
 0x2cb   :  { %9143 = vst [vmem:[#allocation30_spill] sm:$0xff] %v8255_v57  ;;  %v1965_v57 = vadd.f32 %v8102_v17, %v7908_v12  ;;  %v1979_v17 = vadd.f32 %v8126_v2, %v7936_v28 }
 0x2cc   :  { %v8257_v40 = vpop.f32.mrf.mxu1 }
 0x2cd   :  { %9144 = vst [vmem:[#allocation31_spill] sm:$0xff] %v8257_v40 }
 0x2ce   :  { %v2365_v47 = vpop.f32.mrf.mxu1 }
 0x2cf   :  { %v8263_v48 = vadd.f32 %v2365_v47, %v1959_v51  ;;  %v1971_v47 = vadd.f32 %v8115_v42, %v7914_v19  ;;  %v8293_v19 = vpop.f32.mrf.mxu0  ;;  %v1989_v51 = vadd.f32 %v8145_v5, %v7976_v46 }
 0x2d0   :  { %v2367_v35 = vpop.f32.mrf.mxu1 }
 0x2d1   :  { %v8267_v58 = vadd.f32 %v2367_v35, %v1961_v32  ;;  %v1973_v35 = vadd.f32 %v8118_v10, %v7922_v24  ;;  %v1981_v24 = vadd.f32 %v8134_v62, %v7948_v34  ;;  %v1991_v62 = vadd.f32 %v8153_v18, %v7987_v53 }
 0x2d2   :  { %v2369_v60 = vpop.f32.mrf.mxu1  ;;  %v1999_v53 = vadd.f32 %v8164_v50, %v8009_v8 }
 0x2d3   :  { %v8271_v40 = vadd.f32 %v2369_v60, %v1963_v13  ;;  %v1975_v60 = vadd.f32 %v8121_v44, %v7931_v1  ;;  %v1983_v1 = vadd.f32 %v8137_v63, %v7956_v39  ;;  %v1993_v63 = vadd.f32 %v8156_v0, %v7994_v54 }
 0x2d4   :  { %v2371_v43 = vpop.f32.mrf.mxu1 }
 0x2d5   :  { %v8275_v11 = vadd.f32 %v2371_v43, %v1965_v57  ;;  %v8303_v57 = vpop.f32.mrf.mxu0 }
 0x2d6   :  { %v2375_v9 = vpop.f32.mrf.mxu1 }
 0x2d7   :  { %v8279_v7 = vadd.f32 %v2375_v9, %v1969_v33  ;;  %v8311_v33 = vpop.f32.mrf.mxu0 }
 0x2d8   :  { %v2377_v37 = vpop.f32.mrf.mxu1 }
 0x2d9   :  { %v8283_v32 = vadd.f32 %v2377_v37, %v1971_v47  ;;  %v8321_v37 = vpop.f32.mrf.mxu0 }
 0x2da   :  { %v2379_v12 = vpop.f32.mrf.mxu1 }
 0x2db   :  { %v8287_v45 = vadd.f32 %v2379_v12, %v1973_v35  ;;  %v8325_v46 = vpop.f32.mrf.mxu0 }
 0x2dc   :  { %v2381_v15 = vpop.f32.mrf.mxu1 }
 0x2dd   :  { %v8291_v30 = vadd.f32 %v2381_v15, %v1975_v60  ;;  %v2001_v60 = vadd.f32 %v8168_v4, %v8017_v59  ;;  %v8335_v0 = vpop.f32.mrf.mxu0  ;;  %v2009_v59 = vadd.f32 %v8178_v14, %v8026_v20  ;;  %v2011_v4 = vadd.f32 %v8181_v55, %v8031_v21 }
 0x2de   :  { %v2385_v42 = vpop.f32.mrf.mxu1  ;;  %v2019_v20 = vadd.f32 %v8187_v61, %v8040_v36  ;;  %v2029_v36 = vadd.f32 %v8203_v6, %v8054_v26  ;;  %v9147_v6 = vld [vmem:[#allocation24_spill] sm:$0xff] }
 0x2df   :  { %v8297_v10 = vadd.f32 %v2385_v42, %v1979_v17  ;;  %v2003_v17 = vadd.f32 %v8171_v27, %v8022_v52  ;;  %v2013_v27 = vadd.f32 %v8183_v56, %v8033_v22  ;;  %v2023_v56 = vadd.f32 %v8195_v25, %v8047_v23 }
 0x2e0   :  { %v2387_v43 = vpop.f32.mrf.mxu1  ;;  %v2033_v25 = vadd.f32 %v8215_v38, %v8061_v29 }
 0x2e1   :  { %v8301_v44 = vadd.f32 %v2387_v43, %v1981_v24 }
 0x2e2   :  { %v2389_v13 = vpop.f32.mrf.mxu1 }
 0x2e3   :  { %v8305_v28 = vadd.f32 %v2389_v13, %v1983_v1  ;;  %v8343_v1 = vpop.f32.mrf.mxu0 }
 0x2e4   :  { %v8307_v2 = vpop.f32.mrf.mxu1 }
 0x2e6   :  { %v2395_v34 = vpop.f32.mrf.mxu1 }
 0x2e7   :  { %v8315_v9 = vadd.f32 %v2395_v34, %v1989_v51  ;;  %v8353_v51 = vpop.f32.mrf.mxu0 }
 0x2e8   :  { %v2397_v39 = vpop.f32.mrf.mxu1 }
 0x2e9   :  { %v8319_v47 = vadd.f32 %v2397_v39, %v1991_v62  ;;  %v8359_v62 = vpop.f32.mrf.mxu0 }
 0x2ea   :  { %v2399_v35 = vpop.f32.mrf.mxu1 }
 0x2eb   :  { %v8323_v12 = vadd.f32 %v2399_v35, %v1993_v63  ;;  %v8367_v21 = vpop.f32.mrf.mxu0  ;;  %v2021_v35 = vadd.f32 %v8192_v16, %v8045_v41 }
 0x2ec   :  { %v8327_v5 = vpop.f32.mrf.mxu1 }
 0x2ee   :  { %v2405_v18 = vpop.f32.mrf.mxu1 }
 0x2ef   :  { %v8333_v15 = vadd.f32 %v2405_v18, %v1999_v53 }
 0x2f0   :  { %v2407_v54 = vpop.f32.mrf.mxu1 }
 0x2f1   :  { %v8339_v42 = vadd.f32 %v2407_v54, %v2001_v60  ;;  %v8377_v60 = vpop.f32.mrf.mxu0 }
 0x2f2   :  { %v2409_v24 = vpop.f32.mrf.mxu1 }
 0x2f3   :  { %v8341_v43 = vadd.f32 %v2409_v24, %v2003_v17  ;;  %v8385_v24 = vpop.f32.mrf.mxu0 }
 0x2f4   :  { %v8345_v8 = vpop.f32.mrf.mxu1 }
 0x2f6   :  { %v2415_v50 = vpop.f32.mrf.mxu1 }
 0x2f7   :  { %v8351_v13 = vadd.f32 %v2415_v50, %v2009_v59  ;;  %v8389_v59 = vpop.f32.mrf.mxu0 }
 0x2f8   :  { %v2417_v52 = vpop.f32.mrf.mxu1 }
 0x2f9   :  { %v8357_v34 = vadd.f32 %v2417_v52, %v2011_v4  ;;  %v2035_v4 = vadd.f32 %v8223_v49, %v8063_v3  ;;  %v9152_v3 = vld [vmem:[#allocation12_spill] sm:$0xff]  ;;  %v9153_v49 = vld [vmem:[#allocation26_spill] sm:$0xff] }
 0x2fa   :  { %v2419_v39 = vpop.f32.mrf.mxu1 }
 0x2fb   :  { %v8361_v63 = vadd.f32 %v2419_v39, %v2013_v27  ;;  %v8399_v27 = vpop.f32.mrf.mxu0  ;;  %v2039_v39 = vadd.f32 %v9147_v6, %v8066_v31 }
 0x2fc   :  { %v8363_v14 = vpop.f32.mrf.mxu1 }
 0x2fd   :  { %v8409_v29 = vpop.f32.mrf.mxu0 }
 0x2fe   :  { %v2425_v55 = vpop.f32.mrf.mxu1 }
 0x2ff   :  { %v8371_v53 = vadd.f32 %v2425_v55, %v2019_v20 }
 0x300   :  { %v2427_v22 = vpop.f32.mrf.mxu1 }
 0x301   :  { %v8375_v18 = vadd.f32 %v2427_v22, %v2021_v35  ;;  %v9149_v35 = vld [vmem:[#allocation11_spill] sm:$0xff]  ;;  %v9150_v22 = vld [vmem:[#allocation25_spill] sm:$0xff] }
 0x302   :  { %v2429_v54 = vpop.f32.mrf.mxu1 }
 0x303   :  { %v8379_v17 = vadd.f32 %v2429_v54, %v2023_v56  ;;  %v2041_v56 = vadd.f32 %v9150_v22, %v9149_v35  ;;  %v9158_v35 = vld [vmem:[#allocation14_spill] sm:$0xff] }
 0x304   :  { %v8381_v61 = vpop.f32.mrf.mxu1 }
 0x306   :  { %v2435_v41 = vpop.f32.mrf.mxu1 }
 0x307   :  { %v8387_v16 = vadd.f32 %v2435_v41, %v2029_v36  ;;  %v2043_v36 = vadd.f32 %v9153_v49, %v9152_v3  ;;  %v9161_v3 = vld [vmem:[#allocation15_spill] sm:$0xff] }
 0x308   :  { %v8391_v23 = vpop.f32.mrf.mxu1 }
 0x309   :  { %9145 = vst [vmem:[#allocation32_spill] sm:$0xff] %v8387_v16 }
 0x30a   :  { %v2439_v50 = vpop.f32.mrf.mxu1 }
 0x30b   :  { %v8397_v52 = vadd.f32 %v2439_v50, %v2033_v25  ;;  %v9155_v50 = vld [vmem:[#allocation13_spill] sm:$0xff] }
 0x30c   :  { %v2441_v26 = vpop.f32.mrf.mxu1 }
 0x30d   :  { %9146 = vst [vmem:[#allocation33_spill] sm:$0xff] %v8397_v52  ;;  %v8403_v20 = vadd.f32 %v2441_v26, %v2035_v4  ;;  %v9156_v52 = vld [vmem:[#allocation27_spill] sm:$0xff]  ;;  %v8419_v26 = vpop.f32.mrf.mxu0 }
 0x30e   :  { %v2445_v55 = vpop.f32.mrf.mxu1  ;;  %v2045_v31 = vadd.f32 %v9156_v52, %v9155_v50  ;;  %v9164_v52 = vld [vmem:[#allocation16_spill] sm:$0xff] }
 0x30f   :  { %9148 = vst [vmem:[#allocation24_spill] sm:$0xff] %v8403_v20  ;;  %v8407_v54 = vadd.f32 %v2445_v55, %v2039_v39  ;;  %v9159_v39 = vld [vmem:[#allocation28_spill] sm:$0xff] }
 0x310   :  { %v2447_v38 = vpop.f32.mrf.mxu1  ;;  %v2049_v55 = vadd.f32 %v9159_v39, %v9158_v35  ;;  %v9168_v35 = vld [vmem:[#allocation31_spill] sm:$0xff] }
 0x311   :  { %9151 = vst [vmem:[#allocation11_spill] sm:$0xff] %v8407_v54  ;;  %v8413_v41 = vadd.f32 %v2447_v38, %v2041_v56  ;;  %v8425_v54 = vpop.f32.mrf.mxu0  ;;  %v9162_v56 = vld [vmem:[#allocation29_spill] sm:$0xff] }
 0x312   :  { %v2449_v25 = vpop.f32.mrf.mxu1  ;;  %v2051_v38 = vadd.f32 %v9162_v56, %v9161_v3  ;;  %v2911_v3 = vadd.f32 %v8293_v19, %v8263_v48  ;;  %v2913_v48 = vadd.f32 %v8311_v33, %v8271_v40  ;;  %v2915_v40 = vadd.f32 %v8325_v46, %v8279_v7 }
 0x313   :  { %9154 = vst [vmem:[#allocation25_spill] sm:$0xff] %v8413_v41  ;;  %v8417_v4 = vadd.f32 %v2449_v25, %v2043_v36  ;;  %v9165_v36 = vld [vmem:[#allocation30_spill] sm:$0xff] }
 0x314   :  { %v2451_v6 = vpop.f32.mrf.mxu1  ;;  %v2053_v25 = vadd.f32 %v9165_v36, %v9164_v52 }
 0x315   :  { %9157 = vst [vmem:[#allocation12_spill] sm:$0xff] %v8417_v4  ;;  %v8423_v22 = vadd.f32 %v2451_v6, %v2045_v31  ;;  %v8435_v4 = vpop.f32.mrf.mxu0  ;;  %v3398_v31 = vld [vmem:[%s9102_s4] sm:$0x3]  ;;  %v9167_v6 = vld [vmem:[#allocation17_spill] sm:$0xff] }
 0x316   :  { %v2455_v20 = vpop.f32.mrf.mxu1  ;;  %v2055_v39 = vadd.f32 %v9168_v35, %v9167_v6 }
 0x317   :  { %9160 = vst [vmem:[#allocation26_spill] sm:$0xff] %v8423_v22  ;;  %v8429_v49 = vadd.f32 %v2455_v20, %v2049_v55  ;;  %v8452_v52 = vpop.f32.mrf.mxu0 }
 0x318   :  { %v2457_v41 = vpop.f32.mrf.mxu1 }
 0x319   :  { %9163 = vst [vmem:[#allocation13_spill] sm:$0xff] %v8429_v49  ;;  %v8433_v50 = vadd.f32 %v2457_v41, %v2051_v38  ;;  %v9169_v41 = vld [vmem:[#allocation4_spill] sm:$0xff]  ;;  %v2912_v49 = vadd.f32 %v8303_v57, %v8267_v58  ;;  %v8463_v19 = vpop.f32.mrf.mxu0  ;;  %v2914_v58 = vadd.f32 %v8321_v37, %v8275_v11 }
 0x31a   :  { %v2459_v16 = vpop.f32.mrf.mxu1  ;;  %v9170_v56 = vsub.s32 0, %v9169_v41 }
 0x31b   :  { %9166 = vst [vmem:[#allocation27_spill] sm:$0xff] %v8433_v50  ;;  %v8442_v22 = vadd.f32 %v2459_v16, %v2053_v25  ;;  %v9171_v16 = vsub.s32 1, %v9169_v41  ;;  %v8468_v57 = vpop.f32.mrf.mxu0 }
 0x31c   :  { %v2461_v20 = vpop.f32.mrf.mxu1  ;;  %v8450_v38 = vrot.slane %v3398_v31, %v9170_v56 }
 0x31d   :  { %v8444_v55 = vadd.f32 %v2461_v20, %v2055_v39  ;;  %v8458_v25 = vrot.slane %v3398_v31, %v9171_v16  ;;  %v2916_v16 = vadd.f32 %v8335_v0, %v8283_v32  ;;  %v9172_v32 = vld [vmem:[#allocation5_spill] sm:$0xff]  ;;  %v9173_v0 = vld [vmem:[#allocation18_spill] sm:$0xff] }
 0x31e   :  { %v3259_v36 = vpop.f32.mrf.mxu1 }
 0x31f   :  { %v3358_v50 = vadd.f32 %v3259_v36, %v2911_v3 }
 0x320   :  { %v3261_v6 = vpop.f32.mrf.mxu1 }
 0x321   :  { %v3410_v35 = vadd.f32 %v8450_v38, %v3358_v50  ;;  %v3359_v39 = vadd.f32 %v3261_v6, %v2912_v49  ;;  %v8476_v6 = vpop.f32.mrf.mxu0 }
 0x322   :  { %v3263_v20 = vpop.f32.mrf.mxu1 }
 0x323   :  { %v3411_v56 = vadd.f32 %v8458_v25, %v3359_v39  ;;  %v3360_v3 = vadd.f32 %v3263_v20, %v2913_v48  ;;  %6900 = vtanh.f32 %v3410_v35  ;;  %v2917_v39 = vadd.f32 %v8343_v1, %v8287_v45 }
 0x324   :  { %v3265_v31 = vpop.f32.mrf.mxu1  ;;  %v2918_v20 = vadd.f32 %v8353_v51, %v8291_v30  ;;  %v2919_v45 = vadd.f32 %v8359_v62, %v8297_v10  ;;  %v2921_v10 = vadd.f32 %v8377_v60, %v8305_v28 }
 0x325   :  { %6902 = vtanh.f32 %v3411_v56  ;;  %v3412_v50 = vadd.f32 %v8450_v38, %v3360_v3  ;;  %v3361_v49 = vadd.f32 %v3265_v31, %v2914_v58  ;;  %v8484_v56 = vpop.f32.mrf.mxu0  ;;  %v1985_v3 = vadd.f32 %v9173_v0, %v9172_v32 }
 0x326   :  { %v3269_v33 = vpop.f32.mrf.mxu1 }
 0x327   :  { %v3413_v41 = vadd.f32 %v8458_v25, %v3361_v49  ;;  %v3362_v36 = vadd.f32 %v3269_v33, %v2915_v40  ;;  %6904 = vtanh.f32 %v3412_v50  ;;  %v2475_v49 = vadd.f32 %v8307_v2, %v1985_v3  ;;  %v8495_v33 = vpop.f32.mrf.mxu0  ;;  %v6617_v2 = vld [vmem:[%s9101_s5 + $0x190] sm:$0xff]  }
 0x328   :  { %v3271_v11 = vpop.f32.mrf.mxu1  ;;  %v2920_v40 = vadd.f32 %v8367_v21, %v8301_v44  ;;  %v2923_v3 = vadd.f32 %v8389_v59, %v8315_v9 }
 0x329   :  { %6906 = vtanh.f32 %v3413_v41  ;;  %v3414_v37 = vadd.f32 %v8450_v38, %v3362_v36  ;;  %v3363_v35 = vadd.f32 %v3271_v11, %v2916_v16  ;;  %v8506_v44 = vpop.f32.mrf.mxu0 }
 0x32a   :  { %v3273_v48 = vpop.f32.mrf.mxu1 }
 0x32b   :  { %v3415_v7 = vadd.f32 %v8458_v25, %v3363_v35  ;;  %v3364_v46 = vadd.f32 %v3273_v48, %v2917_v39  ;;  %6908 = vtanh.f32 %v3414_v37  ;;  %v2922_v48 = vadd.f32 %v8385_v24, %v2475_v49 }
 0x32c   :  { %v3275_v58 = vpop.f32.mrf.mxu1 }
 0x32d   :  { %6910 = vtanh.f32 %v3415_v7  ;;  %v3416_v31 = vadd.f32 %v8450_v38, %v3364_v46  ;;  %v3365_v50 = vadd.f32 %v3275_v58, %v2918_v20  ;;  %v9176_v7 = vld [vmem:[#allocation6_spill] sm:$0xff]  ;;  %v9177_v46 = vld [vmem:[#allocation19_spill] sm:$0xff] }
 0x32e   :  { %v3279_v1 = vpop.f32.mrf.mxu1  ;;  %v1995_v20 = vadd.f32 %v9177_v46, %v9176_v7 }
 0x32f   :  { %v3417_v30 = vadd.f32 %v8458_v25, %v3365_v50  ;;  %v3366_v51 = vadd.f32 %v3279_v1, %v2919_v45  ;;  %6912 = vtanh.f32 %v3416_v31  ;;  %v8517_v31 = vpop.f32.mrf.mxu0  ;;  %v2924_v50 = vadd.f32 %v8399_v27, %v8319_v47 }
 0x330   :  { %v3281_v41 = vpop.f32.mrf.mxu1  ;;  %v6901_v36 = vpop.eup %6900  ;;  %v2479_v45 = vadd.f32 %v8327_v5, %v1995_v20  ;;  %v2928_v20 = vadd.f32 %v8435_v4, %v8339_v42  ;;  %v2929_v4 = vadd.f32 %v8452_v52, %v8341_v43  ;;  %v6570_v43 = vld [vmem:[%s9101_s5 + $0x120] sm:$0xff]  }
 0x331   :  { %6914 = vtanh.f32 %v3417_v30  ;;  %v3418_v16 = vadd.f32 %v8450_v38, %v3366_v51  ;;  %v3367_v11 = vadd.f32 %v3281_v41, %v2920_v40  ;;  %v2925_v41 = vadd.f32 %v8409_v29, %v8323_v12  ;;  %v8528_v27 = vpop.f32.mrf.mxu0 }
 0x332   :  { %v6903_v62 = vpop.eup %6902  ;;  %v3283_v21 = vpop.f32.mrf.mxu1 }
 0x333   :  { %v6091_v37 = vpack.c.bf16 %v6903_v62, %v6901_v36  ;;  %v3419_v35 = vadd.f32 %v8458_v25, %v3367_v11  ;;  %v3368_v39 = vadd.f32 %v3283_v21, %v2921_v10  ;;  %6916 = vtanh.f32 %v3418_v16  ;;  %v9178_v62 = vld [vmem:[#allocation7_spill] sm:$0xff]  ;;  %v9179_v21 = vld [vmem:[#allocation20_spill] sm:$0xff]  ;;  %v8539_v46 = vpop.f32.mrf.mxu0 }
 0x334   :  { %v3285_v28 = vpop.f32.mrf.mxu1  ;;  %v6905_v60 = vpop.eup %6904  ;;  %v2926_v10 = vadd.f32 %v8419_v26, %v2479_v45 }
 0x335   :  { %3612 = vst.msk [vmem:[#allocation3] sm:$0xff] %vm8502_vm6, %v6091_v37  ;;  %6918 = vtanh.f32 %v3419_v35  ;;  %v3420_v32 = vadd.f32 %v8450_v38, %v3368_v39  ;;  %v3369_v0 = vadd.f32 %v3285_v28, %v2922_v48  ;;  %v2005_v37 = vadd.f32 %v9179_v21, %v9178_v62 }
 0x336   :  { %v6907_v58 = vpop.eup %6906  ;;  %v3289_v24 = vpop.f32.mrf.mxu1  ;;  %v2927_v48 = vadd.f32 %v8425_v54, %v8333_v15  ;;  %v2932_v21 = vadd.f32 %v8476_v6, %v8357_v34 }
 0x337   :  { %v6092_v1 = vpack.c.bf16 %v6907_v58, %v6905_v60  ;;  %v3421_v49 = vadd.f32 %v8458_v25, %v3369_v0  ;;  %v3370_v30 = vadd.f32 %v3289_v24, %v2923_v3  ;;  %6920 = vtanh.f32 %v3420_v32  ;;  %v6569_v3 = vld [vmem:[%s9101_s5 + $0x128] sm:$0xff]   ;;  %v8548_v58 = vpop.f32.mrf.mxu0 }
 0x338   :  { %v3291_v51 = vpop.f32.mrf.mxu1  ;;  %v6909_v40 = vpop.eup %6908  ;;  %v2483_v28 = vadd.f32 %v8345_v8, %v2005_v37 }
 0x339   :  { %3613 = vst.msk [vmem:[#allocation3 + $0x8] sm:$0xff] %vm8502_vm6, %v6092_v1  ;;  %6922 = vtanh.f32 %v3421_v49  ;;  %v3422_v9 = vadd.f32 %v8450_v38, %v3370_v30  ;;  %v3371_v59 = vadd.f32 %v3291_v51, %v2924_v50 }
 0x33a   :  { %v6911_v47 = vpop.eup %6910  ;;  %v3293_v5 = vpop.f32.mrf.mxu1 }
 0x33b   :  { %v6093_v36 = vpack.c.bf16 %v6911_v47, %v6909_v40  ;;  %v3423_v16 = vadd.f32 %v8458_v25, %v3371_v59  ;;  %v3372_v11 = vadd.f32 %v3293_v5, %v2925_v41  ;;  %6924 = vtanh.f32 %v3422_v9  ;;  %v8558_v9 = vpop.f32.mrf.mxu0  ;;  %v9180_v59 = vld [vmem:[#allocation8_spill] sm:$0xff]  ;;  %v9181_v41 = vld [vmem:[#allocation21_spill] sm:$0xff] }
 0x33c   :  { %v3295_v35 = vpop.f32.mrf.mxu1  ;;  %v6913_v39 = vpop.eup %6912  ;;  %v2930_v40 = vadd.f32 %v8463_v19, %v2483_v28  ;;  %v2015_v47 = vadd.f32 %v9181_v41, %v9180_v59 }
 0x33d   :  { %3614 = vst.msk [vmem:[#allocation3 + $0x10] sm:$0xff] %vm8502_vm6, %v6093_v36  ;;  %6926 = vtanh.f32 %v3423_v16  ;;  %v3424_v12 = vadd.f32 %v8450_v38, %v3372_v11  ;;  %v3373_v29 = vadd.f32 %v3295_v35, %v2926_v10  ;;  %v2931_v16 = vadd.f32 %v8468_v57, %v8351_v13  ;;  %v6575_v13 = vld [vmem:[%s9101_s5 + $0x118] sm:$0xff]   ;;  %v8581_v57 = vpop.f32.mrf.mxu0 }
 0x33e   :  { %v6915_v7 = vpop.eup %6914  ;;  %v3299_v26 = vpop.f32.mrf.mxu1  ;;  %v9182_v11 = vmov 0   ;;  %v2487_v37 = vadd.f32 %v8363_v14, %v2015_v47 }
 0x33f   :  { %v6094_v60 = vpack.c.bf16 %v6915_v7, %v6913_v39  ;;  %v3425_v32 = vadd.f32 %v8458_v25, %v3373_v29  ;;  %v3374_v0 = vadd.f32 %v3299_v26, %v2927_v48  ;;  %6928 = vtanh.f32 %v3424_v12  ;;  %v6574_v29 = vld [vmem:[%s9101_s5 + $0xd8] sm:$0xff]  }
 0x340   :  { %v3301_v15 = vpop.f32.mrf.mxu1  ;;  %v6565_v54 = vld [vmem:[#allocation3] ss:$8 sps:$4 sm:$0xff]   ;;  %v6567_v24 = vld [vmem:[#allocation3 + $0x4] ss:$8 sps:$4 sm:$0xff]   ;;  %v6917_v50 = vpop.eup %6916 }
 0x341   :  { %3615 = vst.msk [vmem:[#allocation3 + $0x18] sm:$0xff] %vm8502_vm6, %v6094_v60  ;;  %6930 = vtanh.f32 %v3425_v32  ;;  %v3426_v42 = vadd.f32 %v8450_v38, %v3374_v0  ;;  %v3375_v8 = vadd.f32 %v3301_v15, %v2928_v20  ;;  %5795 = vmatprep.mubr.msk.bf16.mxu1 %vm479_vm0, %v6567_v24  ;;  %v2933_v20 = vadd.f32 %v8484_v56, %v8361_v63  ;;  %v9183_v24 = vld [vmem:[#allocation9_spill] sm:$0xff]  ;;  %v6576_v56 = vld [vmem:[%s9101_s5 + $0xd0] sm:$0xff]  }
 0x342   :  { %v6919_v45 = vpop.eup %6918  ;;  %v3303_v1 = vpop.f32.mrf.mxu1  ;;  %3896 = vmatmul.mubr.bf16.vlgmr.msra.gmra.mxu1 %v6565_v54  ;;  %v2934_v15 = vadd.f32 %v8495_v33, %v2487_v37 }
 0x343   :  { %v6095_v49 = vpack.c.bf16 %v6919_v45, %v6917_v50  ;;  %v3427_v30 = vadd.f32 %v8458_v25, %v3375_v8  ;;  %v3376_v51 = vadd.f32 %v3303_v1, %v2929_v4  ;;  %6932 = vtanh.f32 %v3426_v42  ;;  %4140 = vmatpush1.bf16.msra.mxu1 %v6569_v3  ;;  %v8592_v54 = vpop.f32.mrf.mxu0  ;;  %v9184_v50 = vld [vmem:[#allocation22_spill] sm:$0xff] }
 0x344   :  { %v3305_v5 = vpop.f32.mrf.mxu1  ;;  %v6921_v52 = vpop.eup %6920  ;;  %4141 = vmatprep.subr.bf16.mxu1 %v9182_v11  ;;  %v2025_v42 = vadd.f32 %v9184_v50, %v9183_v24  ;;  %v6577_v8 = vld [vmem:[%s9101_s5 + $0x110] sm:$0xff]   ;;  %v2935_v1 = vadd.f32 %v8506_v44, %v8371_v53  ;;  %v6581_v53 = vld [vmem:[%s9101_s5 + $0xc8] sm:$0xff]   ;;  %v6589_v24 = vld [vmem:[%s9101_s5 + $0xf8] sm:$0xff]  }
 0x345   :  { %3616 = vst.msk [vmem:[#allocation3 + $0x20] sm:$0xff] %vm8502_vm6, %v6095_v49  ;;  %6934 = vtanh.f32 %v3427_v30  ;;  %v3428_v19 = vadd.f32 %v8450_v38, %v3376_v51  ;;  %v3377_v36 = vadd.f32 %v3305_v5, %v2930_v40  ;;  %v8609_v30 = vpop.f32.mrf.mxu0  ;;  %v2936_v5 = vadd.f32 %v8517_v31, %v8375_v18  ;;  %v9185_v44 = vld [vmem:[#allocation10_spill] sm:$0xff] }
 0x346   :  { %v6923_v10 = vpop.eup %6922  ;;  %v3309_v62 = vpop.f32.mrf.mxu1  ;;  %v2491_v51 = vadd.f32 %v8381_v61, %v2025_v42 }
 0x347   :  { %v6096_v35 = vpack.c.bf16 %v6923_v10, %v6921_v52  ;;  %v3429_v39 = vadd.f32 %v8458_v25, %v3377_v36  ;;  %v3378_v12 = vadd.f32 %v3309_v62, %v2931_v16  ;;  %6936 = vtanh.f32 %v3428_v19  ;;  %4142 = vmatpush1.bf16.msra.mxu1 %v6570_v43  ;;  %v9186_v43 = vld [vmem:[#allocation23_spill] sm:$0xff]  ;;  %v6582_v36 = vld [vmem:[%s9101_s5 + $0x108] sm:$0xff]  }
 0x348   :  { %v3311_v48 = vpop.f32.mrf.mxu1  ;;  %v6571_v34 = vld [vmem:[#allocation3 + $0x10] ss:$8 sps:$4 sm:$0xff]   ;;  %v6573_v6 = vld [vmem:[#allocation3 + $0x14] ss:$8 sps:$4 sm:$0xff]   ;;  %v6925_v14 = vpop.eup %6924  ;;  %4143 = vmatprep.subr.bf16.mxu1 %v9182_v11  ;;  %v2031_v52 = vadd.f32 %v9186_v43, %v9185_v44  ;;  %v2937_v10 = vadd.f32 %v8528_v27, %v8379_v17  ;;  %v6583_v27 = vld [vmem:[%s9101_s5 + $0xc0] sm:$0xff]  }
 0x349   :  { %3617 = vst.msk [vmem:[#allocation3 + $0x28] sm:$0xff] %vm8502_vm6, %v6096_v35  ;;  %6938 = vtanh.f32 %v3429_v39  ;;  %v3430_v7 = vadd.f32 %v8450_v38, %v3378_v12  ;;  %v3379_v26 = vadd.f32 %v3311_v48, %v2932_v21  ;;  %5782 = vmatprep.mubr.msk.bf16.mxu0 %vm479_vm0, %v6573_v6  ;;  %v8630_v21 = vpop.f32.mrf.mxu0  ;;  %v2938_v35 = vadd.f32 %v8539_v46, %v2491_v51  ;;  %v6584_v48 = vld [vmem:[%s9101_s5 + $0x100] sm:$0xff]   ;;  %v9190_v44 = vld [vmem:[#allocation11_spill] sm:$0xff] }
 0x34a   :  { %v6927_v28 = vpop.eup %6926  ;;  %v3313_v60 = vpop.f32.mrf.mxu1  ;;  %3783 = vmatmul.mubr.bf16.vlgmr.msra.gmra.mxu0 %v6571_v34  ;;  %v2493_v39 = vadd.f32 %v8391_v23, %v2031_v52  ;;  %v9187_v6 = vld [vmem:[#allocation32_spill] sm:$0xff]  ;;  %v2943_v43 = vadd.f32 %v8609_v30, %v9190_v44  ;;  %v6592_v30 = vld [vmem:[%s9101_s5 + $0xa8] sm:$0xff]  }
 0x34b   :  { %v6097_v32 = vpack.c.bf16 %v6927_v28, %v6925_v14  ;;  %v3431_v0 = vadd.f32 %v8458_v25, %v3379_v26  ;;  %v3380_v3 = vadd.f32 %v3313_v60, %v2933_v20  ;;  %6940 = vtanh.f32 %v3430_v7  ;;  %4001 = vmatpush1.bf16.msra.mxu0 %v6574_v29  ;;  %4144 = vmatpush1.bf16.msra.mxu1 %v6575_v13  ;;  %v2896_v26 = vpop.f32.mrf.mxu0  ;;  %v9189_v51 = vld [vmem:[#allocation24_spill] sm:$0xff] }
 0x34c   :  { %v3315_v63 = vpop.f32.mrf.mxu1  ;;  %v6929_v4 = vpop.eup %6928  ;;  %4002 = vmatprep.subr.bf16.mxu0 %v9182_v11  ;;  %4145 = vmatprep.subr.bf16.mxu1 %v9182_v11  ;;  %v2939_v14 = vadd.f32 %v8548_v58, %v9187_v6  ;;  %v6602_v44 = vld [vmem:[%s9101_s5 + $0x1c0] sm:$0xff]  }
 0x34d   :  { %3618 = vst.msk [vmem:[#allocation3 + $0x30] sm:$0xff] %vm8502_vm6, %v6097_v32  ;;  %6942 = vtanh.f32 %v3431_v0  ;;  %v3432_v33 = vadd.f32 %v8450_v38, %v3380_v3  ;;  %v3381_v45 = vadd.f32 %v3315_v63, %v2934_v15  ;;  %v2940_v0 = vadd.f32 %v8558_v9, %v2493_v39  ;;  %v6588_v3 = vld [vmem:[%s9101_s5 + $0xb8] sm:$0xff]   ;;  %v9188_v63 = vld [vmem:[#allocation33_spill] sm:$0xff] }
 0x34e   :  { %v6931_v49 = vpop.eup %6930  ;;  %v3319_v40 = vpop.f32.mrf.mxu1 }
 0x34f   :  { %v6098_v59 = vpack.c.bf16 %v6931_v49, %v6929_v4  ;;  %v3433_v41 = vadd.f32 %v8458_v25, %v3381_v45  ;;  %v3382_v47 = vadd.f32 %v3319_v40, %v2935_v1  ;;  %6944 = vtanh.f32 %v3432_v33  ;;  %4003 = vmatpush1.bf16.msra.mxu0 %v6576_v56  ;;  %4146 = vmatpush1.bf16.msra.mxu1 %v6577_v8  ;;  %v2898_v4 = vpop.f32.mrf.mxu0 }
 0x350   :  { %v3321_v19 = vpop.f32.mrf.mxu1  ;;  %v6580_v61 = vld [vmem:[#allocation3 + $0x24] ss:$8 sps:$4 sm:$0xff]   ;;  %v6933_v16 = vpop.eup %6932  ;;  %4004 = vmatprep.subr.bf16.mxu0 %v9182_v11  ;;  %4147 = vmatprep.subr.bf16.mxu1 %v9182_v11  ;;  %v2941_v56 = vadd.f32 %v8581_v57, %v9188_v63  ;;  %v2942_v40 = vadd.f32 %v8592_v54, %v9189_v51  ;;  %v6590_v57 = vld [vmem:[%s9101_s5 + $0xb0] sm:$0xff]  }
 0x351   :  { %3619 = vst.msk [vmem:[#allocation3 + $0x38] sm:$0xff] %vm8502_vm6, %v6098_v59  ;;  %6946 = vtanh.f32 %v3433_v41  ;;  %v3434_v18 = vadd.f32 %v8450_v38, %v3382_v47  ;;  %v3383_v31 = vadd.f32 %v3321_v19, %v2936_v5  ;;  %5828 = vmatprep.mubr.msk.bf16.mxu0 %vm479_vm0, %v6580_v61  ;;  %v2902_v59 = vpop.f32.mrf.mxu0  ;;  %v6591_v47 = vld [vmem:[%s9101_s5 + $0xf0] sm:$0xff]  }
 0x352   :  { %v6935_v62 = vpop.eup %6934  ;;  %v3323_v37 = vpop.f32.mrf.mxu1 }
 0x353   :  { %v6099_v12 = vpack.c.bf16 %v6935_v62, %v6933_v16  ;;  %v3435_v29 = vadd.f32 %v8458_v25, %v3383_v31  ;;  %v3384_v13 = vadd.f32 %v3323_v37, %v2937_v10  ;;  %6948 = vtanh.f32 %v3434_v18  ;;  %4005 = vmatpush1.bf16.msra.mxu0 %v6581_v53  ;;  %4148 = vmatpush1.bf16.msra.mxu1 %v6582_v36  ;;  %v9191_v18 = vld [vmem:[#allocation25_spill] sm:$0xff]  ;;  %v2904_v10 = vpop.f32.mrf.mxu0  ;;  %v6593_v37 = vld [vmem:[%s9101_s5 + $0x138] sm:$0xff]  }
 0x354   :  { %v3325_v17 = vpop.f32.mrf.mxu1  ;;  %v6937_v34 = vpop.eup %6936  ;;  %4006 = vmatprep.subr.bf16.mxu0 %v9182_v11  ;;  %4149 = vmatprep.subr.bf16.mxu1 %v9182_v11  ;;  %v2944_v31 = vadd.f32 %v8630_v21, %v9191_v18 }
 0x355   :  { %3620 = vst.msk [vmem:[#allocation3 + $0x40] sm:$0xff] %vm8502_vm6, %v6099_v12  ;;  %6950 = vtanh.f32 %v3435_v29  ;;  %v3436_v23 = vadd.f32 %v8450_v38, %v3384_v13  ;;  %v3385_v46 = vadd.f32 %v3325_v17, %v2938_v35  ;;  %v9192_v12 = vld [vmem:[#allocation12_spill] sm:$0xff]  ;;  %v2906_v6 = vpop.f32.mrf.mxu0 }
 0x356   :  { %v6939_v7 = vpop.eup %6938  ;;  %v3329_v20 = vpop.f32.mrf.mxu1  ;;  %v2945_v29 = vadd.f32 %v2896_v26, %v9192_v12  ;;  %v6595_v26 = vld [vmem:[%s9101_s5 + $0x130] sm:$0xff]   ;;  %v6610_v12 = vld [vmem:[%s9101_s5 + $0x168] sm:$0xff]  }
 0x357   :  { %v6100_v28 = vpack.c.bf16 %v6939_v7, %v6937_v34  ;;  %v3437_v60 = vadd.f32 %v8458_v25, %v3385_v46  ;;  %v3386_v32 = vadd.f32 %v3329_v20, %v2939_v14  ;;  %6952 = vtanh.f32 %v3436_v23  ;;  %4007 = vmatpush1.bf16.msra.mxu0 %v6583_v27  ;;  %4150 = vmatpush1.bf16.msra.mxu1 %v6584_v48  ;;  %v9193_v23 = vld [vmem:[#allocation26_spill] sm:$0xff]  ;;  %v6594_v7 = vld [vmem:[%s9101_s5 + $0xa0] sm:$0xff]   ;;  %v2908_v63 = vpop.f32.mrf.mxu0 }
 0x358   :  { %v3331_v15 = vpop.f32.mrf.mxu1  ;;  %v6587_v58 = vld [vmem:[#allocation3 + $0x34] ss:$8 sps:$4 sm:$0xff]   ;;  %v6941_v50 = vpop.eup %6940  ;;  %4008 = vmatprep.subr.bf16.mxu0 %v9182_v11  ;;  %4151 = vmatprep.subr.bf16.mxu1 %v9182_v11  ;;  %v2946_v46 = vadd.f32 %v2898_v4, %v9193_v23  ;;  %v6597_v4 = vld [vmem:[%s9101_s5 + $0x1c8] sm:$0xff]   ;;  %v6613_v23 = vld [vmem:[%s9101_s5 + $0x1a0] sm:$0xff]  }
 0x359   :  { %3621 = vst.msk [vmem:[#allocation3 + $0x48] sm:$0xff] %vm8502_vm6, %v6100_v28  ;;  %6954 = vtanh.f32 %v3437_v60  ;;  %v3438_v9 = vadd.f32 %v8450_v38, %v3386_v32  ;;  %v3387_v42 = vadd.f32 %v3331_v15, %v2940_v0  ;;  %5861 = vmatprep.mubr.msk.bf16.mxu1 %vm479_vm0, %v6587_v58  ;;  %v9194_v28 = vld [vmem:[#allocation13_spill] sm:$0xff]  ;;  %v9195_v58 = vld [vmem:[#allocation27_spill] sm:$0xff] }
 0x35a   :  { %v6943_v8 = vpop.eup %6942  ;;  %v3333_v33 = vpop.f32.mrf.mxu1  ;;  %v2947_v60 = vadd.f32 %v2902_v59, %v9194_v28  ;;  %v6619_v28 = vld [vmem:[%s9101_s5 + $0x1d8] sm:$0xff]  }
 0x35b   :  { %v6101_v45 = vpack.c.bf16 %v6943_v8, %v6941_v50  ;;  %v3439_v1 = vadd.f32 %v8458_v25, %v3387_v42  ;;  %v3388_v49 = vadd.f32 %v3333_v33, %v2941_v56  ;;  %6956 = vtanh.f32 %v3438_v9  ;;  %4009 = vmatpush1.bf16.msra.mxu0 %v6588_v3  ;;  %4152 = vmatpush1.bf16.msra.mxu1 %v6589_v24  ;;  %v6596_v8 = vld [vmem:[%s9101_s5 + $0xe8] sm:$0xff]  }
 0x35c   :  { %v3335_v41 = vpop.f32.mrf.mxu1  ;;  %v6945_v5 = vpop.eup %6944  ;;  %4010 = vmatprep.subr.bf16.mxu0 %v9182_v11  ;;  %4153 = vmatprep.subr.bf16.mxu1 %v9182_v11  ;;  %v2948_v24 = vadd.f32 %v2904_v10, %v9195_v58 }
 0x35d   :  { %3622 = vst.msk [vmem:[#allocation3 + $0x50] sm:$0xff] %vm8502_vm6, %v6101_v45  ;;  %6958 = vtanh.f32 %v3439_v1  ;;  %v3440_v54 = vadd.f32 %v8450_v38, %v3388_v49  ;;  %v3389_v53 = vadd.f32 %v3335_v41, %v2942_v40  ;;  %v2949_v45 = vadd.f32 %v2906_v6, %v8442_v22  ;;  %v6585_v1 = vld [vmem:[#allocation3 + $0x30] ss:$8 sps:$4 sm:$0xff]  }
 0x35e   :  { %v6947_v52 = vpop.eup %6946  ;;  %v3339_v19 = vpop.f32.mrf.mxu1 }
 0x35f   :  { %v6102_v61 = vpack.c.bf16 %v6947_v52, %v6945_v5  ;;  %v3441_v36 = vadd.f32 %v8458_v25, %v3389_v53  ;;  %v3390_v16 = vadd.f32 %v3339_v19, %v2943_v43  ;;  %6960 = vtanh.f32 %v3440_v54  ;;  %4011 = vmatpush1.bf16.msra.mxu0 %v6590_v57  ;;  %4154 = vmatpush1.bf16.msra.mxu1 %v6591_v47  ;;  %v6601_v53 = vld [vmem:[%s9101_s5 + $0xe0] sm:$0xff]  }
 0x360   :  { %v3341_v62 = vpop.f32.mrf.mxu1  ;;  %v6949_v35 = vpop.eup %6948  ;;  %4012 = vmatprep.subr.bf16.mxu0 %v9182_v11  ;;  %4167 = vmatprep.subr.bf16.mxu1 %v9182_v11  ;;  %v2950_v57 = vadd.f32 %v2908_v63, %v8444_v55  ;;  %v6606_v10 = vld [vmem:[#allocation3 + $0x44] ss:$8 sps:$4 sm:$0xff]   ;;  %v6633_v63 = vld [vmem:[%s9101_s5 + $0x258] sm:$0xff]  }
 0x361   :  { %3623 = vst.msk [vmem:[#allocation3 + $0x58] sm:$0xff] %vm8502_vm6, %v6102_v61  ;;  %6962 = vtanh.f32 %v3441_v36  ;;  %v3442_v21 = vadd.f32 %v8450_v38, %v3390_v16  ;;  %v3391_v39 = vadd.f32 %v3341_v62, %v2944_v31  ;;  %v6603_v16 = vld [vmem:[%s9101_s5 + $0x178] sm:$0xff]  }
 0x362   :  { %v6951_v13 = vpop.eup %6950  ;;  %v3343_v17 = vpop.f32.mrf.mxu1 }
 0x363   :  { %v6103_v27 = vpack.c.bf16 %v6951_v13, %v6949_v35  ;;  %v3443_v48 = vadd.f32 %v8458_v25, %v3391_v39  ;;  %v3392_v34 = vadd.f32 %v3343_v17, %v2945_v29  ;;  %6964 = vtanh.f32 %v3442_v21  ;;  %4013 = vmatpush1.bf16.msra.mxu0 %v6592_v30  ;;  %4168 = vmatpush2.bf16.msra.mxu1 %v6593_v37  ;;  %v6608_v30 = vld [vmem:[%s9101_s5 + $0x170] sm:$0xff]   ;;  %v6611_v13 = vld [vmem:[%s9101_s5 + $0x1a8] sm:$0xff]  }
 0x364   :  { %v3345_v14 = vpop.f32.mrf.mxu1  ;;  %v6953_v20 = vpop.eup %6952  ;;  %4014 = vmatprep.subr.bf16.mxu0 %v9182_v11  ;;  %4169 = vmatprep.subr.bf16.mxu1 %v9182_v11  ;;  %v6609_v35 = vld [vmem:[%s9101_s5 + $0x1b0] sm:$0xff]  }
 0x365   :  { %3624 = vst.msk [vmem:[#allocation3 + $0x60] sm:$0xff] %vm8502_vm6, %v6103_v27  ;;  %6966 = vtanh.f32 %v3443_v48  ;;  %v3444_v32 = vadd.f32 %v8450_v38, %v3392_v34  ;;  %v3393_v0 = vadd.f32 %v3345_v14, %v2946_v46  ;;  %v6612_v48 = vld [vmem:[%s9101_s5 + $0x160] sm:$0xff]   ;;  %v6614_v14 = vld [vmem:[%s9101_s5 + $0x158] sm:$0xff]  }
 0x366   :  { %v6955_v3 = vpop.eup %6954  ;;  %v3349_v15 = vpop.f32.mrf.mxu1 }
 0x367   :  { %v6104_v50 = vpack.c.bf16 %v6955_v3, %v6953_v20  ;;  %v3445_v9 = vadd.f32 %v8458_v25, %v3393_v0  ;;  %v3394_v42 = vadd.f32 %v3349_v15, %v2947_v60  ;;  %6968 = vtanh.f32 %v3444_v32  ;;  %4015 = vmatpush1.bf16.msra.mxu0 %v6594_v7  ;;  %4170 = vmatpush2.bf16.msra.mxu1 %v6595_v26  ;;  %v6615_v7 = vld [vmem:[%s9101_s5 + $0x198] sm:$0xff]   ;;  %v6616_v26 = vld [vmem:[%s9101_s5 + $0x150] sm:$0xff]   ;;  %v6618_v20 = vld [vmem:[%s9101_s5 + $0x148] sm:$0xff]  }
 0x368   :  { %v3351_v56 = vpop.f32.mrf.mxu1  ;;  %v6957_v33 = vpop.eup %6956  ;;  %4028 = vmatprep.subr.bf16.mxu0 %v9182_v11  ;;  %4417 = vmatprep.subr.bf16.mxu1 %v9182_v11  ;;  %v6600_v40 = vld [vmem:[#allocation3 + $0x54] ss:$8 sps:$4 sm:$0xff]   ;;  %v6620_v60 = vld [vmem:[%s9101_s5 + $0x140] sm:$0xff]   ;;  %v6622_v0 = vld [vmem:[%s9101_s5 + $0x188] sm:$0xff]  }
 0x369   :  { %3625 = vst.msk [vmem:[#allocation3 + $0x68] sm:$0xff] %vm8502_vm6, %v6104_v50  ;;  %6970 = vtanh.f32 %v3445_v9  ;;  %v3446_v49 = vadd.f32 %v8450_v38, %v3394_v42  ;;  %v3395_v51 = vadd.f32 %v3351_v56, %v2948_v24  ;;  %v6621_v32 = vld [vmem:[%s9101_s5 + $0x1d0] sm:$0xff]   ;;  %v6623_v3 = vld [vmem:[%s9101_s5 + $0x268] sm:$0xff]   ;;  %v6627_v24 = vld [vmem:[%s9101_s5 + $0x180] sm:$0xff]  }
 0x36a   :  { %v6959_v59 = vpop.eup %6958  ;;  %v3353_v41 = vpop.f32.mrf.mxu1  ;;  %4172 = vmatmul.mubr.bf16.vlgmr.msra.gmra.mxu1 %v6585_v1  ;;  %v6598_v15 = vld [vmem:[#allocation3 + $0x50] ss:$8 sps:$4 sm:$0xff]   ;;  %v6628_v50 = vld [vmem:[%s9101_s5 + $0x260] sm:$0xff]  }
 0x36b   :  { %v6105_v47 = vpack.c.bf16 %v6959_v59, %v6957_v33  ;;  %v3447_v22 = vadd.f32 %v8458_v25, %v3395_v51  ;;  %v3396_v5 = vadd.f32 %v3353_v41, %v2949_v45  ;;  %6972 = vtanh.f32 %v3446_v49  ;;  %4029 = vmatpush2.bf16.msra.mxu0 %v6596_v8  ;;  %4418 = vmatpush1.bf16.msra.mxu1 %v6597_v4  ;;  %v6629_v9 = vld [vmem:[%s9101_s5 + $0x218] sm:$0xff]   ;;  %v6604_v42 = vld [vmem:[#allocation3 + $0x40] ss:$8 sps:$4 sm:$0xff]   ;;  %v6634_v8 = vld [vmem:[%s9101_s5 + $0x210] sm:$0xff]  }
 0x36c   :  { %v3355_v54 = vpop.f32.mrf.mxu1  ;;  %v6961_v43 = vpop.eup %6960  ;;  %5927 = vmatprep.mubr.msk.bf16.mxu1 %vm479_vm0, %v6600_v40  ;;  %4030 = vmatprep.subr.bf16.mxu0 %v9182_v11  ;;  %v6635_v4 = vld [vmem:[%s9101_s5 + $0x250] sm:$0xff]   ;;  %v6636_v33 = vld [vmem:[%s9101_s5 + $0x208] sm:$0xff]   ;;  %v6638_v1 = vld [vmem:[%s9101_s5 + $0x200] sm:$0xff]  }
 0x36d   :  { %3626 = vst.msk [vmem:[#allocation3 + $0x70] sm:$0xff] %vm8502_vm6, %v6105_v47  ;;  %6974 = vtanh.f32 %v3447_v22  ;;  %v3448_v55 = vadd.f32 %v8450_v38, %v3396_v5  ;;  %v3397_v52 = vadd.f32 %v3355_v54, %v2950_v57  ;;  %4419 = vmatprep.subr.bf16.mxu1 %v9182_v11  ;;  %v6578_v38 = vld [vmem:[#allocation3 + $0x20] ss:$8 sps:$4 sm:$0xff]   ;;  %v6640_v51 = vld [vmem:[%s9101_s5 + $0x1f8] sm:$0xff]   ;;  %v6642_v59 = vld [vmem:[%s9101_s5 + $0x1f0] sm:$0xff]  }
 0x36e   :  { %v6963_v19 = vpop.eup %6962  ;;  %v6637_v45 = vld [vmem:[%s9101_s5 + $0x248] sm:$0xff]   ;;  %v6639_v49 = vld [vmem:[%s9101_s5 + $0x240] sm:$0xff]   ;;  %v6641_v40 = vld [vmem:[%s9101_s5 + $0x238] sm:$0xff]  }
 0x36f   :  { %v6106_v61 = vpack.c.bf16 %v6963_v19, %v6961_v43  ;;  %v3449_v36 = vadd.f32 %v8458_v25, %v3397_v52  ;;  %6976 = vtanh.f32 %v3448_v55  ;;  %4031 = vmatpush2.bf16.msra.mxu0 %v6601_v53  ;;  %4420 = vmatpush1.bf16.msra.mxu1 %v6602_v44  ;;  %v6607_v25 = vld [vmem:[%s9101_s5 + $0x1b8] sm:$0xff]   ;;  %v6643_v41 = vld [vmem:[%s9101_s5 + $0x230] sm:$0xff]   ;;  %v6644_v57 = vld [vmem:[%s9101_s5 + $0x1e8] sm:$0xff]  }
 0x370   :  { %v6965_v18 = vpop.eup %6964  ;;  %4278 = vmatprep.subr.bf16.mxu0 %v9182_v11  ;;  %4421 = vmatprep.subr.bf16.mxu1 %v9182_v11  ;;  %v6632_v56 = vld [vmem:[#allocation3 + $0x64] ss:$8 sps:$4 sm:$0xff]   ;;  %v6645_v47 = vld [vmem:[%s9101_s5 + $0x278] sm:$0xff]   ;;  %v6647_v5 = vld [vmem:[%s9101_s5 + $0x270] sm:$0xff]  }
 0x371   :  { %3627 = vst.msk [vmem:[#allocation3 + $0x78] sm:$0xff] %vm8502_vm6, %v6106_v61  ;;  %6978 = vtanh.f32 %v3449_v36  ;;  %v6646_v22 = vld [vmem:[%s9101_s5 + $0x1e0] sm:$0xff]   ;;  %v6648_v54 = vld [vmem:[%s9101_s5 + $0x228] sm:$0xff]   ;;  %v6655_v19 = vld [vmem:[%s9101_s5 + $0x2b8] sm:$0xff]  }
 0x372   :  { %v6967_v31 = vpop.eup %6966  ;;  %4033 = vmatmul.mubr.bf16.vlgmr.msra.gmra.mxu0 %v6578_v38  ;;  %v6649_v53 = vld [vmem:[%s9101_s5 + $0x308] sm:$0xff]   ;;  %v6653_v55 = vld [vmem:[%s9101_s5 + $0x220] sm:$0xff]   ;;  %v6659_v36 = vld [vmem:[%s9101_s5 + $0x2f8] sm:$0xff]  }
 0x373   :  { %v6107_v62 = vpack.c.bf16 %v6967_v31, %v6965_v18  ;;  %4279 = vmatpush1.bf16.msra.mxu0 %v6603_v16  ;;  %5894 = vmatprep.mubr.msk.bf16.mxu0 %vm479_vm0, %v6606_v10  ;;  %v6654_v52 = vld [vmem:[%s9101_s5 + $0x300] sm:$0xff]   ;;  %v6660_v18 = vld [vmem:[%s9101_s5 + $0x2b0] sm:$0xff]   ;;  %v6663_v31 = vld [vmem:[%s9101_s5 + $0x2e8] sm:$0xff]  }
 0x374   :  { %v6969_v37 = vpop.eup %6968  ;;  %4422 = vmatpush1.bf16.msra.mxu1 %v6607_v25  ;;  %4280 = vmatprep.subr.bf16.mxu0 %v9182_v11  ;;  %v6630_v61 = vld [vmem:[#allocation3 + $0x60] ss:$8 sps:$4 sm:$0xff]   ;;  %v6661_v38 = vld [vmem:[%s9101_s5 + $0x2f0] sm:$0xff]  }
 0x375   :  { %3628 = vst.msk [vmem:[#allocation3 + $0x80] sm:$0xff] %vm8502_vm6, %v6107_v62  ;;  %4423 = vmatprep.subr.bf16.mxu1 %v9182_v11  ;;  %v6662_v25 = vld [vmem:[%s9101_s5 + $0x2a8] sm:$0xff]   ;;  %v6664_v10 = vld [vmem:[%s9101_s5 + $0x2a0] sm:$0xff]  }
 0x376   :  { %v6971_v21 = vpop.eup %6970  ;;  %v6665_v62 = vld [vmem:[%s9101_s5 + $0x2e0] sm:$0xff]  }
 0x377   :  { %v6108_v39 = vpack.c.bf16 %v6971_v21, %v6969_v37  ;;  %4281 = vmatpush1.bf16.msra.mxu0 %v6608_v30  ;;  %v6666_v30 = vld [vmem:[%s9101_s5 + $0x298] sm:$0xff]   ;;  %v6669_v21 = vld [vmem:[%s9101_s5 + $0x2d0] sm:$0xff]  }
 0x378   :  { %v6973_v29 = vpop.eup %6972  ;;  %4424 = vmatpush1.bf16.msra.mxu1 %v6609_v35  ;;  %4282 = vmatprep.subr.bf16.mxu0 %v9182_v11  ;;  %v6626_v58 = vld [vmem:[#allocation3 + $0x74] ss:$8 sps:$4 sm:$0xff]   ;;  %v6624_v44 = vld [vmem:[#allocation3 + $0x70] ss:$8 sps:$4 sm:$0xff]  }
 0x379   :  { %3629 = vst.msk [vmem:[#allocation3 + $0x88] sm:$0xff] %vm8502_vm6, %v6108_v39  ;;  %4425 = vmatprep.subr.bf16.mxu1 %v9182_v11  ;;  %v6667_v37 = vld [vmem:[%s9101_s5 + $0x2d8] sm:$0xff]   ;;  %v6668_v35 = vld [vmem:[%s9101_s5 + $0x290] sm:$0xff]   ;;  %v6670_v39 = vld [vmem:[%s9101_s5 + $0x288] sm:$0xff]  }
 0x37a   :  { %v6975_v17 = vpop.eup %6974 }
 0x37b   :  { %v6109_v27 = vpack.c.bf16 %v6975_v17, %v6973_v29  ;;  %4283 = vmatpush1.bf16.msra.mxu0 %v6610_v12  ;;  %v6671_v12 = vld [vmem:[%s9101_s5 + $0x318] sm:$0xff]   ;;  %v6672_v29 = vld [vmem:[%s9101_s5 + $0x280] sm:$0xff]   ;;  %v6674_v17 = vld [vmem:[%s9101_s5 + $0x2c8] sm:$0xff]  }
 0x37c   :  { %v6977_v34 = vpop.eup %6976  ;;  %4426 = vmatpush1.bf16.msra.mxu1 %v6611_v13  ;;  %4284 = vmatprep.subr.bf16.mxu0 %v9182_v11  ;;  %v6673_v13 = vld [vmem:[%s9101_s5 + $0x310] sm:$0xff]  }
 0x37d   :  { %3630 = vst.msk [vmem:[#allocation3 + $0x90] sm:$0xff] %vm8502_vm6, %v6109_v27  ;;  %4427 = vmatprep.subr.bf16.mxu1 %v9182_v11 }
 0x37e   :  { %v6979_v46 = vpop.eup %6978 }
 0x37f   :  { %v6110_v6 = vpack.c.bf16 %v6979_v46, %v6977_v34  ;;  %4285 = vmatpush1.bf16.msra.mxu0 %v6612_v48  ;;  %v6675_v48 = vld [vmem:[%s9101_s5 + $0x2c0] sm:$0xff]  }
 0x380   :  { %4428 = vmatpush1.bf16.msra.mxu1 %v6613_v23  ;;  %4286 = vmatprep.subr.bf16.mxu0 %v9182_v11  ;;  %v6658_v16 = vld [vmem:[#allocation3 + $0x84] ss:$8 sps:$4 sm:$0xff]   ;;  %v6656_v34 = vld [vmem:[#allocation3 + $0x80] ss:$8 sps:$4 sm:$0xff]  }
 0x381   :  { %3631 = vst.msk [vmem:[#allocation3 + $0x98] sm:$0xff] %vm8502_vm6, %v6110_v6  ;;  %4429 = vmatprep.subr.bf16.mxu1 %v9182_v11 }
 0x383   :  { %4287 = vmatpush1.bf16.msra.mxu0 %v6614_v14 }
 0x384   :  { %4430 = vmatpush1.bf16.msra.mxu1 %v6615_v7  ;;  %4288 = vmatprep.subr.bf16.mxu0 %v9182_v11 }
 0x385   :  { %4431 = vmatprep.subr.bf16.mxu1 %v9182_v11 }
 0x387   :  { %4289 = vmatpush1.bf16.msra.mxu0 %v6616_v26 }
 0x388   :  { %4432 = vmatpush1.bf16.msra.mxu1 %v6617_v2  ;;  %4290 = vmatprep.subr.bf16.mxu0 %v9182_v11  ;;  %v6652_v43 = vld [vmem:[#allocation3 + $0x94] ss:$8 sps:$4 sm:$0xff]   ;;  %v6650_v27 = vld [vmem:[#allocation3 + $0x90] ss:$8 sps:$4 sm:$0xff]  }
 0x389   :  { %4445 = vmatprep.subr.bf16.mxu1 %v9182_v11 }
 0x38b   :  { %4291 = vmatpush1.bf16.msra.mxu0 %v6618_v20 }
 0x38c   :  { %4446 = vmatpush2.bf16.msra.mxu1 %v6619_v28  ;;  %4292 = vmatprep.subr.bf16.mxu0 %v9182_v11 }
 0x38d   :  { %4447 = vmatprep.subr.bf16.mxu1 %v9182_v11 }
 0x38f   :  { %4293 = vmatpush1.bf16.msra.mxu0 %v6620_v60 }
 0x390   :  { %4448 = vmatpush2.bf16.msra.mxu1 %v6621_v32  ;;  %4306 = vmatprep.subr.bf16.mxu0 %v9182_v11  ;;  %v5042_v32 = vld [vmem:[%s9103_s7 + $0x78] sm:$0xff] }
 0x391   :  { %4695 = vmatprep.subr.bf16.mxu1 %v9182_v11 }
 0x393   :  { %4450 = vmatmul.mubr.bf16.vlgmr.msra.gmra.mxu1 %v6598_v15  ;;  %4307 = vmatpush2.bf16.msra.mxu0 %v6622_v0  ;;  %v5040_v0 = vld [vmem:[%s9103_s7 + $0x68] sm:$0xff] }
 0x394   :  { %4696 = vmatpush1.bf16.msra.mxu1 %v6623_v3  ;;  %5993 = vmatprep.mubr.msk.bf16.mxu1 %vm479_vm0, %v6626_v58  ;;  %v5039_v3 = vld [vmem:[%s9103_s7 + $0x60] sm:$0xff]  ;;  %v5038_v58 = vld [vmem:[%s9103_s7 + $0x58] sm:$0xff] }
 0x395   :  { %4308 = vmatprep.subr.bf16.mxu0 %v9182_v11  ;;  %4697 = vmatprep.subr.bf16.mxu1 %v9182_v11 }
 0x397   :  { %4309 = vmatpush2.bf16.msra.mxu0 %v6627_v24 }
 0x398   :  { %4698 = vmatpush1.bf16.msra.mxu1 %v6628_v50  ;;  %4556 = vmatprep.subr.bf16.mxu0 %v9182_v11  ;;  %v5037_v50 = vld [vmem:[%s9103_s7 + $0x50] sm:$0xff] }
 0x399   :  { %4699 = vmatprep.subr.bf16.mxu1 %v9182_v11 }
 0x39a   :  { %4311 = vmatmul.mubr.bf16.vlgmr.msra.gmra.mxu0 %v6604_v42  ;;  %v5036_v42 = vld [vmem:[%s9103_s7 + $0x48] sm:$0xff] }
 0x39b   :  { %4557 = vmatpush1.bf16.msra.mxu0 %v6629_v9  ;;  %5960 = vmatprep.mubr.msk.bf16.mxu0 %vm479_vm0, %v6632_v56  ;;  %v5035_v56 = vld [vmem:[%s9103_s7 + $0x40] sm:$0xff] }
 0x39c   :  { %4700 = vmatpush1.bf16.msra.mxu1 %v6633_v63  ;;  %4558 = vmatprep.subr.bf16.mxu0 %v9182_v11 }
 0x39d   :  { %4701 = vmatprep.subr.bf16.mxu1 %v9182_v11 }
 0x39f   :  { %4559 = vmatpush1.bf16.msra.mxu0 %v6634_v8 }
 0x3a0   :  { %4702 = vmatpush1.bf16.msra.mxu1 %v6635_v4  ;;  %4560 = vmatprep.subr.bf16.mxu0 %v9182_v11 }
 0x3a1   :  { %4703 = vmatprep.subr.bf16.mxu1 %v9182_v11 }
 0x3a3   :  { %4561 = vmatpush1.bf16.msra.mxu0 %v6636_v33  ;;  %v5034_v33 = vld [vmem:[%s9103_s7 + $0x38] sm:$0xff] }
 0x3a4   :  { %4704 = vmatpush1.bf16.msra.mxu1 %v6637_v45  ;;  %4562 = vmatprep.subr.bf16.mxu0 %v9182_v11 }
 0x3a5   :  { %4705 = vmatprep.subr.bf16.mxu1 %v9182_v11 }
 0x3a7   :  { %4563 = vmatpush1.bf16.msra.mxu0 %v6638_v1 }
 0x3a8   :  { %4706 = vmatpush1.bf16.msra.mxu1 %v6639_v49  ;;  %4564 = vmatprep.subr.bf16.mxu0 %v9182_v11  ;;  %v5033_v49 = vld [vmem:[%s9103_s7 + $0x30] sm:$0xff] }
 0x3a9   :  { %4707 = vmatprep.subr.bf16.mxu1 %v9182_v11 }
 0x3ab   :  { %4565 = vmatpush1.bf16.msra.mxu0 %v6640_v51  ;;  %v5032_v51 = vld [vmem:[%s9103_s7 + $0x28] sm:$0xff] }
 0x3ac   :  { %4708 = vmatpush1.bf16.msra.mxu1 %v6641_v40  ;;  %4566 = vmatprep.subr.bf16.mxu0 %v9182_v11 }
 0x3ad   :  { %4709 = vmatprep.subr.bf16.mxu1 %v9182_v11 }
 0x3af   :  { %4567 = vmatpush1.bf16.msra.mxu0 %v6642_v59 }
 0x3b0   :  { %4710 = vmatpush1.bf16.msra.mxu1 %v6643_v41  ;;  %4568 = vmatprep.subr.bf16.mxu0 %v9182_v11  ;;  %v5031_v41 = vld [vmem:[%s9103_s7 + $0x20] sm:$0xff] }
 0x3b1   :  { %4723 = vmatprep.subr.bf16.mxu1 %v9182_v11 }
 0x3b3   :  { %4569 = vmatpush1.bf16.msra.mxu0 %v6644_v57 }
 0x3b4   :  { %4724 = vmatpush2.bf16.msra.mxu1 %v6645_v47  ;;  %4570 = vmatprep.subr.bf16.mxu0 %v9182_v11 }
 0x3b5   :  { %4725 = vmatprep.subr.bf16.mxu1 %v9182_v11 }
 0x3b7   :  { %4571 = vmatpush1.bf16.msra.mxu0 %v6646_v22  ;;  %v5030_v22 = vld [vmem:[%s9103_s7 + $0x18] sm:$0xff] }
 0x3b8   :  { %4726 = vmatpush2.bf16.msra.mxu1 %v6647_v5  ;;  %4584 = vmatprep.subr.bf16.mxu0 %v9182_v11  ;;  %v5029_v5 = vld [vmem:[%s9103_s7 + $0x10] sm:$0xff] }
 0x3b9   :  { %4973 = vmatprep.subr.bf16.mxu1 %v9182_v11 }
 0x3bb   :  { %4728 = vmatmul.mubr.bf16.vlgmr.msra.gmra.mxu1 %v6624_v44  ;;  %4585 = vmatpush2.bf16.msra.mxu0 %v6648_v54  ;;  %v5028_v54 = vld [vmem:[%s9103_s7 + $0x8] sm:$0xff]  ;;  %v5142_v44 = vld [vmem:[%s9104_s9 + $0x78] sm:$0xff] }
 0x3bc   :  { %4974 = vmatpush1.bf16.msra.mxu1 %v6649_v53  ;;  %6059 = vmatprep.mubr.msk.bf16.mxu1 %vm479_vm0, %v6652_v43  ;;  %v5027_v53 = vld [vmem:[%s9103_s7] sm:$0xff]  ;;  %v5141_v43 = vld [vmem:[%s9104_s9 + $0x70] sm:$0xff] }
 0x3bd   :  { %4586 = vmatprep.subr.bf16.mxu0 %v9182_v11  ;;  %4975 = vmatprep.subr.bf16.mxu1 %v9182_v11 }
 0x3bf   :  { %4587 = vmatpush2.bf16.msra.mxu0 %v6653_v55  ;;  %v5140_v55 = vld [vmem:[%s9104_s9 + $0x68] sm:$0xff] }
 0x3c0   :  { %4976 = vmatpush1.bf16.msra.mxu1 %v6654_v52  ;;  %4834 = vmatprep.subr.bf16.mxu0 %v9182_v11  ;;  %v5139_v52 = vld [vmem:[%s9104_s9 + $0x60] sm:$0xff] }
 0x3c1   :  { %4977 = vmatprep.subr.bf16.mxu1 %v9182_v11 }
 0x3c2   :  { %4589 = vmatmul.mubr.bf16.vlgmr.msra.gmra.mxu0 %v6630_v61  ;;  %v5137_v61 = vld [vmem:[%s9104_s9 + $0x50] sm:$0xff] }
 0x3c3   :  { %4835 = vmatpush1.bf16.msra.mxu0 %v6655_v19  ;;  %6026 = vmatprep.mubr.msk.bf16.mxu0 %vm479_vm0, %v6658_v16  ;;  %v5138_v19 = vld [vmem:[%s9104_s9 + $0x58] sm:$0xff] }
 0x3c4   :  { %4978 = vmatpush1.bf16.msra.mxu1 %v6659_v36  ;;  %4836 = vmatprep.subr.bf16.mxu0 %v9182_v11 }
 0x3c5   :  { %4979 = vmatprep.subr.bf16.mxu1 %v9182_v11 }
 0x3c7   :  { %4837 = vmatpush1.bf16.msra.mxu0 %v6660_v18 }
 0x3c8   :  { %4980 = vmatpush1.bf16.msra.mxu1 %v6661_v38  ;;  %4838 = vmatprep.subr.bf16.mxu0 %v9182_v11 }
 0x3c9   :  { %4981 = vmatprep.subr.bf16.mxu1 %v9182_v11 }
 0x3cb   :  { %4839 = vmatpush1.bf16.msra.mxu0 %v6662_v25 }
 0x3cc   :  { %4982 = vmatpush1.bf16.msra.mxu1 %v6663_v31  ;;  %4840 = vmatprep.subr.bf16.mxu0 %v9182_v11 }
 0x3cd   :  { %4983 = vmatprep.subr.bf16.mxu1 %v9182_v11 }
 0x3cf   :  { %4841 = vmatpush1.bf16.msra.mxu0 %v6664_v10 }
 0x3d0   :  { %4984 = vmatpush1.bf16.msra.mxu1 %v6665_v62  ;;  %4842 = vmatprep.subr.bf16.mxu0 %v9182_v11 }
 0x3d1   :  { %4985 = vmatprep.subr.bf16.mxu1 %v9182_v11 }
 0x3d3   :  { %4843 = vmatpush1.bf16.msra.mxu0 %v6666_v30 }
 0x3d4   :  { %4986 = vmatpush1.bf16.msra.mxu1 %v6667_v37  ;;  %4844 = vmatprep.subr.bf16.mxu0 %v9182_v11 }
 0x3d5   :  { %4987 = vmatprep.subr.bf16.mxu1 %v9182_v11 }
 0x3d7   :  { %4845 = vmatpush1.bf16.msra.mxu0 %v6668_v35 }
 0x3d8   :  { %4988 = vmatpush1.bf16.msra.mxu1 %v6669_v21  ;;  %4846 = vmatprep.subr.bf16.mxu0 %v9182_v11 }
 0x3d9   :  { %5001 = vmatprep.subr.bf16.mxu1 %v9182_v11 }
 0x3db   :  { %4847 = vmatpush1.bf16.msra.mxu0 %v6670_v39 }
 0x3dc   :  { %5002 = vmatpush2.bf16.msra.mxu1 %v6671_v12  ;;  %4848 = vmatprep.subr.bf16.mxu0 %v9182_v11 }
 0x3dd   :  { %5003 = vmatprep.subr.bf16.mxu1 %v9182_v11 }
 0x3df   :  { %4849 = vmatpush1.bf16.msra.mxu0 %v6672_v29 }
 0x3e0   :  { %5004 = vmatpush2.bf16.msra.mxu1 %v6673_v13  ;;  %4862 = vmatprep.subr.bf16.mxu0 %v9182_v11 }
 0x3e1   :  { %6182 = vmatprep.subr.mxu1 %v5142_v44 }
 0x3e3   :  { %5006 = vmatmul.mubr.bf16.vlgmr.msra.gmra.mxu1 %v6650_v27  ;;  %4863 = vmatpush2.bf16.msra.mxu0 %v6674_v17 }
 0x3e4   :  { %4864 = vmatprep.subr.bf16.mxu0 %v9182_v11  ;;  %v5041_v11 = vld [vmem:[%s9103_s7 + $0x70] sm:$0xff]  ;;  %6183 = vmatpush3.msra.mxu1 %v5142_v44 }
 0x3e5   :  { %6184 = vmatprep.subr.mxu1 %v5141_v43 }
 0x3e6   :  { %6185 = vmatpush3.msra.mxu1 %v5141_v43  ;;  %v6062_v43 = vld [vmem:[%s9107_s10] ss:$0 sm:$0xff] }
 0x3e7   :  { %4865 = vmatpush2.bf16.msra.mxu0 %v6675_v48  ;;  %6186 = vmatprep.subr.mxu1 %v5140_v55 }
 0x3e8   :  { %6147 = vmatprep.subr.mxu0 %v5042_v32  ;;  %6187 = vmatpush3.msra.mxu1 %v5140_v55 }
 0x3e9   :  { %6188 = vmatprep.subr.mxu1 %v5139_v52 }
 0x3ea   :  { %4867 = vmatmul.mubr.bf16.vlgmr.msra.gmra.mxu0 %v6656_v34  ;;  %6189 = vmatpush3.msra.mxu1 %v5139_v52 }
 0x3eb   :  { %6148 = vmatpush3.msra.mxu0 %v5042_v32  ;;  %6190 = vmatprep.subr.mxu1 %v5138_v19 }
 0x3ec   :  { %6149 = vmatprep.subr.mxu0 %v5041_v11  ;;  %6191 = vmatpush3.msra.mxu1 %v5138_v19 }
 0x3ed   :  { %6150 = vmatpush3.msra.mxu0 %v5041_v11  ;;  %6192 = vmatprep.subr.mxu1 %v5137_v61 }
 0x3ee   :  { %6151 = vmatprep.subr.mxu0 %v5040_v0  ;;  %6193 = vmatpush3.msra.mxu1 %v5137_v61 }
 0x3ef   :  { %6152 = vmatpush3.msra.mxu0 %v5040_v0 }
 0x3f0   :  { %6153 = vmatprep.subr.mxu0 %v5039_v3 }
 0x3f1   :  { %6154 = vmatpush3.msra.mxu0 %v5039_v3 }
 0x3f2   :  { %6155 = vmatprep.subr.mxu0 %v5038_v58 }
 0x3f3   :  { %6156 = vmatpush3.msra.mxu0 %v5038_v58 }
 0x3f4   :  { %6157 = vmatprep.subr.mxu0 %v5037_v50 }
 0x3f5   :  { %6158 = vmatpush3.msra.mxu0 %v5037_v50 }
 0x3f6   :  { %6159 = vmatprep.subr.mxu0 %v5036_v42 }
 0x3f7   :  { %6160 = vmatpush3.msra.mxu0 %v5036_v42 }
 0x3f8   :  { %6161 = vmatprep.subr.mxu0 %v5035_v56 }
 0x3f9   :  { %6162 = vmatpush3.msra.mxu0 %v5035_v56  ;;  %v5136_v56 = vld [vmem:[%s9104_s9 + $0x48] sm:$0xff] }
 0x3fa   :  { %6163 = vmatprep.subr.mxu0 %v5034_v33  ;;  %6194 = vmatprep.subr.mxu1 %v5136_v56 }
 0x3fb   :  { %6164 = vmatpush3.msra.mxu0 %v5034_v33  ;;  %6195 = vmatpush3.msra.mxu1 %v5136_v56  ;;  %v5133_v33 = vld [vmem:[%s9104_s9 + $0x30] sm:$0xff] }
 0x3fc   :  { %6165 = vmatprep.subr.mxu0 %v5033_v49 }
 0x3fd   :  { %6166 = vmatpush3.msra.mxu0 %v5033_v49  ;;  %v5130_v49 = vld [vmem:[%s9104_s9 + $0x18] sm:$0xff] }
 0x3fe   :  { %6167 = vmatprep.subr.mxu0 %v5032_v51 }
 0x3ff   :  { %6168 = vmatpush3.msra.mxu0 %v5032_v51  ;;  %v5129_v51 = vld [vmem:[%s9104_s9 + $0x10] sm:$0xff] }
 0x400   :  { %6169 = vmatprep.subr.mxu0 %v5031_v41 }
 0x401   :  { %6170 = vmatpush3.msra.mxu0 %v5031_v41  ;;  %v6061_v41 = vld [vmem:[%s9106_s8] ss:$0 sm:$0xff] }
 0x402   :  { %v3897_v23 = vpop.f32.mrf.mxu1  ;;  %6171 = vmatprep.subr.mxu0 %v5030_v22 }
 0x403   :  { %6172 = vmatpush3.msra.mxu0 %v5030_v22 }
 0x404   :  { %v3899_v46 = vpop.f32.mrf.mxu1  ;;  %6173 = vmatprep.subr.mxu0 %v5029_v5 }
 0x405   :  { %6174 = vmatpush3.msra.mxu0 %v5029_v5 }
 0x406   :  { %v3900_v6 = vpop.f32.mrf.mxu1  ;;  %6175 = vmatprep.subr.mxu0 %v5028_v54 }
 0x407   :  { %6176 = vmatpush3.msra.mxu0 %v5028_v54 }
 0x408   :  { %v3902_v14 = vpop.f32.mrf.mxu1  ;;  %6177 = vmatprep.subr.mxu0 %v5027_v53 }
 0x409   :  { %6178 = vmatpush3.msra.mxu0 %v5027_v53 }
 0x40a   :  { %v3784_v7 = vpop.f32.mrf.mxu0 }
 0x40b   :  { %v3898_v26 = vadd.f32 %v3897_v23, %v3784_v7 }
 0x40c   :  { %v3786_v2 = vpop.f32.mrf.mxu0 }
 0x40e   :  { %v3787_v20 = vpop.f32.mrf.mxu0 }
 0x40f   :  { %v3901_v28 = vadd.f32 %v3900_v6, %v3787_v20 }
 0x410   :  { %v3789_v60 = vpop.f32.mrf.mxu0 }
 0x411   :  { %v6060_v60 = vld [vmem:[%s9105_s6] ss:$0 sm:$0xff] }
 0x42a   :  { %v4173_v15 = vpop.f32.mrf.mxu1 }
 0x42c   :  { %v4175_v24 = vpop.f32.mrf.mxu1 }
 0x42e   :  { %v4176_v9 = vpop.f32.mrf.mxu1 }
 0x430   :  { %v4178_v63 = vpop.f32.mrf.mxu1 }
 0x432   :  { %v4034_v8 = vpop.f32.mrf.mxu0 }
 0x433   :  { %v4041_v4 = vadd.f32 %v4034_v8, %v3898_v26  ;;  %v5135_v8 = vld [vmem:[%s9104_s9 + $0x40] sm:$0xff] }
 0x434   :  { %v4036_v45 = vpop.f32.mrf.mxu0  ;;  %6196 = vmatprep.subr.mxu1 %v5135_v8 }
 0x435   :  { %v4180_v1 = vadd.f32 %v4173_v15, %v4041_v4  ;;  %6197 = vmatpush3.msra.mxu1 %v5135_v8  ;;  %v5134_v4 = vld [vmem:[%s9104_s9 + $0x38] sm:$0xff]  ;;  %v5132_v45 = vld [vmem:[%s9104_s9 + $0x28] sm:$0xff] }
 0x436   :  { %v4037_v40 = vpop.f32.mrf.mxu0  ;;  %6198 = vmatprep.subr.mxu1 %v5134_v4 }
 0x437   :  { %v4042_v59 = vadd.f32 %v4037_v40, %v3901_v28  ;;  %6199 = vmatpush3.msra.mxu1 %v5134_v4  ;;  %v5128_v40 = vld [vmem:[%s9104_s9 + $0x8] sm:$0xff] }
 0x438   :  { %v4039_v57 = vpop.f32.mrf.mxu0  ;;  %6200 = vmatprep.subr.mxu1 %v5133_v33 }
 0x439   :  { %v4181_v47 = vadd.f32 %v4176_v9, %v4042_v59  ;;  %6201 = vmatpush3.msra.mxu1 %v5133_v33  ;;  %v5127_v59 = vld [vmem:[%s9104_s9] sm:$0xff] }
 0x43a   :  { %6202 = vmatprep.subr.mxu1 %v5132_v45 }
 0x43b   :  { %6203 = vmatpush3.msra.mxu1 %v5132_v45 }
 0x453   :  { %v4451_v36 = vpop.f32.mrf.mxu1 }
 0x455   :  { %v4453_v16 = vpop.f32.mrf.mxu1 }
 0x457   :  { %v4454_v18 = vpop.f32.mrf.mxu1 }
 0x459   :  { %v4456_v38 = vpop.f32.mrf.mxu1 }
 0x45a   :  { %v4312_v25 = vpop.f32.mrf.mxu0 }
 0x45b   :  { %v4319_v31 = vadd.f32 %v4312_v25, %v4180_v1  ;;  %v5131_v1 = vld [vmem:[%s9104_s9 + $0x20] sm:$0xff] }
 0x45c   :  { %v4314_v10 = vpop.f32.mrf.mxu0  ;;  %6204 = vmatprep.subr.mxu1 %v5131_v1 }
 0x45d   :  { %v4458_v62 = vadd.f32 %v4451_v36, %v4319_v31  ;;  %6205 = vmatpush3.msra.mxu1 %v5131_v1 }
 0x45e   :  { %v4315_v30 = vpop.f32.mrf.mxu0  ;;  %6206 = vmatprep.subr.mxu1 %v5130_v49 }
 0x45f   :  { %v4320_v37 = vadd.f32 %v4315_v30, %v4181_v47  ;;  %6207 = vmatpush3.msra.mxu1 %v5130_v49 }
 0x460   :  { %v4317_v35 = vpop.f32.mrf.mxu0  ;;  %6208 = vmatprep.subr.mxu1 %v5129_v51 }
 0x461   :  { %v4459_v21 = vadd.f32 %v4454_v18, %v4320_v37  ;;  %6209 = vmatpush3.msra.mxu1 %v5129_v51 }
 0x462   :  { %6210 = vmatprep.subr.mxu1 %v5128_v40 }
 0x463   :  { %6211 = vmatpush3.msra.mxu1 %v5128_v40 }
 0x464   :  { %6212 = vmatprep.subr.mxu1 %v5127_v59 }
 0x465   :  { %6213 = vmatpush3.msra.mxu1 %v5127_v59 }
 0x47b   :  { %v4729_v39 = vpop.f32.mrf.mxu1 }
 0x47d   :  { %v4731_v12 = vpop.f32.mrf.mxu1 }
 0x47f   :  { %v4732_v29 = vpop.f32.mrf.mxu1 }
 0x481   :  { %v4734_v13 = vpop.f32.mrf.mxu1 }
 0x482   :  { %v4590_v17 = vpop.f32.mrf.mxu0 }
 0x483   :  { %v4597_v46 = vadd.f32 %v4590_v17, %v4458_v62 }
 0x484   :  { %v4592_v27 = vpop.f32.mrf.mxu0 }
 0x485   :  { %v4736_v2 = vadd.f32 %v4729_v39, %v4597_v46 }
 0x486   :  { %v4593_v48 = vpop.f32.mrf.mxu0 }
 0x487   :  { %v4598_v7 = vadd.f32 %v4593_v48, %v4459_v21 }
 0x488   :  { %v4595_v34 = vpop.f32.mrf.mxu0 }
 0x489   :  { %v4737_v0 = vadd.f32 %v4732_v29, %v4598_v7 }
 0x4a3   :  { %v5007_v23 = vpop.f32.mrf.mxu1 }
 0x4a5   :  { %v5009_v6 = vpop.f32.mrf.mxu1 }
 0x4a7   :  { %v5010_v14 = vpop.f32.mrf.mxu1 }
 0x4a9   :  { %v5012_v26 = vpop.f32.mrf.mxu1 }
 0x4aa   :  { %v4868_v20 = vpop.f32.mrf.mxu0 }
 0x4ab   :  { %v4875_v28 = vadd.f32 %v4868_v20, %v4736_v2 }
 0x4ac   :  { %v4870_v32 = vpop.f32.mrf.mxu0 }
 0x4ad   :  { %v5014_v11 = vadd.f32 %v5007_v23, %v4875_v28 }
 0x4ae   :  { %v4871_v3 = vpop.f32.mrf.mxu0 }
 0x4af   :  { %v5023_v15 = vadd.f32 %v6060_v60, %v5014_v11  ;;  %v4876_v58 = vadd.f32 %v4871_v3, %v4737_v0 }
 0x4b0   :  { %v4873_v24 = vpop.f32.mrf.mxu0 }
 0x4b1   :  { %6980 = vtanh.f32 %v5023_v15  ;;  %v5015_v50 = vadd.f32 %v5010_v14, %v4876_v58 }
 0x4b3   :  { %v5024_v9 = vadd.f32 %v6060_v60, %v5015_v50 }
 0x4b5   :  { %6982 = vtanh.f32 %v5024_v9 }
 0x4be   :  { %v6981_v42 = vpop.eup %6980 }
 0x4bf   :  { %6179 = vmatprep.mubr.f32.mxu0 %v6981_v42 }
 0x4c2   :  { %v6983_v63 = vpop.eup %6982 }
 0x4c3   :  { %6180 = vmatmul.mubr.f32.vlgmr.msra.gmra.mxu0 %v6983_v63 }
 0x583   :  { %v6181_v57 = vpop.f32.mrf.mxu0 }
 0x584   :  { %v5122_v47 = vadd.f32 %v6181_v57, %v6061_v41 }
 0x585   :  { %v5116_v22 = vpop.f32.mrf.mxu0 }
 0x586   :  { %v5117_v5 = vadd.f32 %v6061_v41, %v5116_v22 }
 0x588   :  { %6984 = vtanh.f32 %v5117_v5 }
 0x589   :  { %6986 = vtanh.f32 %v5122_v47 }
 0x595   :  { %v6985_v54 = vpop.eup %6984 }
 0x596   :  { %v6987_v53 = vpop.eup %6986  ;;  %6214 = vmatprep.mubr.f32.mxu1 %v6985_v54 }
 0x597   :  { %6215 = vmatmul.mubr.f32.vlgmr.msra.gmra.mxu1 %v6987_v53 }
 0x657   :  { %v6216_v44 = vpop.f32.mrf.mxu1 }
 0x658   :  { %v5222_v19 = vadd.f32 %v6216_v44, %v6062_v43 }
 0x659   :  { %v5216_v55 = vpop.f32.mrf.mxu1 }
 0x65a   :  { %v5217_v52 = vadd.f32 %v6062_v43, %v5216_v55 }
 0x65c   :  { %5225 = vmax.xlane.f32.xlu0 %v5217_v52 }
 0x660   :  { %5227 = vmax.xlane.f32.xlu0 %v5222_v19 }
 0x6e5   :  { %v5226_v61 = vpop.xlane.xlu0 %5225 }
 0x6e6   :  { %v5229_v36 = vsub.f32 %v5217_v52, %v5226_v61 }
 0x6e8   :  { %v5231_v16 = vmul.f32 1.442695, %v5229_v36 }
 0x6e9   :  { %v5228_v18 = vpop.xlane.xlu0 %5227 }
 0x6ea   :  { %6988 = vpow2.f32 %v5231_v16  ;;  %v5230_v38 = vsub.f32 %v5222_v19, %v5228_v18 }
 0x6ec   :  { %v5233_v25 = vmul.f32 1.442695, %v5230_v38 }
 0x6ee   :  { %6990 = vpow2.f32 %v5233_v25 }
 0x6f7   :  { %v6989_v31 = vpop.eup %6988 }
 0x6f8   :  { %5235 = vadd.xlane.f32.xlu1 %v6989_v31 }
 0x6fb   :  { %v6991_v10 = vpop.eup %6990 }
 0x6fc   :  { %5237 = vadd.xlane.f32.xlu1 %v6991_v10 }
 0x781   :  { %v5236_v62 = vpop.xlane.xlu1 %5235 }
 0x782   :  { %6992 = vrcp.f32 %v5236_v62 }
 0x785   :  { %v5238_v30 = vpop.xlane.xlu1 %5237 }
 0x786   :  { %6994 = vrcp.f32 %v5238_v30 }
 0x78f   :  { %v6993_v37 = vpop.eup %6992 }
 0x790   :  { %v5240_v35 = vmul.f32 %v6993_v37, %v6989_v31 }
 0x792   :  { %5243 = vst [vmem:[%s9108_s11] sm:$0xff] %v5240_v35 }
 0x793   :  { %v6995_v21 = vpop.eup %6994 }
 0x794   :  { %v5242_v39 = vmul.f32 %v6995_v21, %v6991_v10 }
 0x796   :  { %5244 = vst [vmem:[%s9108_s11 + $0x8] sm:$0xff] %v5242_v39 }

</bundles_post_ra>
